<compile_context>
chip_gen: v5e
topology: v5e:2x2
jax: 0.10.0
libtpu: 0.0.40
codegen_flags: <defaults>
</compile_context>

<pallas_src>
import jax
import jax.numpy as jnp
from jax.experimental import pallas as pl
from jax.experimental.pallas import tpu as pltpu


def _round_up(x, m):
    return ((x + m - 1) // m) * m


def _two_channel_mlp_kernel(h_ref, l_ref,
                            w1h_ref, w1l_ref, b1_ref,
                            w2_ref, b2_ref,
                            w3_ref, b3_ref,
                            w4_ref, b4_ref,
                            o_ref):
    """Fused concat + 4-layer MLP for one batch tile.

    All matmuls feed the MXU in the weight dtype (bf16) with f32 accumulation;
    bias add / ReLU epilogues are f32 on the VPU.
    """
    cdtype = w1h_ref.dtype                                   # MXU operand dtype
    h = h_ref[...].astype(cdtype)                            # (tb, D)
    l = l_ref[...].astype(cdtype)                            # (tb, D)

    # Layer 1: cat([h, l]) @ W1 == h @ W1[:D] + l @ W1[D:]
    y = jnp.dot(h, w1h_ref[...], preferred_element_type=jnp.float32)
    y = y + jnp.dot(l, w1l_ref[...], preferred_element_type=jnp.float32)
    y = jnp.maximum(y + b1_ref[...], 0.0)                    # (tb, H1) f32

    # Layer 2
    y = jnp.dot(y.astype(cdtype), w2_ref[...], preferred_element_type=jnp.float32)
    y = jnp.maximum(y + b2_ref[...], 0.0)                    # (tb, H2) f32

    # Layer 3
    y = jnp.dot(y.astype(cdtype), w3_ref[...], preferred_element_type=jnp.float32)
    y = jnp.maximum(y + b3_ref[...], 0.0)                    # (tb, H3) f32

    # Layer 4: logits (no activation)
    y = jnp.dot(y.astype(cdtype), w4_ref[...], preferred_element_type=jnp.float32)
    y = y + b4_ref[...]                                      # (tb, C) f32

    o_ref[...] = y.astype(o_ref.dtype)


def two_channel_classifier_forward(h1, l1,
                                   w1h, w1l, b1, w2, b2, w3, b3, w4, b4,
                                   *, batch_tile=128, out_dtype=jnp.float32):
    """logits = classifier(cat([h1, l1], axis=1)).

    h1, l1 : (B, D) encoder features (last token of each channel).
    w1h/w1l: (D, H1)  halves of the first Linear weight, stored [in, out].
    w2     : (H1, H2), w3: (H2, H3), w4: (H3, C) — all stored [in, out].
    b*     : 1-D biases.
    """
    B, D = h1.shape
    H1 = w1h.shape[1]
    H2 = w2.shape[1]
    H3 = w3.shape[1]
    C = w4.shape[1]

    # Biases as (1, N) f32 rows (lane-aligned, f32 epilogue).
    b1r = b1.reshape(1, H1).astype(jnp.float32)
    b2r = b2.reshape(1, H2).astype(jnp.float32)
    b3r = b3.reshape(1, H3).astype(jnp.float32)
    b4r = b4.reshape(1, C).astype(jnp.float32)

    # --- batch tiling: cdiv grid + zero-padding (no divisibility assert) ---
    tb = _round_up(min(batch_tile, _round_up(B, 8)), 8)
    n_tiles = pl.cdiv(B, tb)
    b_pad = n_tiles * tb
    if b_pad != B:
        h1 = jnp.pad(h1, ((0, b_pad - B), (0, 0)))
        l1 = jnp.pad(l1, ((0, b_pad - B), (0, 0)))

    # --- advisory cost estimate so XLA overlaps the producers of h1/l1 ---
    out_itemsize = jnp.dtype(out_dtype).itemsize
    flops = 2 * b_pad * (2 * D * H1 + H1 * H2 + H2 * H3 + H3 * C)
    bytes_accessed = (h1.nbytes + l1.nbytes
                      + w1h.nbytes + w1l.nbytes + w2.nbytes + w3.nbytes + w4.nbytes
                      + b1r.nbytes + b2r.nbytes + b3r.nbytes + b4r.nbytes
                      + b_pad * C * out_itemsize)
    cost = pl.CostEstimate(flops=flops, transcendentals=0,
                           bytes_accessed=bytes_accessed)

    # --- explicit VMEM budget (tightest constraint is v7x's 64 MiB) ---
    resident_bytes = (2 * tb * D * h1.dtype.itemsize           # h/l tiles
                      + w1h.nbytes + w1l.nbytes + w2.nbytes + w3.nbytes + w4.nbytes
                      + b1r.nbytes + b2r.nbytes + b3r.nbytes + b4r.nbytes
                      + tb * C * out_itemsize)
    vmem_limit = int(max(16 << 20, min(2 * resident_bytes + (4 << 20), 48 << 20)))

    grid_spec = pltpu.PrefetchScalarGridSpec(
        num_scalar_prefetch=0,
        grid=(n_tiles,),
        in_specs=[
            pl.BlockSpec((tb, D), lambda i: (i, 0)),     # h tile   (pipelined)
            pl.BlockSpec((tb, D), lambda i: (i, 0)),     # l tile   (pipelined)
            pl.BlockSpec((D, H1), lambda i: (0, 0)),     # W1 h-half (resident)
            pl.BlockSpec((D, H1), lambda i: (0, 0)),     # W1 l-half (resident)
            pl.BlockSpec((1, H1), lambda i: (0, 0)),     # b1
            pl.BlockSpec((H1, H2), lambda i: (0, 0)),    # W2        (resident)
            pl.BlockSpec((1, H2), lambda i: (0, 0)),     # b2
            pl.BlockSpec((H2, H3), lambda i: (0, 0)),    # W3        (resident)
            pl.BlockSpec((1, H3), lambda i: (0, 0)),     # b3
            pl.BlockSpec((H3, C), lambda i: (0, 0)),     # W4        (resident)
            pl.BlockSpec((1, C), lambda i: (0, 0)),      # b4
        ],
        out_specs=pl.BlockSpec((tb, C), lambda i: (i, 0)),
    )

    out = pl.pallas_call(
        _two_channel_mlp_kernel,
        out_shape=jax.ShapeDtypeStruct((b_pad, C), out_dtype),
        grid_spec=grid_spec,
        compiler_params=pltpu.CompilerParams(
            dimension_semantics=("parallel",),     # megacore-shard batch tiles
            vmem_limit_bytes=vmem_limit),
        cost_estimate=cost,
    )(h1, l1, w1h, w1l, b1r, w2, b2r, w3, b3r, w4, b4r)

    return out[:B]


if __name__ == "__main__":
    # Small shapes consistent with the module: two mel spectrogram inputs,
    # encoder width D (= ln_post.normalized_shape[0]); classifier hidden dims
    # 1024/512/256 are fixed by the module, num_classes defaults to 1.
    B, n_mels, T, D, num_classes = 32, 16, 8, 64, 1
    H1, H2, H3 = 1024, 512, 256
    batch_tile = 16                      # -> grid of 2 parallel, pipelined steps
    param_dtype = jnp.bfloat16           # MXU operand dtype

    key = jax.random.PRNGKey(0)
    (k_m0, k_m1, k_enc, k_l1, k_l2, k_l3, k_l4) = jax.random.split(key, 7)

    mel_tensor_0 = jax.random.normal(k_m0, (B, n_mels, T), dtype=jnp.float32)
    mel_tensor_1 = jax.random.normal(k_m1, (B, n_mels, T), dtype=jnp.float32)

    # ---- stand-in encoder (plain JAX; the real encoder is an external module) ----
    # TODO(synk): encoder is an arbitrary external nn.Module; stand-in only.
    w_embed = jax.random.normal(k_enc, (n_mels, D), dtype=jnp.float32) / jnp.sqrt(
        jnp.float32(n_mels))
    ln_gamma = jnp.ones((D,), jnp.float32)
    ln_beta = jnp.zeros((D,), jnp.float32)

    def standin_encoder(mel):
        tokens = jnp.einsum("bmt,md->btd", mel, w_embed)          # (B, T, D)
        mu = tokens.mean(-1, keepdims=True)
        var = tokens.var(-1, keepdims=True)
        tokens = (tokens - mu) * jax.lax.rsqrt(var + 1e-5)
        return tokens * ln_gamma + ln_beta                        # ~ ln_post

    output_h1 = standin_encoder(mel_tensor_0)[:, -1, :]           # (B, D)
    output_l1 = standin_encoder(mel_tensor_1)[:, -1, :]           # (B, D)

    # ---- classifier parameters (nn.Linear-style init), stored [in, out] ----
    def init_linear(k, fan_in, fan_out):
        kw, kb = jax.random.split(k)
        bound = 1.0 / jnp.sqrt(jnp.float32(fan_in))
        w = jax.random.uniform(kw, (fan_in, fan_out), jnp.float32, -bound, bound)
        b = jax.random.uniform(kb, (fan_out,), jnp.float32, -bound, bound)
        return w, b

    W1, b1 = init_linear(k_l1, 2 * D, H1)
    W2, b2 = init_linear(k_l2, H1, H2)
    W3, b3 = init_linear(k_l3, H2, H3)
    W4, b4 = init_linear(k_l4, H3, num_classes)

    # Split W1 into the halves that multiply h / l (folds away the concat),
    # and cast weights to the MXU operand dtype.
    w1h = W1[:D].astype(param_dtype)
    w1l = W1[D:].astype(param_dtype)
    w2p = W2.astype(param_dtype)
    w3p = W3.astype(param_dtype)
    w4p = W4.astype(param_dtype)

    logits = two_channel_classifier_forward(
        output_h1, output_l1,
        w1h, w1l, b1, w2p, b2, w3p, b3, w4p, b4,
        batch_tile=batch_tile)
    logits = jax.block_until_ready(logits)

    # ---- pure-JAX reference mirroring the same bf16-operand / f32-acc math ----
    def reference(h, l):
        x = jnp.concatenate([h, l], axis=1).astype(param_dtype)
        w1p = jnp.concatenate([w1h, w1l], axis=0)
        y = jnp.dot(x, w1p, preferred_element_type=jnp.float32) + b1
        y = jnp.maximum(y, 0.0)
        y = jnp.dot(y.astype(param_dtype), w2p, preferred_element_type=jnp.float32) + b2
        y = jnp.maximum(y, 0.0)
        y = jnp.dot(y.astype(param_dtype), w3p, preferred_element_type=jnp.float32) + b3
        y = jnp.maximum(y, 0.0)
        y = jnp.dot(y.astype(param_dtype), w4p, preferred_element_type=jnp.float32) + b4
        return y

    ref = reference(output_h1, output_l1)

    assert logits.shape == (B, num_classes), logits.shape
    assert jnp.allclose(logits, ref, atol=1e-2, rtol=1e-2), (
        float(jnp.max(jnp.abs(logits - ref))))

    print("KERNEL_OK")
</pallas_src>

<mosaic_0001>
module attributes {stable_mosaic.version = 11 : i64} {
  func.func @_two_channel_mlp_kernel(%arg0: i32, %arg1: memref<16x64xf32, #tpu.memory_space<vmem>>, %arg2: memref<16x64xf32, #tpu.memory_space<vmem>>, %arg3: memref<64x1024xbf16, #tpu.memory_space<vmem>>, %arg4: memref<64x1024xbf16, #tpu.memory_space<vmem>>, %arg5: memref<1x1024xf32, #tpu.memory_space<vmem>>, %arg6: memref<1024x512xbf16, #tpu.memory_space<vmem>>, %arg7: memref<1x512xf32, #tpu.memory_space<vmem>>, %arg8: memref<512x256xbf16, #tpu.memory_space<vmem>>, %arg9: memref<1x256xf32, #tpu.memory_space<vmem>>, %arg10: memref<256x1xbf16, #tpu.memory_space<vmem>>, %arg11: memref<1x1xf32, #tpu.memory_space<vmem>>, %arg12: memref<16x1xf32, #tpu.memory_space<vmem>>) attributes {dimension_semantics = [#tpu.dimension_semantics<parallel>], iteration_bounds = array<i64: 2>, scalar_prefetch = 0 : i64, scratch_operands = 0 : i64, tpu.core_type = #tpu.core_type<tc>, window_params = [{transform_indices = @transform_0, window_bounds = array<i64: 16, 64>}, {transform_indices = @transform_1, window_bounds = array<i64: 16, 64>}, {pipeline_mode = #tpu.pipeline_mode<synchronous>, transform_indices = @transform_2, window_bounds = array<i64: 64, 1024>}, {pipeline_mode = #tpu.pipeline_mode<synchronous>, transform_indices = @transform_3, window_bounds = array<i64: 64, 1024>}, {pipeline_mode = #tpu.pipeline_mode<synchronous>, transform_indices = @transform_4, window_bounds = array<i64: 1, 1024>}, {pipeline_mode = #tpu.pipeline_mode<synchronous>, transform_indices = @transform_5, window_bounds = array<i64: 1024, 512>}, {pipeline_mode = #tpu.pipeline_mode<synchronous>, transform_indices = @transform_6, window_bounds = array<i64: 1, 512>}, {pipeline_mode = #tpu.pipeline_mode<synchronous>, transform_indices = @transform_7, window_bounds = array<i64: 512, 256>}, {pipeline_mode = #tpu.pipeline_mode<synchronous>, transform_indices = @transform_8, window_bounds = array<i64: 1, 256>}, {pipeline_mode = #tpu.pipeline_mode<synchronous>, transform_indices = @transform_9, window_bounds = array<i64: 256, 1>}, {pipeline_mode = #tpu.pipeline_mode<synchronous>, transform_indices = @transform_10, window_bounds = array<i64: 1, 1>}, {transform_indices = @transform_11, window_bounds = array<i64: 16, 1>}]} {
    %c0 = arith.constant 0 : index
    %c0_0 = arith.constant 0 : index
    %0 = vector.load %arg1[%c0, %c0_0] : memref<16x64xf32, #tpu.memory_space<vmem>>, vector<16x64xf32>
    %1 = arith.truncf %0 : vector<16x64xf32> to vector<16x64xbf16>
    %c0_1 = arith.constant 0 : index
    %c0_2 = arith.constant 0 : index
    %2 = vector.load %arg2[%c0_1, %c0_2] : memref<16x64xf32, #tpu.memory_space<vmem>>, vector<16x64xf32>
    %3 = arith.truncf %2 : vector<16x64xf32> to vector<16x64xbf16>
    %c0_3 = arith.constant 0 : index
    %c0_4 = arith.constant 0 : index
    %4 = vector.load %arg3[%c0_3, %c0_4] : memref<64x1024xbf16, #tpu.memory_space<vmem>>, vector<64x1024xbf16>
    %cst = arith.constant dense<0.000000e+00> : vector<16x1024xf32>
    %5 = tpu.matmul %1, %4, %cst {dimension_numbers = #tpu.dot_dimension_numbers<[1], [0], [0], [1], [0, 0, 1, 1], [], []>} : vector<16x64xbf16>, vector<64x1024xbf16>, vector<16x1024xf32> -> vector<16x1024xf32>
    %c0_5 = arith.constant 0 : index
    %c0_6 = arith.constant 0 : index
    %6 = vector.load %arg4[%c0_5, %c0_6] : memref<64x1024xbf16, #tpu.memory_space<vmem>>, vector<64x1024xbf16>
    %cst_7 = arith.constant dense<0.000000e+00> : vector<16x1024xf32>
    %7 = tpu.matmul %3, %6, %cst_7 {dimension_numbers = #tpu.dot_dimension_numbers<[1], [0], [0], [1], [0, 0, 1, 1], [], []>} : vector<16x64xbf16>, vector<64x1024xbf16>, vector<16x1024xf32> -> vector<16x1024xf32>
    %8 = arith.addf %5, %7 : vector<16x1024xf32>
    %c0_8 = arith.constant 0 : index
    %c0_9 = arith.constant 0 : index
    %9 = vector.load %arg5[%c0_8, %c0_9] : memref<1x1024xf32, #tpu.memory_space<vmem>>, vector<1x1024xf32>
    %10 = vector.broadcast %9 : vector<1x1024xf32> to vector<16x1024xf32>
    %11 = arith.addf %8, %10 : vector<16x1024xf32>
    %cst_10 = arith.constant 0.000000e+00 : f32
    %12 = vector.broadcast %cst_10 : f32 to vector<16x1024xf32>
    %13 = arith.maximumf %11, %12 : vector<16x1024xf32>
    %14 = arith.truncf %13 : vector<16x1024xf32> to vector<16x1024xbf16>
    %c0_11 = arith.constant 0 : index
    %c0_12 = arith.constant 0 : index
    %15 = vector.load %arg6[%c0_11, %c0_12] : memref<1024x512xbf16, #tpu.memory_space<vmem>>, vector<1024x512xbf16>
    %cst_13 = arith.constant dense<0.000000e+00> : vector<16x512xf32>
    %16 = tpu.matmul %14, %15, %cst_13 {dimension_numbers = #tpu.dot_dimension_numbers<[1], [0], [0], [1], [0, 0, 1, 1], [], []>} : vector<16x1024xbf16>, vector<1024x512xbf16>, vector<16x512xf32> -> vector<16x512xf32>
    %c0_14 = arith.constant 0 : index
    %c0_15 = arith.constant 0 : index
    %17 = vector.load %arg7[%c0_14, %c0_15] : memref<1x512xf32, #tpu.memory_space<vmem>>, vector<1x512xf32>
    %18 = vector.broadcast %17 : vector<1x512xf32> to vector<16x512xf32>
    %19 = arith.addf %16, %18 : vector<16x512xf32>
    %cst_16 = arith.constant 0.000000e+00 : f32
    %20 = vector.broadcast %cst_16 : f32 to vector<16x512xf32>
    %21 = arith.maximumf %19, %20 : vector<16x512xf32>
    %22 = arith.truncf %21 : vector<16x512xf32> to vector<16x512xbf16>
    %c0_17 = arith.constant 0 : index
    %c0_18 = arith.constant 0 : index
    %23 = vector.load %arg8[%c0_17, %c0_18] : memref<512x256xbf16, #tpu.memory_space<vmem>>, vector<512x256xbf16>
    %cst_19 = arith.constant dense<0.000000e+00> : vector<16x256xf32>
    %24 = tpu.matmul %22, %23, %cst_19 {dimension_numbers = #tpu.dot_dimension_numbers<[1], [0], [0], [1], [0, 0, 1, 1], [], []>} : vector<16x512xbf16>, vector<512x256xbf16>, vector<16x256xf32> -> vector<16x256xf32>
    %c0_20 = arith.constant 0 : index
    %c0_21 = arith.constant 0 : index
    %25 = vector.load %arg9[%c0_20, %c0_21] : memref<1x256xf32, #tpu.memory_space<vmem>>, vector<1x256xf32>
    %26 = vector.broadcast %25 : vector<1x256xf32> to vector<16x256xf32>
    %27 = arith.addf %24, %26 : vector<16x256xf32>
    %cst_22 = arith.constant 0.000000e+00 : f32
    %28 = vector.broadcast %cst_22 : f32 to vector<16x256xf32>
    %29 = arith.maximumf %27, %28 : vector<16x256xf32>
    %30 = arith.truncf %29 : vector<16x256xf32> to vector<16x256xbf16>
    %c0_23 = arith.constant 0 : index
    %c0_24 = arith.constant 0 : index
    %31 = vector.load %arg10[%c0_23, %c0_24] : memref<256x1xbf16, #tpu.memory_space<vmem>>, vector<256x1xbf16>
    %cst_25 = arith.constant dense<0.000000e+00> : vector<16x1xf32>
    %32 = tpu.matmul %30, %31, %cst_25 {dimension_numbers = #tpu.dot_dimension_numbers<[1], [0], [0], [1], [0, 0, 1, 1], [], []>} : vector<16x256xbf16>, vector<256x1xbf16>, vector<16x1xf32> -> vector<16x1xf32>
    %c0_26 = arith.constant 0 : index
    %c0_27 = arith.constant 0 : index
    %33 = vector.load %arg11[%c0_26, %c0_27] : memref<1x1xf32, #tpu.memory_space<vmem>>, vector<1x1xf32>
    %34 = vector.broadcast %33 : vector<1x1xf32> to vector<16x1xf32>
    %35 = arith.addf %32, %34 : vector<16x1xf32>
    %c0_28 = arith.constant 0 : index
    %c0_29 = arith.constant 0 : index
    %36 = vector.load %arg12[%c0_28, %c0_29] : memref<16x1xf32, #tpu.memory_space<vmem>>, vector<16x1xf32>
    tpu.vector_store %arg12[%c0_28, %c0_29], %35 {strides = array<i32>} : memref<16x1xf32, #tpu.memory_space<vmem>>, vector<16x1xf32>,
    return
  }
  func.func @transform_0(%arg0: i32) -> (i32, i32) {
    %c0_i32 = arith.constant 0 : i32
    %c0_i32_0 = arith.constant 0 : i32
    return %arg0, %c0_i32 : i32, i32
  }
  func.func @transform_1(%arg0: i32) -> (i32, i32) {
    %c0_i32 = arith.constant 0 : i32
    %c0_i32_0 = arith.constant 0 : i32
    return %arg0, %c0_i32 : i32, i32
  }
  func.func @transform_2(%arg0: i32) -> (i32, i32) {
    %c0_i32 = arith.constant 0 : i32
    %c0_i32_0 = arith.constant 0 : i32
    %c0_i32_1 = arith.constant 0 : i32
    return %c0_i32, %c0_i32_0 : i32, i32
  }
  func.func @transform_3(%arg0: i32) -> (i32, i32) {
    %c0_i32 = arith.constant 0 : i32
    %c0_i32_0 = arith.constant 0 : i32
    %c0_i32_1 = arith.constant 0 : i32
    return %c0_i32, %c0_i32_0 : i32, i32
  }
  func.func @transform_4(%arg0: i32) -> (i32, i32) {
    %c0_i32 = arith.constant 0 : i32
    %c0_i32_0 = arith.constant 0 : i32
    %c0_i32_1 = arith.constant 0 : i32
    return %c0_i32, %c0_i32_0 : i32, i32
  }
  func.func @transform_5(%arg0: i32) -> (i32, i32) {
    %c0_i32 = arith.constant 0 : i32
    %c0_i32_0 = arith.constant 0 : i32
    %c0_i32_1 = arith.constant 0 : i32
    return %c0_i32, %c0_i32_0 : i32, i32
  }
  func.func @transform_6(%arg0: i32) -> (i32, i32) {
    %c0_i32 = arith.constant 0 : i32
    %c0_i32_0 = arith.constant 0 : i32
    %c0_i32_1 = arith.constant 0 : i32
    return %c0_i32, %c0_i32_0 : i32, i32
  }
  func.func @transform_7(%arg0: i32) -> (i32, i32) {
    %c0_i32 = arith.constant 0 : i32
    %c0_i32_0 = arith.constant 0 : i32
    %c0_i32_1 = arith.constant 0 : i32
    return %c0_i32, %c0_i32_0 : i32, i32
  }
  func.func @transform_8(%arg0: i32) -> (i32, i32) {
    %c0_i32 = arith.constant 0 : i32
    %c0_i32_0 = arith.constant 0 : i32
    %c0_i32_1 = arith.constant 0 : i32
    return %c0_i32, %c0_i32_0 : i32, i32
  }
  func.func @transform_9(%arg0: i32) -> (i32, i32) {
    %c0_i32 = arith.constant 0 : i32
    %c0_i32_0 = arith.constant 0 : i32
    %c0_i32_1 = arith.constant 0 : i32
    return %c0_i32, %c0_i32_0 : i32, i32
  }
  func.func @transform_10(%arg0: i32) -> (i32, i32) {
    %c0_i32 = arith.constant 0 : i32
    %c0_i32_0 = arith.constant 0 : i32
    %c0_i32_1 = arith.constant 0 : i32
    return %c0_i32, %c0_i32_0 : i32, i32
  }
  func.func @transform_11(%arg0: i32) -> (i32, i32) {
    %c0_i32 = arith.constant 0 : i32
    %c0_i32_0 = arith.constant 0 : i32
    return %arg0, %c0_i32 : i32, i32
  }
}

</mosaic_0001>

<bundles_post_ra>
// kernel: tpu_custom_call.1
= control target key start
LH: loop header
LB: loop body
LE: loop exit
PB: predicated region body
PF: predicated region fallthrough
CT: control target
= control target key end

     0   :  { %s6553_s0 = inlined_call_operand.vmem [shape: f32[32,64], index: 0, kind: input, shape index: {}]   ;;  %s6554_s1 = inlined_call_operand.vmem [shape: f32[32,64], index: 1, kind: input, shape index: {}]   ;;  %s6555_s2 = inlined_call_operand.hbm [shape: bf16[64,1024], index: 2, kind: input, shape index: {}]   ;;  %s6556_s3 = inlined_call_operand.hbm [shape: bf16[64,1024], index: 3, kind: input, shape index: {}]   ;;  %s6557_s4 = inlined_call_operand.vmem [shape: f32[1,1024], index: 4, kind: input, shape index: {}]   ;;  %s6558_s5 = inlined_call_operand.hbm [shape: bf16[1024,512], index: 5, kind: input, shape index: {}]   ;;  %s6559_s6 = inlined_call_operand.vmem [shape: f32[1,512], index: 6, kind: input, shape index: {}]   ;;  %s6560_s7 = inlined_call_operand.hbm [shape: bf16[512,256], index: 7, kind: input, shape index: {}]   ;;  %s6561_s8 = inlined_call_operand.vmem [shape: f32[1,256], index: 8, kind: input, shape index: {}]   ;;  %s6562_s9 = inlined_call_operand.vmem [shape: bf16[256,1], index: 9, kind: input, shape index: {}]   ;;  %s6563_s10 = inlined_call_operand.<no memory space> [shape: f32[1,1], index: 10, kind: input, shape index: {}]   ;;  %s6564_s11 = inlined_call_operand.vmem [shape: f32[32,1], index: 11, kind: output, shape index: {}]  }
   0x1   :  { %v16_v0 = vstv %s6563_s10 }
   0x2   :  { %17 = vst [vmem:[#allocation2] sm:$0x1] %v16_v0 }
   0x3   :  { %18 = vsyncpa [#allocation4], 0 }
   0x4   :  { %19 = vsyncpa [#allocation6], 0 }
   0x5   :  { %20 = vsyncpa [#allocation9], 0  ;;  %s6253_s19 = smov 0  }
   0x6 LB: > { %s6565_s20 = sadd.s32 4294967295, %s6178_s19   ;;  %p3949_p0 = scmp.ge.s32.totalorder %s6178_s19, 1  ;;  %s6178_s19 = sphi %s6253_s19, %s26_s19  }
   0x7   : > { %p298_p1 = scmp.lt.s32.totalorder %s6178_s19, 3  ;;  %p6263_p2 = scmp.eq.s32.totalorder %s6565_s20, 0 }
   0x8   : > { %s323_s23 = sshll.u32 %s6556_s3, 4  ;;  %s309_s27 = sshll.u32 %s6555_s2, 4  ;;  %s324_s23 = int_to_ptr.hbm [resolvable:$true] %s323_s23  ;;  %s310_s27 = int_to_ptr.hbm [resolvable:$true] %s309_s27 }
   0x9   : > { %p6270_p3 = pnand %p3949_p0, %p298_p1  ;;  %s6180_s28 = smov [#allocation5]  }
   0xa   : > { %s325_s29 = sshll.u32 %s6180_s28, 4  ;;  %s6181_s12 = smov [#allocation3]   ;;  %s326_s29 = int_to_ptr.vmem [resolvable:$true] %s325_s29 }
   0xb   : > { %p6000_p4 = pneg %p6270_p3  ;;  %s311_s13 = sshll.u32 %s6181_s12, 4  ;;  %s312_s13 = int_to_ptr.vmem [resolvable:$true] %s311_s13 }
   0xc   : > { %s340_s16 = sshll.u32 %s6558_s5, 4  ;;  %s6182_s17 = smov 512   ;;  %s341_s16 = int_to_ptr.hbm [resolvable:$true] %s340_s16 }
   0xd   : > { %p6281_p5 = pnand %p6263_p2, %p6000_p4  ;;  %s6183_s18 = smov 32  }
   0xe   : > { %s6184_s21 = smov [#allocation7]   ;;  %s6185_s25 = smov 256  }
   0xf   : > { %6006 = dma.hbm_to_vmem [thread:$0]  (!%p6281_p5), %s324_s23, 4096, %s326_s29, [#allocation6], %s6182_s17, %s6182_s17, %s6183_s18  }
  0x10   : > { %6003 = dma.hbm_to_vmem [thread:$0]  (!%p6281_p5), %s310_s27, 4096, %s312_s13, [#allocation4], %s6182_s17, %s6182_s17, %s6183_s18  }
  0x11   : > { %s342_s22 = sshll.u32 %s6184_s21, 4  ;;  %s6186_s26 = smov 16   ;;  %s343_s22 = int_to_ptr.vmem [resolvable:$true] %s342_s22 }
  0x12   : > { %6009 = dma.hbm_to_vmem [thread:$0]  (!%p6281_p5), %s341_s16, 32768, %s343_s22, [#allocation6], %s6185_s25, %s6185_s25, %s6186_s26  }
  0x13   : > { %s357_s14 = sshll.u32 %s6560_s7, 4  ;;  %s6187_s15 = smov [#allocation8]   ;;  %s358_s14 = int_to_ptr.hbm [resolvable:$true] %s357_s14 }
  0x14   : > { %s359_s20 = sshll.u32 %s6187_s15, 4  ;;  %s6188_s23 = smov 128   ;;  %s360_s20 = int_to_ptr.vmem [resolvable:$true] %s359_s20 }
  0x15   : > { %s6189_s29 = smov 8   ;;  %402 = sbr.rel (%p6270_p3) target bundleno = 886 (0x376), region = 64 }
  0x16   : > { %6012 = dma.hbm_to_vmem [thread:$0]  (!%p6281_p5), %s358_s14, 8192, %s360_s20, [#allocation9], %s6188_s23, %s6188_s23, %s6189_s29  }
  0x1a   : > { %6165 = dma.done.wait (%p6263_p2), [#allocation4], 4096  }
  0x1b   : > { %6167 = vsyncadd (%p6263_p2), [#allocation4], 4294963200 }
  0x1c   : > { %6169 = dma.done.wait (%p6263_p2), [#allocation6], 36864  }
  0x1d   : > { %6171 = vsyncadd (%p6263_p2), [#allocation6], 4294930432 }
  0x1e   : > { %6173 = dma.done.wait (%p6263_p2), [#allocation9], 8192  }
  0x1f   : > { %6175 = vsyncadd (%p6263_p2), [#allocation9], 4294959104  ;;  %s6569_s20 = sadd.s32 4294967295, %s6178_s19   ;;  %v4064_v1 = vld [vmem:[#allocation5 + $0xc0] sm:$0xf]  ;;  %vm712_vm0 = vcmask 523264  }
  0x20   : > { %s3960_s24 = sshll.u32 %s6569_s20, 1  ;;  %v5644_v2 = vld [vmem:[#allocation5 + $0xdc] sm:$0xf0]  ;;  %v5640_v3 = vld [vmem:[#allocation5 + $0xc4] sm:$0xf]  ;;  %vm3835_vm1 = vcmask 7168  }
  0x21   : > { %p464_p6 = scmp.lt.s32.totalorder %s3960_s24, 3  ;;  %v4065_v4 = vor.u32 %v5644_v2, %v4064_v1  ;;  %v4066_v5 = vld [vmem:[#allocation5 + $0xe0] sm:$0xf0]  ;;  %v4080_v6 = vld [vmem:[#allocation5 + $0xd0] sm:$0xf] }
  0x22   : > { %v5646_v7 = vld [vmem:[#allocation5 + $0xec] sm:$0xf0]  ;;  %v4069_v8 = vor.u32 %v5640_v3, %v4066_v5  ;;  %v5642_v10 = vld [vmem:[#allocation5 + $0xd4] sm:$0xf]  ;;  %v4032_v12 = vld [vmem:[#allocation5 + $0x80] sm:$0xf] }
  0x23   : > { %s6571_s24 = smov (!%p464_p6, %s3960_s24), 3  ;;  %v4081_v9 = vor.u32 %v5646_v7, %v4080_v6  ;;  %v4082_v11 = vld [vmem:[#allocation5 + $0xf0] sm:$0xf0]  ;;  %720 = vmatpush.bf16.msra.mxu2 %v4065_v4  ;;  %v5636_v14 = vld [vmem:[#allocation5 + $0x9c] sm:$0xf0] }
  0x24   : > { %s6315_s27 = sshll.u32 %s6571_s24, 3  ;;  %v4085_v13 = vor.u32 %v5642_v10, %v4082_v11  ;;  %v5632_v15 = vld [vmem:[#allocation5 + $0x84] sm:$0xf]  ;;  %734 = vmatpush.bf16.msra.mxu3 %v4069_v8  ;;  %v4033_v17 = vor.u32 %v5636_v14, %v4032_v12  ;;  %v4048_v19 = vld [vmem:[#allocation5 + $0x90] sm:$0xf] }
  0x25   : > { %v4034_v16 = vld [vmem:[#allocation5 + $0xa0] sm:$0xf0]  ;;  %776 = vmatpush.bf16.msra.mxu0 %v4081_v9  ;;  %v5638_v20 = vld [vmem:[#allocation5 + $0xac] sm:$0xf0]  ;;  %v5634_v21 = vld [vmem:[#allocation5 + $0x94] sm:$0xf]  ;;  %s473_s13 = scalar_lea.vmem %s6554_s1, %s6315_s27  ;;  %s467_s18 = scalar_lea.vmem %s6553_s0, %s6315_s27 }
  0x26   : > { %v4037_v18 = vor.u32 %v5632_v15, %v4034_v16  ;;  %790 = vmatpush.bf16.msra.mxu1 %v4085_v13  ;;  %v4049_v22 = vor.u32 %v5638_v20, %v4048_v19  ;;  %v4050_v23 = vld [vmem:[#allocation5 + $0xb0] sm:$0xf0]  ;;  %v4000_v24 = vld [vmem:[#allocation5 + $0x40] sm:$0xf]  ;;  %v5624_v27 = vld [vmem:[#allocation5 + $0x44] sm:$0xf]  ;;  %s479_s28 = scalar_lea.vmem %s6564_s11, %s6315_s27 }
  0x27   : > { %v5628_v25 = vld [vmem:[#allocation5 + $0x5c] sm:$0xf0]  ;;  %v4053_v26 = vor.u32 %v5634_v21, %v4050_v23  ;;  %v4002_v28 = vld [vmem:[#allocation5 + $0x60] sm:$0xf0]  ;;  %v4016_v29 = vld [vmem:[#allocation5 + $0x50] sm:$0xf]  ;;  %721 = vmatpush.bf16.msra.mxu2 %v4033_v17 }
  0x28   : > { %v4001_v30 = vor.u32 %v5628_v25, %v4000_v24  ;;  %v5630_v31 = vld [vmem:[#allocation5 + $0x6c] sm:$0xf0]  ;;  %v5626_v32 = vld [vmem:[#allocation5 + $0x54] sm:$0xf]  ;;  %735 = vmatpush.bf16.msra.mxu3 %v4037_v18  ;;  %v4005_v34 = vor.u32 %v5624_v27, %v4002_v28  ;;  %v3968_v36 = vld [vmem:[#allocation5] sm:$0xf] }
  0x29   : > { %v4018_v33 = vld [vmem:[#allocation5 + $0x70] sm:$0xf0]  ;;  %777 = vmatpush.bf16.msra.mxu0 %v4049_v22  ;;  %v4017_v35 = vor.u32 %v5630_v31, %v4016_v29  ;;  %v5620_v37 = vld [vmem:[#allocation5 + $0x1c] sm:$0xf0]  ;;  %v5616_v38 = vld [vmem:[#allocation5 + $0x4] sm:$0xf] }
  0x2a   : > { %791 = vmatpush.bf16.msra.mxu1 %v4053_v26  ;;  %v4021_v39 = vor.u32 %v5626_v32, %v4018_v33  ;;  %v3970_v40 = vld [vmem:[#allocation5 + $0x20] sm:$0xf0]  ;;  %v3984_v41 = vld [vmem:[#allocation5 + $0x10] sm:$0xf]  ;;  %v5618_v43 = vld [vmem:[#allocation5 + $0x14] sm:$0xf]  ;;  %v3969_v46 = vor.u32 %v5620_v37, %v3968_v36 }
  0x2b   : > { %v5622_v42 = vld [vmem:[#allocation5 + $0x2c] sm:$0xf0]  ;;  %v3986_v44 = vld [vmem:[#allocation5 + $0x30] sm:$0xf0]  ;;  %v485_v45 = vld [vmem:[%s473_s13] sm:$0xff]  ;;  %722 = vmatpush.bf16.msra.mxu2 %v4001_v30  ;;  %v3973_v50 = vor.u32 %v5616_v38, %v3970_v40 }
  0x2c   : > { %v486_v47 = vld [vmem:[%s473_s13 + $0x8] sm:$0xff]  ;;  %736 = vmatpush.bf16.msra.mxu3 %v4005_v34  ;;  %v3985_v51 = vor.u32 %v5622_v42, %v3984_v41  ;;  %v3989_v54 = vor.u32 %v5618_v43, %v3986_v44  ;;  %v4200_v56 = vld [vmem:[#allocation3 + $0xc0] sm:$0xf]  ;;  %v4088_v26 = vld [vmem:[#allocation5 + $0xd8] sm:$0xf] }
  0x2d   : > { %v4072_v48 = vld [vmem:[#allocation5 + $0xc8] sm:$0xf]  ;;  %778 = vmatpush.bf16.msra.mxu0 %v4017_v35  ;;  %v5641_v52 = vld [vmem:[#allocation5 + $0xcc] sm:$0xf]  ;;  %v5612_v57 = vld [vmem:[#allocation3 + $0xdc] sm:$0xf0]  ;;  %v6321_v59 = vpack.c.bf16 %v486_v47, %v485_v45 }
  0x2e   : > { %v5645_v49 = vld [vmem:[#allocation5 + $0xe4] sm:$0xf0]  ;;  %v4074_v53 = vld [vmem:[#allocation5 + $0xe8] sm:$0xf0]  ;;  %792 = vmatpush.bf16.msra.mxu1 %v4021_v39  ;;  %v5608_v58 = vld [vmem:[#allocation3 + $0xc4] sm:$0xf]  ;;  %v4201_v2 = vor.u32 %v5612_v57, %v4200_v56 }
  0x2f   : > { %v4073_v55 = vor.u32 %v5645_v49, %v4072_v48  ;;  %v4077_v60 = vor.u32 %v5641_v52, %v4074_v53  ;;  %v4202_v61 = vld [vmem:[#allocation3 + $0xe0] sm:$0xf0]  ;;  %v4040_v62 = vld [vmem:[#allocation5 + $0x88] sm:$0xf]  ;;  %723 = vmatpush.bf16.msra.mxu2 %v3969_v46  ;;  %v5633_v0 = vld [vmem:[#allocation5 + $0x8c] sm:$0xf] }
  0x30   : > { %v5637_v63 = vld [vmem:[#allocation5 + $0xa4] sm:$0xf0]  ;;  %v4042_v1 = vld [vmem:[#allocation5 + $0xa8] sm:$0xf0]  ;;  %737 = vmatpush.bf16.msra.mxu3 %v3973_v50  ;;  %v4205_v3 = vor.u32 %v5608_v58, %v4202_v61  ;;  %v4168_v5 = vld [vmem:[#allocation3 + $0x80] sm:$0xf] }
  0x31   : > { %779 = vmatpush.bf16.msra.mxu0 %v3985_v51  ;;  %v4041_v4 = vor.u32 %v5637_v63, %v4040_v62  ;;  %v5604_v6 = vld [vmem:[#allocation3 + $0x9c] sm:$0xf0]  ;;  %v5600_v7 = vld [vmem:[#allocation3 + $0x84] sm:$0xf]  ;;  %v4045_v8 = vor.u32 %v5633_v0, %v4042_v1  ;;  %v4008_v10 = vld [vmem:[#allocation5 + $0x48] sm:$0xf] }
  0x32   : > { %793 = vmatpush.bf16.msra.mxu1 %v3989_v54  ;;  %4094 = vmatmul.msk.bf16.vlgmr.msra.gmra.mxu2 %vm712_vm0, %v6321_v59  ;;  %v4170_v9 = vld [vmem:[#allocation3 + $0xa0] sm:$0xf0]  ;;  %v5629_v11 = vld [vmem:[#allocation5 + $0x64] sm:$0xf0]  ;;  %v5625_v12 = vld [vmem:[#allocation5 + $0x4c] sm:$0xf]  ;;  %v4169_v14 = vor.u32 %v5604_v6, %v4168_v5 }
  0x33   : > { %748 = vmatpush.bf16.msrb.mxu2 %v4073_v55  ;;  %4095 = vmatmul.msk.bf16.vlgmr.msra.gmra.mxu3 %vm712_vm0, %v6321_v59  ;;  %v4010_v13 = vld [vmem:[#allocation5 + $0x68] sm:$0xf0]  ;;  %v4136_v15 = vld [vmem:[#allocation3 + $0x40] sm:$0xf]  ;;  %v4173_v16 = vor.u32 %v5600_v7, %v4170_v9  ;;  %v4009_v17 = vor.u32 %v5629_v11, %v4008_v10  ;;  %v5592_v19 = vld [vmem:[#allocation3 + $0x44] sm:$0xf] }
  0x34   : > { %762 = vmatpush.bf16.msrb.mxu3 %v4077_v60  ;;  %4098 = vmatmul.msk.bf16.vlgmr.msra.gmra.mxu0 %vm712_vm0, %v6321_v59  ;;  %v5596_v18 = vld [vmem:[#allocation3 + $0x5c] sm:$0xf0]  ;;  %v4138_v20 = vld [vmem:[#allocation3 + $0x60] sm:$0xf0]  ;;  %v4013_v21 = vor.u32 %v5625_v12, %v4010_v13  ;;  %v3976_v22 = vld [vmem:[#allocation5 + $0x8] sm:$0xf] }
  0x35   : > { %4099 = vmatmul.msk.bf16.vlgmr.msra.gmra.mxu1 %vm712_vm0, %v6321_v59  ;;  %995 = vmatpush.bf16.msrb.mxu0 %v4201_v2  ;;  %v5621_v23 = vld [vmem:[#allocation5 + $0x24] sm:$0xf0]  ;;  %v5617_v24 = vld [vmem:[#allocation5 + $0xc] sm:$0xf]  ;;  %v5647_v27 = vld [vmem:[#allocation5 + $0xf4] sm:$0xf0]  ;;  %v4137_v28 = vor.u32 %v5596_v18, %v4136_v15  ;;  %v4141_v31 = vor.u32 %v5592_v19, %v4138_v20 }
  0x36   : > { %1009 = vmatpush.bf16.msrb.mxu1 %v4205_v3  ;;  %v3978_v25 = vld [vmem:[#allocation5 + $0x28] sm:$0xf0]  ;;  %v5643_v29 = vld [vmem:[#allocation5 + $0xdc] sm:$0xf]  ;;  %v3977_v32 = vor.u32 %v5621_v23, %v3976_v22  ;;  %v4104_v33 = vld [vmem:[#allocation3] sm:$0xf]  ;;  %v4089_v38 = vor.u32 %v5647_v27, %v4088_v26 }
  0x37   : > { %749 = vmatpush.bf16.msrb.mxu2 %v4041_v4  ;;  %v4090_v30 = vld [vmem:[#allocation5 + $0xf8] sm:$0xf0]  ;;  %v5588_v34 = vld [vmem:[#allocation3 + $0x1c] sm:$0xf0]  ;;  %v5584_v35 = vld [vmem:[#allocation3 + $0x4] sm:$0xf]  ;;  %v3981_v36 = vor.u32 %v5617_v24, %v3978_v25 }
  0x38   : > { %763 = vmatpush.bf16.msrb.mxu3 %v4045_v8  ;;  %v4106_v37 = vld [vmem:[#allocation3 + $0x20] sm:$0xf0]  ;;  %v4216_v39 = vld [vmem:[#allocation3 + $0xd0] sm:$0xf]  ;;  %v4093_v41 = vor.u32 %v5643_v29, %v4090_v30  ;;  %v5610_v42 = vld [vmem:[#allocation3 + $0xd4] sm:$0xf]  ;;  %v4105_v44 = vor.u32 %v5588_v34, %v4104_v33 }
  0x39   : > { %996 = vmatpush.bf16.msrb.mxu0 %v4169_v14  ;;  %v5614_v40 = vld [vmem:[#allocation3 + $0xec] sm:$0xf0]  ;;  %v4218_v43 = vld [vmem:[#allocation3 + $0xf0] sm:$0xf0]  ;;  %v482_v45 = vld [vmem:[%s467_s18] sm:$0xff]  ;;  %v4109_v47 = vor.u32 %v5584_v35, %v4106_v37 }
  0x3a   : > { %1010 = vmatpush.bf16.msrb.mxu1 %v4173_v16  ;;  %v483_v46 = vld [vmem:[%s467_s18 + $0x8] sm:$0xff]  ;;  %v4217_v48 = vor.u32 %v5614_v40, %v4216_v39  ;;  %v4056_v49 = vld [vmem:[#allocation5 + $0x98] sm:$0xf]  ;;  %v5635_v51 = vld [vmem:[#allocation5 + $0x9c] sm:$0xf]  ;;  %v4221_v52 = vor.u32 %v5610_v42, %v4218_v43 }
  0x3b   : > { %750 = vmatpush.bf16.msrb.mxu2 %v4009_v17  ;;  %v5639_v50 = vld [vmem:[#allocation5 + $0xb4] sm:$0xf0]  ;;  %v4058_v53 = vld [vmem:[#allocation5 + $0xb8] sm:$0xf0]  ;;  %v4184_v54 = vld [vmem:[#allocation3 + $0x90] sm:$0xf]  ;;  %v6335_v56 = vpack.c.bf16 %v483_v46, %v482_v45 }
  0x3c   : > { %764 = vmatpush.bf16.msrb.mxu3 %v4013_v21  ;;  %v5606_v55 = vld [vmem:[#allocation3 + $0xac] sm:$0xf0]  ;;  %v5602_v57 = vld [vmem:[#allocation3 + $0x94] sm:$0xf]  ;;  %v4057_v60 = vor.u32 %v5639_v50, %v4056_v49  ;;  %v4061_v61 = vor.u32 %v5635_v51, %v4058_v53  ;;  %v4024_v63 = vld [vmem:[#allocation5 + $0x58] sm:$0xf] }
  0x3d   : > { %997 = vmatpush.bf16.msrb.mxu0 %v4137_v28  ;;  %v4186_v58 = vld [vmem:[#allocation3 + $0xb0] sm:$0xf0]  ;;  %v4185_v62 = vor.u32 %v5606_v55, %v4184_v54  ;;  %v5631_v0 = vld [vmem:[#allocation5 + $0x74] sm:$0xf0]  ;;  %v5627_v1 = vld [vmem:[#allocation5 + $0x5c] sm:$0xf] }
  0x3e   : > { %1011 = vmatpush.bf16.msrb.mxu1 %v4141_v31  ;;  %v4189_v2 = vor.u32 %v5602_v57, %v4186_v58  ;;  %v4026_v3 = vld [vmem:[#allocation5 + $0x78] sm:$0xf0]  ;;  %v4152_v4 = vld [vmem:[#allocation3 + $0x50] sm:$0xf]  ;;  %v5594_v6 = vld [vmem:[#allocation3 + $0x54] sm:$0xf]  ;;  %v4025_v8 = vor.u32 %v5631_v0, %v4024_v63 }
  0x3f   : > { %751 = vmatpush.bf16.msrb.mxu2 %v3977_v32  ;;  %v5598_v5 = vld [vmem:[#allocation3 + $0x6c] sm:$0xf0]  ;;  %v4154_v7 = vld [vmem:[#allocation3 + $0x70] sm:$0xf0]  ;;  %v3992_v9 = vld [vmem:[#allocation5 + $0x18] sm:$0xf]  ;;  %v4029_v10 = vor.u32 %v5627_v1, %v4026_v3 }
  0x40   : > { %765 = vmatpush.bf16.msrb.mxu3 %v3981_v36  ;;  %v4153_v11 = vor.u32 %v5598_v5, %v4152_v4  ;;  %v5623_v12 = vld [vmem:[#allocation5 + $0x34] sm:$0xf0]  ;;  %v5619_v13 = vld [vmem:[#allocation5 + $0x1c] sm:$0xf]  ;;  %v4157_v15 = vor.u32 %v5594_v6, %v4154_v7  ;;  %v4120_v16 = vld [vmem:[#allocation3 + $0x10] sm:$0xf] }
  0x41   : > { %998 = vmatpush.bf16.msrb.mxu0 %v4105_v44  ;;  %v3994_v14 = vld [vmem:[#allocation5 + $0x38] sm:$0xf0]  ;;  %v5590_v17 = vld [vmem:[#allocation3 + $0x2c] sm:$0xf0]  ;;  %v5586_v18 = vld [vmem:[#allocation3 + $0x14] sm:$0xf]  ;;  %v3993_v22 = vor.u32 %v5623_v12, %v3992_v9 }
  0x42   : > { %1012 = vmatpush.bf16.msrb.mxu1 %v4109_v47  ;;  %4096 = vmatmul.msk.bf16.vlgmr.msrb.gmra.mxu2 %vm712_vm0, %v6321_v59  ;;  %v4122_v19 = vld [vmem:[#allocation3 + $0x30] sm:$0xf0]  ;;  %v4208_v20 = vld [vmem:[#allocation3 + $0xc8] sm:$0xf]  ;;  %v5609_v23 = vld [vmem:[#allocation3 + $0xcc] sm:$0xf]  ;;  %v3997_v25 = vor.u32 %v5619_v13, %v3994_v14  ;;  %v4121_v26 = vor.u32 %v5590_v17, %v4120_v16 }
  0x43   : > { %804 = vmatpush.bf16.msra.mxu2 %v4089_v38  ;;  %4097 = vmatmul.msk.bf16.vlgmr.msrb.gmra.mxu3 %vm712_vm0, %v6321_v59  ;;  %v5613_v21 = vld [vmem:[#allocation3 + $0xe4] sm:$0xf0]  ;;  %v4210_v24 = vld [vmem:[#allocation3 + $0xe8] sm:$0xf0]  ;;  %v4125_v27 = vor.u32 %v5586_v18, %v4122_v19  ;;  %v4352_v42 = vld [vmem:[#allocation7 + $0xe0] sm:$0xf] }
  0x44   : > { %818 = vmatpush.bf16.msra.mxu3 %v4093_v41  ;;  %4230 = vmatmul.msk.bf16.vlgmr.msrb.gmra.mxu0 %vm712_vm0, %v6335_v56  ;;  %v4209_v28 = vor.u32 %v5613_v21, %v4208_v20  ;;  %v4213_v29 = vor.u32 %v5609_v23, %v4210_v24  ;;  %v4176_v30 = vld [vmem:[#allocation3 + $0x88] sm:$0xf]  ;;  %v5601_v32 = vld [vmem:[#allocation3 + $0x8c] sm:$0xf]  ;;  %v5678_v43 = vld [vmem:[#allocation7 + $0xec] sm:$0xf0] }
  0x45   : > { %1051 = vmatpush.bf16.msra.mxu0 %v4217_v48  ;;  %4231 = vmatmul.msk.bf16.vlgmr.msrb.gmra.mxu1 %vm712_vm0, %v6335_v56  ;;  %v5605_v31 = vld [vmem:[#allocation3 + $0xa4] sm:$0xf0]  ;;  %v4178_v33 = vld [vmem:[#allocation3 + $0xa8] sm:$0xf0]  ;;  %v4480_v44 = vld [vmem:[#allocation7 + $0x1e0] sm:$0xf]  ;;  %v4353_v47 = vor.u32 %v5678_v43, %v4352_v42 }
  0x46   : > { %1065 = vmatpush.bf16.msra.mxu1 %v4221_v52  ;;  %v4177_v34 = vor.u32 %v5605_v31, %v4176_v30  ;;  %v4181_v35 = vor.u32 %v5601_v32, %v4178_v33  ;;  %v4144_v36 = vld [vmem:[#allocation3 + $0x48] sm:$0xf]  ;;  %v5593_v38 = vld [vmem:[#allocation3 + $0x4c] sm:$0xf]  ;;  %v5710_v48 = vld [vmem:[#allocation7 + $0x1ec] sm:$0xf0] }
  0x47   : > { %805 = vmatpush.bf16.msra.mxu2 %v4057_v60  ;;  %v5597_v37 = vld [vmem:[#allocation3 + $0x64] sm:$0xf0]  ;;  %v4146_v39 = vld [vmem:[#allocation3 + $0x68] sm:$0xf0]  ;;  %v4336_v49 = vld [vmem:[#allocation7 + $0xc0] sm:$0xf]  ;;  %v4481_v52 = vor.u32 %v5710_v48, %v4480_v44 }
  0x48   : > { %819 = vmatpush.bf16.msra.mxu3 %v4061_v61  ;;  %v4112_v40 = vld [vmem:[#allocation3 + $0x8] sm:$0xf]  ;;  %v4145_v45 = vor.u32 %v5597_v37, %v4144_v36  ;;  %v5585_v46 = vld [vmem:[#allocation3 + $0xc] sm:$0xf]  ;;  %v5674_v50 = vld [vmem:[#allocation7 + $0xcc] sm:$0xf0] }
  0x49   : > { %1052 = vmatpush.bf16.msra.mxu0 %v4185_v62  ;;  %v5589_v41 = vld [vmem:[#allocation3 + $0x24] sm:$0xf0]  ;;  %v4114_v51 = vld [vmem:[#allocation3 + $0x28] sm:$0xf0]  ;;  %v4464_v53 = vld [vmem:[#allocation7 + $0x1c0] sm:$0xf]  ;;  %v4337_v60 = vor.u32 %v5674_v50, %v4336_v49 }
  0x4a   : > { %1066 = vmatpush.bf16.msra.mxu1 %v4189_v2  ;;  %v5706_v54 = vld [vmem:[#allocation7 + $0x1cc] sm:$0xf0]  ;;  %v4224_v55 = vld [vmem:[#allocation3 + $0xd8] sm:$0xf]  ;;  %v5611_v58 = vld [vmem:[#allocation3 + $0xdc] sm:$0xf]  ;;  %v4113_v1 = vor.u32 %v5589_v41, %v4112_v40  ;;  %v4117_v4 = vor.u32 %v5585_v46, %v4114_v51 }
  0x4b   : > { %806 = vmatpush.bf16.msra.mxu2 %v4025_v8  ;;  %v5615_v57 = vld [vmem:[#allocation3 + $0xf4] sm:$0xf0]  ;;  %v4226_v61 = vld [vmem:[#allocation3 + $0xf8] sm:$0xf0]  ;;  %v4465_v62 = vor.u32 %v5706_v54, %v4464_v53  ;;  %v4320_v63 = vld [vmem:[#allocation7 + $0xa0] sm:$0xf] }
  0x4c   : > { %820 = vmatpush.bf16.msra.mxu3 %v4029_v10  ;;  %v5670_v0 = vld [vmem:[#allocation7 + $0xac] sm:$0xf0]  ;;  %v4448_v2 = vld [vmem:[#allocation7 + $0x1a0] sm:$0xf]  ;;  %v4225_v5 = vor.u32 %v5615_v57, %v4224_v55  ;;  %v4229_v6 = vor.u32 %v5611_v58, %v4226_v61  ;;  %v4192_v7 = vld [vmem:[#allocation3 + $0x98] sm:$0xf] }
  0x4d   : > { %1053 = vmatpush.bf16.msra.mxu0 %v4153_v11  ;;  %v5702_v3 = vld [vmem:[#allocation7 + $0x1ac] sm:$0xf0]  ;;  %v5607_v8 = vld [vmem:[#allocation3 + $0xb4] sm:$0xf0]  ;;  %v4321_v9 = vor.u32 %v5670_v0, %v4320_v63  ;;  %v5603_v10 = vld [vmem:[#allocation3 + $0x9c] sm:$0xf] }
  0x4e   : > { %1067 = vmatpush.bf16.msra.mxu1 %v4157_v15  ;;  %v4194_v11 = vld [vmem:[#allocation3 + $0xb8] sm:$0xf0]  ;;  %v4449_v12 = vor.u32 %v5702_v3, %v4448_v2  ;;  %v4304_v13 = vld [vmem:[#allocation7 + $0x80] sm:$0xf]  ;;  %v5666_v14 = vld [vmem:[#allocation7 + $0x8c] sm:$0xf0]  ;;  %v4193_v15 = vor.u32 %v5607_v8, %v4192_v7 }
  0x4f   : > { %807 = vmatpush.bf16.msra.mxu2 %v3993_v22  ;;  %v4432_v16 = vld [vmem:[#allocation7 + $0x180] sm:$0xf]  ;;  %v5698_v17 = vld [vmem:[#allocation7 + $0x18c] sm:$0xf0]  ;;  %v4197_v18 = vor.u32 %v5603_v10, %v4194_v11  ;;  %v4160_v19 = vld [vmem:[#allocation3 + $0x58] sm:$0xf]  ;;  %v4305_v23 = vor.u32 %v5666_v14, %v4304_v13 }
  0x50   : > { %821 = vmatpush.bf16.msra.mxu3 %v3997_v25  ;;  %v5599_v20 = vld [vmem:[#allocation3 + $0x74] sm:$0xf0]  ;;  %v5595_v21 = vld [vmem:[#allocation3 + $0x5c] sm:$0xf]  ;;  %v4433_v24 = vor.u32 %v5698_v17, %v4432_v16  ;;  %v4288_v25 = vld [vmem:[#allocation7 + $0x60] sm:$0xf] }
  0x51   : > { %1054 = vmatpush.bf16.msra.mxu0 %v4121_v26  ;;  %v4162_v22 = vld [vmem:[#allocation3 + $0x78] sm:$0xf0]  ;;  %v5662_v26 = vld [vmem:[#allocation7 + $0x6c] sm:$0xf0]  ;;  %v4128_v31 = vld [vmem:[#allocation3 + $0x18] sm:$0xf] }
  0x52   : > { %1068 = vmatpush.bf16.msra.mxu1 %v4125_v27  ;;  %4100 = vmatmul.msk.bf16.vlgmr.msra.gmra.mxu2 %vm712_vm0, %v6321_v59  ;;  %v4161_v27 = vor.u32 %v5599_v20, %v4160_v19  ;;  %v4165_v30 = vor.u32 %v5595_v21, %v4162_v22  ;;  %v5591_v32 = vld [vmem:[#allocation3 + $0x34] sm:$0xf0]  ;;  %v5587_v33 = vld [vmem:[#allocation3 + $0x1c] sm:$0xf]  ;;  %v4272_v37 = vld [vmem:[#allocation7 + $0x40] sm:$0xf] }
  0x53   : > { %1023 = vmatpush.bf16.msrb.mxu2 %v4209_v28  ;;  %4101 = vmatmul.msk.bf16.vlgmr.msra.gmra.mxu3 %vm712_vm0, %v6321_v59  ;;  %v4149_v59 = vor.u32 %v5593_v38, %v4146_v39  ;;  %v4416_v28 = vld [vmem:[#allocation7 + $0x160] sm:$0xf]  ;;  %v5658_v38 = vld [vmem:[#allocation7 + $0x4c] sm:$0xf0]  ;;  %v4129_v39 = vor.u32 %v5591_v32, %v4128_v31 }
  0x54   : > { %1037 = vmatpush.bf16.msrb.mxu3 %v4213_v29  ;;  %4234 = vmatmul.msk.bf16.vlgmr.msra.gmra.mxu0 %vm712_vm0, %v6335_v56  ;;  %v5694_v29 = vld [vmem:[#allocation7 + $0x16c] sm:$0xf0]  ;;  %v4400_v40 = vld [vmem:[#allocation7 + $0x140] sm:$0xf]  ;;  %v4273_v43 = vor.u32 %v5658_v38, %v4272_v37 }
  0x55   : > { %4235 = vmatmul.msk.bf16.vlgmr.msra.gmra.mxu1 %vm712_vm0, %v6335_v56  ;;  %2707 = vmatpush.bf16.msrb.mxu0 %v4353_v47  ;;  %v4417_v36 = vor.u32 %v5694_v29, %v4416_v28  ;;  %v5690_v41 = vld [vmem:[#allocation7 + $0x14c] sm:$0xf0]  ;;  %v4384_v47 = vld [vmem:[#allocation7 + $0x120] sm:$0xf] }
  0x56   : > { %2721 = vmatpush.bf16.msrb.mxu1 %v4481_v52  ;;  %v4401_v44 = vor.u32 %v5690_v41, %v4400_v40  ;;  %v5654_v46 = vld [vmem:[#allocation7 + $0x2c] sm:$0xf0]  ;;  %v4368_v52 = vld [vmem:[#allocation7 + $0x100] sm:$0xf] }
  0x57   : > { %1024 = vmatpush.bf16.msrb.mxu2 %v4177_v34  ;;  %v4130_v34 = vld [vmem:[#allocation3 + $0x38] sm:$0xf0]  ;;  %v5686_v48 = vld [vmem:[#allocation7 + $0x12c] sm:$0xf0]  ;;  %v4864_v55 = vld [vmem:[#allocation7 + $0x4e0] sm:$0xf] }
  0x58   : > { %1038 = vmatpush.bf16.msrb.mxu3 %v4181_v35  ;;  %v4289_v35 = vor.u32 %v5662_v26, %v4288_v25  ;;  %v4133_v42 = vor.u32 %v5587_v33, %v4130_v34  ;;  %v4385_v50 = vor.u32 %v5686_v48, %v4384_v47  ;;  %v5650_v51 = vld [vmem:[#allocation7 + $0xc] sm:$0xf0]  ;;  %v4992_v61 = vld [vmem:[#allocation7 + $0x5e0] sm:$0xf] }
  0x59   : > { %2708 = vmatpush.bf16.msrb.mxu0 %v4337_v60  ;;  %v5682_v54 = vld [vmem:[#allocation7 + $0x10c] sm:$0xf0]  ;;  %v4848_v0 = vld [vmem:[#allocation7 + $0x4c0] sm:$0xf] }
  0x5a   : > { %2722 = vmatpush.bf16.msrb.mxu1 %v4465_v62  ;;  %v5806_v57 = vld [vmem:[#allocation7 + $0x4ec] sm:$0xf0]  ;;  %v4369_v58 = vor.u32 %v5682_v54, %v4368_v52  ;;  %v4976_v2 = vld [vmem:[#allocation7 + $0x5c0] sm:$0xf] }
  0x5b   : > { %1025 = vmatpush.bf16.msrb.mxu2 %v4145_v45  ;;  %v4256_v45 = vld [vmem:[#allocation7 + $0x20] sm:$0xf]  ;;  %v4865_v60 = vor.u32 %v5806_v57, %v4864_v55  ;;  %v5838_v62 = vld [vmem:[#allocation7 + $0x5ec] sm:$0xf0] }
  0x5c   : > { %1039 = vmatpush.bf16.msrb.mxu3 %v4149_v59  ;;  %v4257_v49 = vor.u32 %v5654_v46, %v4256_v45  ;;  %v4240_v59 = vld [vmem:[#allocation7] sm:$0xf]  ;;  %v4993_v63 = vor.u32 %v5838_v62, %v4992_v61  ;;  %v5834_v3 = vld [vmem:[#allocation7 + $0x5cc] sm:$0xf0] }
  0x5d   : > { %2709 = vmatpush.bf16.msrb.mxu0 %v4321_v9  ;;  %v4241_v53 = vor.u32 %v5650_v51, %v4240_v59  ;;  %v4960_v7 = vld [vmem:[#allocation7 + $0x5a0] sm:$0xf]  ;;  %v5830_v9 = vld [vmem:[#allocation7 + $0x5ac] sm:$0xf0] }
  0x5e   : > { %2723 = vmatpush.bf16.msrb.mxu1 %v4449_v12  ;;  %v4608_v10 = vld [vmem:[#allocation7 + $0x2e0] sm:$0xf]  ;;  %v5742_v11 = vld [vmem:[#allocation7 + $0x2ec] sm:$0xf0]  ;;  %v4961_v12 = vor.u32 %v5830_v9, %v4960_v7 }
  0x5f   : > { %1026 = vmatpush.bf16.msrb.mxu2 %v4113_v1  ;;  %v5802_v1 = vld [vmem:[#allocation7 + $0x4cc] sm:$0xf0]  ;;  %v4609_v13 = vor.u32 %v5742_v11, %v4608_v10  ;;  %v4736_v14 = vld [vmem:[#allocation7 + $0x3e0] sm:$0xf] }
  0x60   : > { %1040 = vmatpush.bf16.msrb.mxu3 %v4117_v4  ;;  %v4977_v4 = vor.u32 %v5834_v3, %v4976_v2  ;;  %v4816_v17 = vld [vmem:[#allocation7 + $0x480] sm:$0xf]  ;;  %v5826_v21 = vld [vmem:[#allocation7 + $0x58c] sm:$0xf0] }
  0x61   : > { %2710 = vmatpush.bf16.msrb.mxu0 %v4305_v23  ;;  %v4944_v19 = vld [vmem:[#allocation7 + $0x580] sm:$0xf]  ;;  %v5738_v23 = vld [vmem:[#allocation7 + $0x2cc] sm:$0xf0] }
  0x62   : > { %4232 = vmatmul.msk.bf16.vlgmr.msrb.gmra.mxu2 %vm712_vm0, %v6335_v56  ;;  %2724 = vmatpush.bf16.msrb.mxu1 %v4433_v24  ;;  %v4592_v22 = vld [vmem:[#allocation7 + $0x2c0] sm:$0xf]  ;;  %v4945_v24 = vor.u32 %v5826_v21, %v4944_v19  ;;  %v5822_v33 = vld [vmem:[#allocation7 + $0x56c] sm:$0xf0] }
  0x63   : > { %1079 = vmatpush.bf16.msra.mxu2 %v4225_v5  ;;  %4233 = vmatmul.msk.bf16.vlgmr.msrb.gmra.mxu3 %vm712_vm0, %v6335_v56  ;;  %v4832_v5 = vld [vmem:[#allocation7 + $0x4a0] sm:$0xf]  ;;  %v4593_v25 = vor.u32 %v5738_v23, %v4592_v22  ;;  %v5766_v38 = vld [vmem:[#allocation7 + $0x3ac] sm:$0xf0] }
  0x64   : > { %1093 = vmatpush.bf16.msra.mxu3 %v4229_v6  ;;  %v5798_v6 = vld [vmem:[#allocation7 + $0x4ac] sm:$0xf0]  ;;  %v4720_v26 = vld [vmem:[#allocation7 + $0x3c0] sm:$0xf] }
  0x65   : > { %2711 = vmatpush.bf16.msrb.mxu0 %v4289_v35  ;;  %v4833_v8 = vor.u32 %v5798_v6, %v4832_v5  ;;  %v4800_v29 = vld [vmem:[#allocation7 + $0x460] sm:$0xf]  ;;  %v5818_v45 = vld [vmem:[#allocation7 + $0x54c] sm:$0xf0] }
  0x66   : > { %2725 = vmatpush.bf16.msrb.mxu1 %v4417_v36  ;;  %v4928_v32 = vld [vmem:[#allocation7 + $0x560] sm:$0xf]  ;;  %v5734_v36 = vld [vmem:[#allocation7 + $0x2ac] sm:$0xf0] }
  0x67   : > { %1080 = vmatpush.bf16.msra.mxu2 %v4193_v15  ;;  %v5774_v15 = vld [vmem:[#allocation7 + $0x3ec] sm:$0xf0]  ;;  %v4576_v34 = vld [vmem:[#allocation7 + $0x2a0] sm:$0xf]  ;;  %v4929_v35 = vor.u32 %v5822_v33, %v4928_v32 }
  0x68   : > { %1094 = vmatpush.bf16.msra.mxu3 %v4197_v18  ;;  %v4737_v16 = vor.u32 %v5774_v15, %v4736_v14  ;;  %v5794_v18 = vld [vmem:[#allocation7 + $0x48c] sm:$0xf0]  ;;  %v4704_v37 = vld [vmem:[#allocation7 + $0x3a0] sm:$0xf] }
  0x69   : > { %2712 = vmatpush.bf16.msrb.mxu0 %v4273_v43  ;;  %v4817_v20 = vor.u32 %v5794_v18, %v4816_v17  ;;  %v4705_v40 = vor.u32 %v5766_v38, %v4704_v37  ;;  %v4784_v41 = vld [vmem:[#allocation7 + $0x440] sm:$0xf]  ;;  %v5730_v47 = vld [vmem:[#allocation7 + $0x28c] sm:$0xf0] }
  0x6a   : > { %2726 = vmatpush.bf16.msrb.mxu1 %v4401_v44  ;;  %v4912_v43 = vld [vmem:[#allocation7 + $0x540] sm:$0xf]  ;;  %v5762_v59 = vld [vmem:[#allocation7 + $0x38c] sm:$0xf0] }
  0x6b   : > { %1081 = vmatpush.bf16.msra.mxu2 %v4161_v27  ;;  %v5770_v27 = vld [vmem:[#allocation7 + $0x3cc] sm:$0xf0]  ;;  %v4560_v46 = vld [vmem:[#allocation7 + $0x280] sm:$0xf]  ;;  %v4913_v48 = vor.u32 %v5818_v45, %v4912_v43 }
  0x6c   : > { %1095 = vmatpush.bf16.msra.mxu3 %v4165_v30  ;;  %v4721_v28 = vor.u32 %v5770_v27, %v4720_v26  ;;  %v5790_v30 = vld [vmem:[#allocation7 + $0x46c] sm:$0xf0]  ;;  %v4768_v52 = vld [vmem:[#allocation7 + $0x420] sm:$0xf] }
  0x6d   : > { %2713 = vmatpush.bf16.msrb.mxu0 %v4257_v49  ;;  %v4801_v31 = vor.u32 %v5790_v30, %v4800_v29  ;;  %v4561_v49 = vor.u32 %v5730_v47, %v4560_v46  ;;  %v4896_v54 = vld [vmem:[#allocation7 + $0x520] sm:$0xf]  ;;  %v5814_v57 = vld [vmem:[#allocation7 + $0x52c] sm:$0xf0] }
  0x6e   : > { %2727 = vmatpush.bf16.msrb.mxu1 %v4385_v50  ;;  %v4688_v50 = vld [vmem:[#allocation7 + $0x380] sm:$0xf]  ;;  %v4897_v61 = vor.u32 %v5814_v57, %v4896_v54  ;;  %v5810_v5 = vld [vmem:[#allocation7 + $0x50c] sm:$0xf0] }
  0x6f   : > { %1082 = vmatpush.bf16.msra.mxu2 %v4129_v39  ;;  %v4577_v39 = vor.u32 %v5734_v36, %v4576_v34  ;;  %v4689_v51 = vor.u32 %v5762_v59, %v4688_v50  ;;  %v4752_v2 = vld [vmem:[#allocation7 + $0x400] sm:$0xf]  ;;  %v5722_v7 = vld [vmem:[#allocation7 + $0x24c] sm:$0xf0] }
  0x70   : > { %1096 = vmatpush.bf16.msra.mxu3 %v4133_v42  ;;  %v5786_v42 = vld [vmem:[#allocation7 + $0x44c] sm:$0xf0]  ;;  %v4880_v3 = vld [vmem:[#allocation7 + $0x500] sm:$0xf] }
  0x71   : > { %2714 = vmatpush.bf16.msrb.mxu0 %v4241_v53  ;;  %v4785_v44 = vor.u32 %v5786_v42, %v4784_v41  ;;  %v5782_v53 = vld [vmem:[#allocation7 + $0x42c] sm:$0xf0]  ;;  %v4528_v6 = vld [vmem:[#allocation7 + $0x240] sm:$0xf]  ;;  %v4881_v9 = vor.u32 %v5810_v5, %v4880_v3 }
  0x72   : > { %4236 = vmatmul.msk.bf16.vlgmr.msra.gmra.mxu2 %vm712_vm0, %v6335_v56  ;;  %2728 = vmatpush.bf16.msrb.mxu1 %v4369_v58  ;;  %v4769_v55 = vor.u32 %v5782_v53, %v4768_v52  ;;  %v4544_v58 = vld [vmem:[#allocation7 + $0x260] sm:$0xf]  ;;  %v4529_v10 = vor.u32 %v5722_v7, %v4528_v6  ;;  %v5746_v29 = vld [vmem:[#allocation7 + $0x30c] sm:$0xf0] }
  0x73   : > { %4237 = vmatmul.msk.bf16.vlgmr.msra.gmra.mxu3 %vm712_vm0, %v6335_v56  ;;  %v4849_v56 = vor.u32 %v5802_v1, %v4848_v0  ;;  %2735 = vmatpush.bf16.msrb.mxu2 %v4609_v13  ;;  %v5758_v0 = vld [vmem:[#allocation7 + $0x36c] sm:$0xf0]  ;;  %v4656_v11 = vld [vmem:[#allocation7 + $0x340] sm:$0xf] }
  0x74   : > { %2749 = vmatpush.bf16.msrb.mxu3 %v4737_v16  ;;  %v4512_v15 = vld [vmem:[#allocation7 + $0x220] sm:$0xf]  ;;  %v5718_v16 = vld [vmem:[#allocation7 + $0x22c] sm:$0xf0] }
  0x75   : > { %2763 = vmatpush.bf16.msra.mxu0 %v4865_v60  ;;  %v5726_v60 = vld [vmem:[#allocation7 + $0x26c] sm:$0xf0]  ;;  %v4640_v17 = vld [vmem:[#allocation7 + $0x320] sm:$0xf]  ;;  %v4513_v19 = vor.u32 %v5718_v16, %v4512_v15  ;;  %v5676_v15 = vld [vmem:[#allocation7 + $0xe4] sm:$0xf] }
  0x76   : > { %2777 = vmatpush.bf16.msra.mxu1 %v4993_v63  ;;  %v4545_v62 = vor.u32 %v5726_v60, %v4544_v58  ;;  %v4672_v63 = vld [vmem:[#allocation7 + $0x360] sm:$0xf]  ;;  %v5870_v32 = vld [vmem:[#allocation7 + $0x6ec] sm:$0xf0]  ;;  %v4354_v16 = vld [vmem:[#allocation7 + $0xf0] sm:$0xf0] }
  0x77   : > { %2736 = vmatpush.bf16.msrb.mxu2 %v4593_v25  ;;  %v4673_v1 = vor.u32 %v5758_v0, %v4672_v63  ;;  %v5714_v25 = vld [vmem:[#allocation7 + $0x20c] sm:$0xf0]  ;;  %v4624_v26 = vld [vmem:[#allocation7 + $0x300] sm:$0xf] }
  0x78   : > { %2750 = vmatpush.bf16.msrb.mxu3 %v4721_v28  ;;  %v4625_v30 = vor.u32 %v5746_v29, %v4624_v26  ;;  %v5248_v33 = vld [vmem:[#allocation7 + $0x7e0] sm:$0xf]  ;;  %v5902_v34 = vld [vmem:[#allocation7 + $0x7ec] sm:$0xf0] }
  0x79   : > { %2764 = vmatpush.bf16.msra.mxu0 %v4849_v56  ;;  %v5778_v56 = vld [vmem:[#allocation7 + $0x40c] sm:$0xf0]  ;;  %v5249_v36 = vor.u32 %v5902_v34, %v5248_v33  ;;  %v5104_v38 = vld [vmem:[#allocation7 + $0x6c0] sm:$0xf] }
  0x7a   : > { %2778 = vmatpush.bf16.msra.mxu1 %v4977_v4  ;;  %v4753_v4 = vor.u32 %v5778_v56, %v4752_v2  ;;  %v5232_v42 = vld [vmem:[#allocation7 + $0x7c0] sm:$0xf]  ;;  %v5898_v43 = vld [vmem:[#allocation7 + $0x7cc] sm:$0xf0] }
  0x7b   : > { %2737 = vmatpush.bf16.msrb.mxu2 %v4577_v39  ;;  %v5866_v39 = vld [vmem:[#allocation7 + $0x6cc] sm:$0xf0]  ;;  %v5088_v47 = vld [vmem:[#allocation7 + $0x6a0] sm:$0xf] }
  0x7c   : > { %2751 = vmatpush.bf16.msrb.mxu3 %v4705_v40  ;;  %v5105_v41 = vor.u32 %v5866_v39, %v5104_v38  ;;  %v5216_v59 = vld [vmem:[#allocation7 + $0x7a0] sm:$0xf]  ;;  %v5858_v58 = vld [vmem:[#allocation7 + $0x68c] sm:$0xf0]  ;;  %v4338_v38 = vld [vmem:[#allocation7 + $0xd0] sm:$0xf0] }
  0x7d   : > { %2765 = vmatpush.bf16.msra.mxu0 %v4833_v8  ;;  %v5072_v57 = vld [vmem:[#allocation7 + $0x680] sm:$0xf]  ;;  %v5882_v34 = vld [vmem:[#allocation7 + $0x74c] sm:$0xf0] }
  0x7e   : > { %2779 = vmatpush.bf16.msra.mxu1 %v4961_v12  ;;  %v5754_v12 = vld [vmem:[#allocation7 + $0x34c] sm:$0xf0]  ;;  %v5073_v63 = vor.u32 %v5858_v58, %v5072_v57  ;;  %v5200_v0 = vld [vmem:[#allocation7 + $0x780] sm:$0xf]  ;;  %v4322_v57 = vld [vmem:[#allocation7 + $0xb0] sm:$0xf0] }
  0x7f   : > { %2738 = vmatpush.bf16.msrb.mxu2 %v4561_v49  ;;  %v4657_v14 = vor.u32 %v5754_v12, %v4656_v11  ;;  %v6372_v49 = vld [vmem:[%s6557_s4] sm:$0xff]  ;;  %v5886_v12 = vld [vmem:[#allocation7 + $0x76c] sm:$0xf0] }
  0x80   : > { %2752 = vmatpush.bf16.msrb.mxu3 %v4689_v51  ;;  %v5894_v51 = vld [vmem:[#allocation7 + $0x7ac] sm:$0xf0]  ;;  %v1105_v54 = vperm.slane %v6372_v49, 0  ;;  %v5056_v6 = vld [vmem:[#allocation7 + $0x660] sm:$0xf] }
  0x81   : > { %2766 = vmatpush.bf16.msra.mxu0 %v4817_v20  ;;  %v5750_v20 = vld [vmem:[#allocation7 + $0x32c] sm:$0xf0]  ;;  %v5217_v52 = vor.u32 %v5894_v51, %v5216_v59  ;;  %v5184_v11 = vld [vmem:[#allocation7 + $0x760] sm:$0xf] }
  0x82   : > { %2780 = vmatpush.bf16.msra.mxu1 %v4945_v24  ;;  %v4641_v22 = vor.u32 %v5750_v20, %v4640_v17  ;;  %v4496_v24 = vld [vmem:[#allocation7 + $0x200] sm:$0xf]  ;;  %v5708_v20 = vld [vmem:[#allocation7 + $0x1e4] sm:$0xf]  ;;  %v5878_v59 = vld [vmem:[#allocation7 + $0x72c] sm:$0xf0] }
  0x83   : > { %2739 = vmatpush.bf16.msrb.mxu2 %v4545_v62  ;;  %v4497_v28 = vor.u32 %v5714_v25, %v4496_v24  ;;  %v5040_v26 = vld [vmem:[#allocation7 + $0x640] sm:$0xf] }
  0x84   : > { %2753 = vmatpush.bf16.msrb.mxu3 %v4673_v1  ;;  %v5890_v1 = vld [vmem:[#allocation7 + $0x78c] sm:$0xf0]  ;;  %v5168_v33 = vld [vmem:[#allocation7 + $0x740] sm:$0xf] }
  0x85   : > { %2767 = vmatpush.bf16.msra.mxu0 %v4801_v31  ;;  %v5120_v31 = vld [vmem:[#allocation7 + $0x6e0] sm:$0xf]  ;;  %v5201_v2 = vor.u32 %v5890_v1, %v5200_v0  ;;  %v4450_v0 = vld [vmem:[#allocation7 + $0x1b0] sm:$0xf0] }
  0x86   : > { %2781 = vmatpush.bf16.msra.mxu1 %v4929_v35  ;;  %v5121_v35 = vor.u32 %v5870_v32, %v5120_v31  ;;  %v4357_v32 = vor.u32 %v5676_v15, %v4354_v16  ;;  %v5696_v15 = vld [vmem:[#allocation7 + $0x184] sm:$0xf]  ;;  %v4434_v16 = vld [vmem:[#allocation7 + $0x190] sm:$0xf0] }
  0x87   : > { %2740 = vmatpush.bf16.msrb.mxu2 %v4529_v10  ;;  %v5854_v10 = vld [vmem:[#allocation7 + $0x66c] sm:$0xf0] }
  0x88   : > { %2754 = vmatpush.bf16.msrb.mxu3 %v4657_v14  ;;  %v5057_v17 = vor.u32 %v5854_v10, %v5056_v6  ;;  %v5874_v6 = vld [vmem:[#allocation7 + $0x70c] sm:$0xf0]  ;;  %v4306_v10 = vld [vmem:[#allocation7 + $0x90] sm:$0xf0] }
  0x89   : > { %2768 = vmatpush.bf16.msra.mxu0 %v4785_v44  ;;  %v5233_v44 = vor.u32 %v5898_v43, %v5232_v42  ;;  %v5704_v42 = vld [vmem:[#allocation7 + $0x1c4] sm:$0xf]  ;;  %v4466_v43 = vld [vmem:[#allocation7 + $0x1d0] sm:$0xf0] }
  0x8a   : > { %2782 = vmatpush.bf16.msra.mxu1 %v4913_v48  ;;  %v5862_v48 = vld [vmem:[#allocation7 + $0x6ac] sm:$0xf0] }
  0x8b   : > { %2741 = vmatpush.bf16.msrb.mxu2 %v4513_v19  ;;  %v5089_v50 = vor.u32 %v5862_v48, %v5088_v47  ;;  %v5846_v47 = vld [vmem:[#allocation7 + $0x62c] sm:$0xf0]  ;;  %v5152_v48 = vld [vmem:[#allocation7 + $0x720] sm:$0xf] }
  0x8c   : > { %2755 = vmatpush.bf16.msrb.mxu3 %v4641_v22  ;;  %v5153_v1 = vor.u32 %v5878_v59, %v5152_v48  ;;  %v4258_v59 = vld [vmem:[#allocation7 + $0x30] sm:$0xf0] }
  0x8d   : > { %2769 = vmatpush.bf16.msra.mxu0 %v4769_v55 }
  0x8e   : > { %2783 = vmatpush.bf16.msra.mxu1 %v4897_v61  ;;  %v1106_v61 = vperm.slane %v6372_v49, 1 }
  0x8f   : > { %2742 = vmatpush.bf16.msrb.mxu2 %v4497_v28  ;;  %v5850_v28 = vld [vmem:[#allocation7 + $0x64c] sm:$0xf0] }
  0x90   : > { %2756 = vmatpush.bf16.msrb.mxu3 %v4625_v30  ;;  %v5041_v39 = vor.u32 %v5850_v28, %v5040_v26  ;;  %v4437_v26 = vor.u32 %v5696_v15, %v4434_v16  ;;  %v5660_v28 = vld [vmem:[#allocation7 + $0x64] sm:$0xf]  ;;  %v4850_v15 = vld [vmem:[#allocation7 + $0x4d0] sm:$0xf0] }
  0x91   : > { %2770 = vmatpush.bf16.msra.mxu0 %v4753_v4 }
  0x92   : > { %2784 = vmatpush.bf16.msra.mxu1 %v4881_v9 }
  0x93   : > { %2791 = vmatpush.bf16.msra.mxu2 %v5121_v35 }
  0x94   : > { %2805 = vmatpush.bf16.msra.mxu3 %v5249_v36 }
  0x97   : > { %2792 = vmatpush.bf16.msra.mxu2 %v5105_v41 }
  0x98   : > { %2806 = vmatpush.bf16.msra.mxu3 %v5233_v44  ;;  %v5169_v44 = vor.u32 %v5882_v34, %v5168_v33  ;;  %v5692_v33 = vld [vmem:[#allocation7 + $0x164] sm:$0xf]  ;;  %v4418_v34 = vld [vmem:[#allocation7 + $0x170] sm:$0xf0] }
  0x9b   : > { %2793 = vmatpush.bf16.msra.mxu2 %v5089_v50 }
  0x9c   : > { %2807 = vmatpush.bf16.msra.mxu3 %v5217_v52  ;;  %v1109_v52 = vperm.slane %v6372_v49, 4 }
  0x9f   : > { %2794 = vmatpush.bf16.msra.mxu2 %v5073_v63  ;;  %v5700_v63 = vld [vmem:[#allocation7 + $0x1a4] sm:$0xf] }
  0xa0   : > { %2808 = vmatpush.bf16.msra.mxu3 %v5201_v2 }
  0xa3   : > { %2795 = vmatpush.bf16.msra.mxu2 %v5057_v17 }
  0xa7   : > { %2796 = vmatpush.bf16.msra.mxu2 %v5041_v39 }
  0xb1   : > { %v6361_v8 = vpop.f32.mrf.mxu0 }
  0xb2   : > { %v6363_v13 = vpop.f32.mrf.mxu1 }
  0xb5   : > { %v725_v18 = vpop.f32.mrf.mxu2 }
  0xb6   : > { %v739_v21 = vpop.f32.mrf.mxu3 }
  0xb9   : > { %v6365_v23 = vpop.f32.mrf.mxu0 }
  0xba   : > { %v6367_v27 = vpop.f32.mrf.mxu1 }
  0xbd   : > { %v727_v37 = vpop.f32.mrf.mxu2 }
  0xbe   : > { %v741_v40 = vpop.f32.mrf.mxu3 }
  0xc1   : > { %v1000_v45 = vpop.f32.mrf.mxu0 }
  0xc2   : > { %v1014_v46 = vpop.f32.mrf.mxu1  ;;  %v1001_v53 = vadd.f32 %v1000_v45, %v725_v18  ;;  %v5185_v18 = vor.u32 %v5886_v12, %v5184_v11 }
  0xc3   : > { %v1015_v60 = vadd.f32 %v1014_v46, %v739_v21  ;;  %v4482_v21 = vld [vmem:[#allocation7 + $0x1f0] sm:$0xf0]  ;;  %v5024_v46 = vld [vmem:[#allocation7 + $0x620] sm:$0xf] }
  0xc4   : > { %v1121_v3 = vadd.f32 %v1105_v54, %v1001_v53  ;;  %2809 = vmatpush.bf16.msra.mxu3 %v5185_v18  ;;  %v4485_v36 = vor.u32 %v5708_v20, %v4482_v21  ;;  %v4469_v53 = vor.u32 %v5704_v42, %v4466_v43  ;;  %v5025_v58 = vor.u32 %v5846_v47, %v5024_v46  ;;  %v5656_v42 = vld [vmem:[#allocation7 + $0x44] sm:$0xf]  ;;  %v4274_v43 = vld [vmem:[#allocation7 + $0x50] sm:$0xf0] }
  0xc5   : > { %v6375_v55 = vpop.f32.mrf.mxu2  ;;  %v1122_v7 = vadd.f32 %v1106_v61, %v1015_v60  ;;  %v4402_v46 = vld [vmem:[#allocation7 + $0x150] sm:$0xf0]  ;;  %v4277_v47 = vor.u32 %v5656_v42, %v4274_v43 }
  0xc6   : > { %v6378_v62 = vpop.f32.mrf.mxu3  ;;  %v1137_v22 = vmax.f32 %v1121_v3, 0.0  ;;  %2797 = vmatpush.bf16.msra.mxu2 %v5025_v58 }
  0xc7   : > { %v1138_v29 = vmax.f32 %v1122_v7, 0.0 }
  0xc8   : > { %2810 = vmatpush.bf16.msra.mxu3 %v5169_v44 }
  0xc9   : > { %v1002_v56 = vpop.f32.mrf.mxu0 }
  0xca   : > { %v1003_v4 = vadd.f32 %v1002_v56, %v727_v37  ;;  %v1016_v5 = vpop.f32.mrf.mxu1  ;;  %v5672_v37 = vld [vmem:[#allocation7 + $0xc4] sm:$0xf]  ;;  %v5008_v56 = vld [vmem:[#allocation7 + $0x600] sm:$0xf] }
  0xcb   : > { %v1017_v9 = vadd.f32 %v1016_v5, %v741_v40  ;;  %v4341_v50 = vor.u32 %v5672_v37, %v4338_v38  ;;  %v5136_v5 = vld [vmem:[#allocation7 + $0x700] sm:$0xf] }
  0xcc   : > { %v1129_v14 = vadd.f32 %v1105_v54, %v1003_v4  ;;  %v5668_v54 = vld [vmem:[#allocation7 + $0xa4] sm:$0xf]  ;;  %2811 = vmatpush.bf16.msra.mxu3 %v5153_v1  ;;  %v5137_v17 = vor.u32 %v5874_v6, %v5136_v5  ;;  %v1107_v6 = vperm.slane %v6372_v49, 2 }
  0xcd   : > { %v1130_v19 = vadd.f32 %v1106_v61, %v1017_v9  ;;  %v6380_v25 = vpop.f32.mrf.mxu2  ;;  %v1110_v61 = vperm.slane %v6372_v49, 5  ;;  %v4325_v4 = vor.u32 %v5668_v54, %v4322_v57  ;;  %v4453_v9 = vor.u32 %v5700_v63, %v4450_v0  ;;  %v5680_v63 = vld [vmem:[#allocation7 + $0x104] sm:$0xf]  ;;  %v4370_v0 = vld [vmem:[#allocation7 + $0x110] sm:$0xf0] }
  0xce   : > { %v1145_v24 = vmax.f32 %v1129_v14, 0.0  ;;  %v6382_v31 = vpop.f32.mrf.mxu3  ;;  %v5804_v1 = vld [vmem:[#allocation7 + $0x4e4] sm:$0xf] }
  0xcf   : > { %v1146_v30 = vmax.f32 %v1130_v19, 0.0 }
  0xd0   : > { %v6384_v35 = vpack.c.bf16 %v1145_v24, %v1137_v22  ;;  %2812 = vmatpush.bf16.msra.mxu3 %v5137_v17  ;;  %v5832_v17 = vld [vmem:[#allocation7 + $0x5c4] sm:$0xf] }
  0xd1   : > { %v6386_v40 = vpack.c.bf16 %v1146_v30, %v1138_v29  ;;  %v1056_v41 = vpop.f32.mrf.mxu0  ;;  %v4290_v29 = vld [vmem:[#allocation7 + $0x70] sm:$0xf0] }
  0xd2   : > { %v1070_v45 = vpop.f32.mrf.mxu1  ;;  %2715 = vmatmul.bf16.vlgmr.msrb.gmra.mxu0 %v6384_v35  ;;  %v1057_v51 = vadd.f32 %v1056_v41, %v6361_v8  ;;  %v5842_v8 = vld [vmem:[#allocation7 + $0x60c] sm:$0xf0]  ;;  %v4293_v38 = vor.u32 %v5660_v28, %v4290_v29  ;;  %v4421_v41 = vor.u32 %v5692_v33, %v4418_v34  ;;  %v5796_v28 = vld [vmem:[#allocation7 + $0x4a4] sm:$0xf]  ;;  %v4834_v29 = vld [vmem:[#allocation7 + $0x4b0] sm:$0xf0] }
  0xd3   : > { %2729 = vmatmul.bf16.vlgmr.msrb.gmra.mxu1 %v6386_v40  ;;  %2819 = vmatpush.bf16.msrb.mxu0 %v4357_v32  ;;  %v1071_v60 = vadd.f32 %v1070_v45, %v6363_v13  ;;  %v5664_v13 = vld [vmem:[#allocation7 + $0x84] sm:$0xf]  ;;  %v5009_v11 = vor.u32 %v5842_v8, %v5008_v56  ;;  %v4866_v56 = vld [vmem:[#allocation7 + $0x4f0] sm:$0xf0]  ;;  %v4837_v43 = vor.u32 %v5796_v28, %v4834_v29 }
  0xd4   : > { %2833 = vmatpush.bf16.msrb.mxu1 %v4485_v36  ;;  %v1125_v7 = vadd.f32 %v1109_v52, %v1057_v51  ;;  %v4309_v21 = vor.u32 %v5664_v13, %v4306_v10  ;;  %v5688_v45 = vld [vmem:[#allocation7 + $0x144] sm:$0xf]  ;;  %v1108_v13 = vperm.slane %v6372_v49, 3  ;;  %v4373_v10 = vor.u32 %v5680_v63, %v4370_v0  ;;  %v4962_v33 = vld [vmem:[#allocation7 + $0x5b0] sm:$0xf0] }
  0xd5   : > { %v6394_v2 = vpop.f32.mrf.mxu2  ;;  %v1126_v12 = vadd.f32 %v1110_v61, %v1071_v60  ;;  %2798 = vmatpush.bf16.msra.mxu2 %v5009_v11  ;;  %v4405_v48 = vor.u32 %v5688_v45, %v4402_v46  ;;  %v5684_v51 = vld [vmem:[#allocation7 + $0x124] sm:$0xf]  ;;  %v4869_v11 = vor.u32 %v5804_v1, %v4866_v56  ;;  %v4722_v63 = vld [vmem:[#allocation7 + $0x3d0] sm:$0xf0] }
  0xd6   : > { %v6396_v3 = vpop.f32.mrf.mxu3  ;;  %v1141_v22 = vmax.f32 %v1125_v7, 0.0  ;;  %v5648_v60 = vld [vmem:[#allocation7 + $0x4] sm:$0xf] }
  0xd7   : > { %2820 = vmatpush.bf16.msrb.mxu0 %v4341_v50  ;;  %v1142_v30 = vmax.f32 %v1126_v12, 0.0  ;;  %v5652_v50 = vld [vmem:[#allocation7 + $0x24] sm:$0xf] }
  0xd8   : > { %2834 = vmatpush.bf16.msrb.mxu1 %v4469_v53  ;;  %v4261_v57 = vor.u32 %v5652_v50, %v4258_v59  ;;  %v5836_v8 = vld [vmem:[#allocation7 + $0x5e4] sm:$0xf]  ;;  %v4818_v50 = vld [vmem:[#allocation7 + $0x490] sm:$0xf0] }
  0xd9   : > { %v1058_v14 = vpop.f32.mrf.mxu0  ;;  %v5740_v34 = vld [vmem:[#allocation7 + $0x2e4] sm:$0xf] }
  0xda   : > { %v1059_v18 = vadd.f32 %v1058_v14, %v6365_v23  ;;  %v1072_v19 = vpop.f32.mrf.mxu1  ;;  %v5800_v14 = vld [vmem:[#allocation7 + $0x4c4] sm:$0xf] }
  0xdb   : > { %v1073_v20 = vadd.f32 %v1072_v19, %v6367_v27  ;;  %2821 = vmatpush.bf16.msrb.mxu0 %v4325_v4  ;;  %v4994_v4 = vld [vmem:[#allocation7 + $0x5f0] sm:$0xf0]  ;;  %v5824_v59 = vld [vmem:[#allocation7 + $0x584] sm:$0xf] }
  0xdc   : > { %v1133_v24 = vadd.f32 %v1109_v52, %v1059_v18  ;;  %2835 = vmatpush.bf16.msrb.mxu1 %v4453_v9  ;;  %v4386_v52 = vld [vmem:[#allocation7 + $0x130] sm:$0xf0]  ;;  %v4997_v12 = vor.u32 %v5836_v8, %v4994_v4  ;;  %v5788_v8 = vld [vmem:[#allocation7 + $0x464] sm:$0xf] }
  0xdd   : > { %v1134_v32 = vadd.f32 %v1110_v61, %v1073_v20  ;;  %v6400_v37 = vpop.f32.mrf.mxu2  ;;  %v4389_v58 = vor.u32 %v5684_v51, %v4386_v52  ;;  %v4242_v61 = vld [vmem:[#allocation7 + $0x10] sm:$0xf0] }
  0xde   : > { %v1149_v36 = vmax.f32 %v1133_v24, 0.0  ;;  %v6402_v27 = vpop.f32.mrf.mxu3  ;;  %v4245_v7 = vor.u32 %v5648_v60, %v4242_v61  ;;  %v4978_v18 = vld [vmem:[#allocation7 + $0x5d0] sm:$0xf0]  ;;  %v5768_v61 = vld [vmem:[#allocation7 + $0x3c4] sm:$0xf] }
  0xdf   : > { %v1150_v23 = vmax.f32 %v1134_v32, 0.0  ;;  %2822 = vmatpush.bf16.msrb.mxu0 %v4309_v21  ;;  %v4802_v4 = vld [vmem:[#allocation7 + $0x470] sm:$0xf0] }
  0xe0   : > { %v6404_v39 = vpack.c.bf16 %v1149_v36, %v1141_v22  ;;  %2836 = vmatpush.bf16.msrb.mxu1 %v4437_v26  ;;  %v4853_v22 = vor.u32 %v5800_v14, %v4850_v15  ;;  %v4981_v26 = vor.u32 %v5832_v17, %v4978_v18  ;;  %v4610_v36 = vld [vmem:[#allocation7 + $0x2f0] sm:$0xf0]  ;;  %v4805_v17 = vor.u32 %v5788_v8, %v4802_v4  ;;  %v5720_v4 = vld [vmem:[#allocation7 + $0x244] sm:$0xf] }
  0xe1   : > { %v6406_v44 = vpack.c.bf16 %v1150_v23, %v1142_v30  ;;  %v5828_v30 = vld [vmem:[#allocation7 + $0x5a4] sm:$0xf]  ;;  %v4706_v14 = vld [vmem:[#allocation7 + $0x3b0] sm:$0xf0] }
  0xe2   : > { %2771 = vmatmul.bf16.vlgmr.msra.gmra.mxu0 %v6404_v39  ;;  %v4965_v46 = vor.u32 %v5828_v30, %v4962_v33  ;;  %v4690_v30 = vld [vmem:[#allocation7 + $0x390] sm:$0xf0] }
  0xe3   : > { %2785 = vmatmul.bf16.vlgmr.msra.gmra.mxu1 %v6406_v44  ;;  %2823 = vmatpush.bf16.msrb.mxu0 %v4293_v38  ;;  %v5772_v38 = vld [vmem:[#allocation7 + $0x3e4] sm:$0xf] }
  0xe4   : > { %2837 = vmatpush.bf16.msrb.mxu1 %v4421_v41 }
  0xe5   : > { %v1028_v53 = vpop.f32.mrf.mxu2 }
  0xe6   : > { %v1042_v54 = vpop.f32.mrf.mxu3  ;;  %v1029_v5 = vadd.f32 %v1028_v53, %v6375_v55 }
  0xe7   : > { %2824 = vmatpush.bf16.msrb.mxu0 %v4277_v47  ;;  %v1043_v9 = vadd.f32 %v1042_v54, %v6378_v62  ;;  %v4613_v47 = vor.u32 %v5740_v34, %v4610_v36  ;;  %v4946_v54 = vld [vmem:[#allocation7 + $0x590] sm:$0xf0] }
  0xe8   : > { %2838 = vmatpush.bf16.msrb.mxu1 %v4405_v48  ;;  %v1123_v19 = vadd.f32 %v1107_v6, %v1029_v5  ;;  %v5792_v48 = vld [vmem:[#allocation7 + $0x484] sm:$0xf]  ;;  %v4949_v1 = vor.u32 %v5824_v59, %v4946_v54 }
  0xe9   : > { %v1124_v21 = vadd.f32 %v1108_v13, %v1043_v9  ;;  %v4821_v0 = vor.u32 %v5792_v48, %v4818_v50  ;;  %v5820_v5 = vld [vmem:[#allocation7 + $0x564] sm:$0xf] }
  0xea   : > { %v5732_v9 = vld [vmem:[#allocation7 + $0x2a4] sm:$0xf] }
  0xeb   : > { %2825 = vmatpush.bf16.msrb.mxu0 %v4261_v57  ;;  %v1140_v41 = vmax.f32 %v1124_v21, 0.0  ;;  %v5736_v57 = vld [vmem:[#allocation7 + $0x2c4] sm:$0xf] }
  0xec   : > { %2839 = vmatpush.bf16.msrb.mxu1 %v4389_v58  ;;  %v4594_v58 = vld [vmem:[#allocation7 + $0x2d0] sm:$0xf0]  ;;  %v5816_v21 = vld [vmem:[#allocation7 + $0x544] sm:$0xf] }
  0xed   : > { %v1030_v16 = vpop.f32.mrf.mxu2  ;;  %v4597_v56 = vor.u32 %v5736_v57, %v4594_v58  ;;  %v5756_v59 = vld [vmem:[#allocation7 + $0x364] sm:$0xf] }
  0xee   : > { %v1031_v55 = vadd.f32 %v1030_v16, %v6380_v25  ;;  %v1044_v20 = vpop.f32.mrf.mxu3  ;;  %v1139_v25 = vmax.f32 %v1123_v19, 0.0  ;;  %v1112_v16 = vperm.slane %v6372_v49, 7  ;;  %v5776_v57 = vld [vmem:[#allocation7 + $0x404] sm:$0xf] }
  0xef   : > { %2826 = vmatpush.bf16.msrb.mxu0 %v4245_v7  ;;  %v1045_v62 = vadd.f32 %v1044_v20, %v6382_v31  ;;  %v4738_v31 = vld [vmem:[#allocation7 + $0x3f0] sm:$0xf0] }
  0xf0   : > { %2840 = vmatpush.bf16.msrb.mxu1 %v4373_v10  ;;  %v1131_v24 = vadd.f32 %v1107_v6, %v1031_v55  ;;  %v4741_v53 = vor.u32 %v5772_v38, %v4738_v31  ;;  %v4725_v6 = vor.u32 %v5768_v61, %v4722_v63  ;;  %v4930_v7 = vld [vmem:[#allocation7 + $0x570] sm:$0xf0]  ;;  %v5784_v55 = vld [vmem:[#allocation7 + $0x444] sm:$0xf] }
  0xf1   : > { %v1132_v32 = vadd.f32 %v1108_v13, %v1045_v62  ;;  %v4578_v13 = vld [vmem:[#allocation7 + $0x2b0] sm:$0xf0]  ;;  %v4933_v18 = vor.u32 %v5820_v5, %v4930_v7  ;;  %v5780_v38 = vld [vmem:[#allocation7 + $0x424] sm:$0xf] }
  0xf2   : > { %2827 = vmatmul.bf16.vlgmr.msrb.gmra.mxu0 %v6384_v35  ;;  %v1147_v23 = vmax.f32 %v1131_v24, 0.0  ;;  %v4581_v19 = vor.u32 %v5732_v9, %v4578_v13  ;;  %v4786_v20 = vld [vmem:[#allocation7 + $0x450] sm:$0xf0]  ;;  %v5728_v24 = vld [vmem:[#allocation7 + $0x284] sm:$0xf] }
  0xf3   : > { %2875 = vmatpush.bf16.msra.mxu0 %v4869_v11  ;;  %2841 = vmatmul.bf16.vlgmr.msrb.gmra.mxu1 %v6386_v40  ;;  %v1148_v42 = vmax.f32 %v1132_v32, 0.0  ;;  %v1111_v11 = vperm.slane %v6372_v49, 6  ;;  %v5760_v49 = vld [vmem:[#allocation7 + $0x384] sm:$0xf]  ;;  %v4789_v34 = vor.u32 %v5784_v55, %v4786_v20  ;;  %v4770_v31 = vld [vmem:[#allocation7 + $0x430] sm:$0xf0] }
  0xf4   : > { %2889 = vmatpush.bf16.msra.mxu1 %v4997_v12  ;;  %v6418_v45 = vpack.c.bf16 %v1147_v23, %v1139_v25  ;;  %v5764_v12 = vld [vmem:[#allocation7 + $0x3a4] sm:$0xf]  ;;  %v4773_v54 = vor.u32 %v5780_v38, %v4770_v31  ;;  %v4754_v63 = vld [vmem:[#allocation7 + $0x410] sm:$0xf0]  ;;  %v4360_v9 = vld [vmem:[#allocation7 + $0xe8] sm:$0xf] }
  0xf5   : > { %v6420_v51 = vpack.c.bf16 %v1148_v42, %v1140_v41  ;;  %v1084_v52 = vpop.f32.mrf.mxu2  ;;  %v5812_v41 = vld [vmem:[#allocation7 + $0x524] sm:$0xf]  ;;  %v4530_v5 = vld [vmem:[#allocation7 + $0x250] sm:$0xf0]  ;;  %v5679_v13 = vld [vmem:[#allocation7 + $0xf4] sm:$0xf0] }
  0xf6   : > { %v1098_v60 = vpop.f32.mrf.mxu3  ;;  %2743 = vmatmul.bf16.vlgmr.msrb.gmra.mxu2 %v6418_v45  ;;  %v1085_v10 = vadd.f32 %v1084_v52, %v6394_v2  ;;  %v4709_v2 = vor.u32 %v5764_v12, %v4706_v14  ;;  %v4658_v7 = vld [vmem:[#allocation7 + $0x350] sm:$0xf0]  ;;  %v5711_v12 = vld [vmem:[#allocation7 + $0x1f4] sm:$0xf0]  ;;  %v5748_v55 = vld [vmem:[#allocation7 + $0x324] sm:$0xf] }
  0xf7   : > { %2876 = vmatpush.bf16.msra.mxu0 %v4853_v22  ;;  %2757 = vmatmul.bf16.vlgmr.msrb.gmra.mxu3 %v6420_v51  ;;  %v1099_v15 = vadd.f32 %v1098_v60, %v6396_v3  ;;  %v4914_v22 = vld [vmem:[#allocation7 + $0x550] sm:$0xf0]  ;;  %v5868_v38 = vld [vmem:[#allocation7 + $0x6e4] sm:$0xf] }
  0xf8   : > { %2890 = vmatpush.bf16.msra.mxu1 %v4981_v26  ;;  %2847 = vmatpush.bf16.msrb.mxu2 %v4613_v47  ;;  %v4562_v26 = vld [vmem:[#allocation7 + $0x290] sm:$0xf0]  ;;  %v1127_v28 = vadd.f32 %v1111_v11, %v1085_v10  ;;  %v4917_v25 = vor.u32 %v5816_v21, %v4914_v22  ;;  %v4757_v10 = vor.u32 %v5776_v57, %v4754_v63  ;;  %v4472_v22 = vld [vmem:[#allocation7 + $0x1c8] sm:$0xf] }
  0xf9   : > { %2861 = vmatpush.bf16.msrb.mxu3 %v4741_v53  ;;  %v1128_v32 = vadd.f32 %v1112_v16, %v1099_v15  ;;  %v4565_v23 = vor.u32 %v5728_v24, %v4562_v26  ;;  %v4546_v47 = vld [vmem:[#allocation7 + $0x270] sm:$0xf0]  ;;  %v4533_v15 = vor.u32 %v5720_v4, %v4530_v5  ;;  %v5707_v24 = vld [vmem:[#allocation7 + $0x1d4] sm:$0xf0]  ;;  %v4424_v5 = vld [vmem:[#allocation7 + $0x168] sm:$0xf] }
  0xfa   : > { %v1143_v48 = vmax.f32 %v1127_v28, 0.0  ;;  %v4642_v21 = vld [vmem:[#allocation7 + $0x330] sm:$0xf0]  ;;  %v5712_v28 = vld [vmem:[#allocation7 + $0x204] sm:$0xf] }
  0xfb   : > { %2877 = vmatpush.bf16.msra.mxu0 %v4837_v43  ;;  %v4693_v43 = vor.u32 %v5760_v49, %v4690_v30  ;;  %v1144_v52 = vmax.f32 %v1128_v32, 0.0  ;;  %v4498_v49 = vld [vmem:[#allocation7 + $0x210] sm:$0xf0]  ;;  %v5744_v30 = vld [vmem:[#allocation7 + $0x304] sm:$0xf] }
  0xfc   : > { %2891 = vmatpush.bf16.msra.mxu1 %v4965_v46  ;;  %2848 = vmatpush.bf16.msrb.mxu2 %v4597_v56  ;;  %v5724_v46 = vld [vmem:[#allocation7 + $0x264] sm:$0xf]  ;;  %v4626_v32 = vld [vmem:[#allocation7 + $0x310] sm:$0xf0]  ;;  %v5663_v4 = vld [vmem:[#allocation7 + $0x74] sm:$0xf0] }
  0xfd   : > { %2862 = vmatpush.bf16.msrb.mxu3 %v4725_v6  ;;  %v1086_v62 = vpop.f32.mrf.mxu2  ;;  %v4549_v61 = vor.u32 %v5724_v46, %v4546_v47  ;;  %v5752_v6 = vld [vmem:[#allocation7 + $0x344] sm:$0xf]  ;;  %v5122_v31 = vld [vmem:[#allocation7 + $0x6f0] sm:$0xf0] }
  0xfe   : > { %v1087_v3 = vadd.f32 %v1086_v62, %v6400_v37  ;;  %v1100_v29 = vpop.f32.mrf.mxu3  ;;  %v4898_v37 = vld [vmem:[#allocation7 + $0x530] sm:$0xf0]  ;;  %v4344_v62 = vld [vmem:[#allocation7 + $0xc8] sm:$0xf] }
  0xff   : > { %2878 = vmatpush.bf16.msra.mxu0 %v4821_v0  ;;  %v1101_v33 = vadd.f32 %v1100_v29, %v6402_v27  ;;  %v4674_v27 = vld [vmem:[#allocation7 + $0x370] sm:$0xf0]  ;;  %v4901_v60 = vor.u32 %v5812_v41, %v4898_v37  ;;  %v5808_v0 = vld [vmem:[#allocation7 + $0x504] sm:$0xf]  ;;  %v4501_v41 = vor.u32 %v5712_v28, %v4498_v49  ;;  %v4629_v37 = vor.u32 %v5744_v30, %v4626_v32  ;;  %v4264_v28 = vld [vmem:[#allocation7 + $0x28] sm:$0xf] }
 0x100   : > { %2892 = vmatpush.bf16.msra.mxu1 %v4949_v1  ;;  %v1135_v36 = vadd.f32 %v1111_v11, %v1087_v3  ;;  %2849 = vmatpush.bf16.msrb.mxu2 %v4581_v19  ;;  %v4882_v1 = vld [vmem:[#allocation7 + $0x510] sm:$0xf0]  ;;  %v4677_v8 = vor.u32 %v5756_v59, %v4674_v27  ;;  %v4488_v11 = vld [vmem:[#allocation7 + $0x1e8] sm:$0xf]  ;;  %v4645_v3 = vor.u32 %v5748_v55, %v4642_v21  ;;  %v5667_v59 = vld [vmem:[#allocation7 + $0x94] sm:$0xf0] }
 0x101   : > { %v1136_v42 = vadd.f32 %v1112_v16, %v1101_v33  ;;  %2863 = vmatpush.bf16.msrb.mxu3 %v4709_v2  ;;  %v4885_v14 = vor.u32 %v5808_v0, %v4882_v1  ;;  %v4661_v16 = vor.u32 %v5752_v6, %v4658_v7  ;;  %v4514_v19 = vld [vmem:[#allocation7 + $0x230] sm:$0xf0]  ;;  %v4489_v20 = vor.u32 %v5711_v12, %v4488_v11  ;;  %v5675_v2 = vld [vmem:[#allocation7 + $0xd4] sm:$0xf0]  ;;  %v4440_v27 = vld [vmem:[#allocation7 + $0x188] sm:$0xf] }
 0x102   : > { %v1151_v50 = vmax.f32 %v1135_v36, 0.0  ;;  %v4345_v29 = vor.u32 %v5675_v2, %v4344_v62  ;;  %v4473_v33 = vor.u32 %v5707_v24, %v4472_v22  ;;  %v5671_v36 = vld [vmem:[#allocation7 + $0xb4] sm:$0xf0]  ;;  %v5106_v57 = vld [vmem:[#allocation7 + $0x6d0] sm:$0xf0] }
 0x103   : > { %2879 = vmatpush.bf16.msra.mxu0 %v4805_v17  ;;  %v1152_v53 = vmax.f32 %v1136_v42, 0.0  ;;  %v4361_v17 = vor.u32 %v5679_v13, %v4360_v9  ;;  %v5900_v42 = vld [vmem:[#allocation7 + $0x7e4] sm:$0xf]  ;;  %v5695_v7 = vld [vmem:[#allocation7 + $0x174] sm:$0xf0] }
 0x104   : > { %2893 = vmatpush.bf16.msra.mxu1 %v4933_v18  ;;  %v6430_v58 = vpack.c.bf16 %v1151_v50, %v1143_v48  ;;  %2850 = vmatpush.bf16.msrb.mxu2 %v4565_v23  ;;  %v5716_v18 = vld [vmem:[#allocation7 + $0x224] sm:$0xf]  ;;  %v5703_v23 = vld [vmem:[#allocation7 + $0x1b4] sm:$0xf0]  ;;  %v5125_v48 = vor.u32 %v5868_v38, %v5122_v31  ;;  %v4312_v50 = vld [vmem:[#allocation7 + $0x88] sm:$0xf] }
 0x105   : > { %v6432_v56 = vpack.c.bf16 %v1152_v53, %v1144_v52  ;;  %2864 = vmatpush.bf16.msrb.mxu3 %v4693_v43  ;;  %v4517_v26 = vor.u32 %v5716_v18, %v4514_v19  ;;  %v5250_v43 = vld [vmem:[#allocation7 + $0x7f0] sm:$0xf0]  ;;  %v5699_v53 = vld [vmem:[#allocation7 + $0x194] sm:$0xf0]  ;;  %v4313_v63 = vor.u32 %v5667_v59, %v4312_v50  ;;  %v5860_v9 = vld [vmem:[#allocation7 + $0x6a4] sm:$0xf] }
 0x106   : > { %2799 = vmatmul.bf16.vlgmr.msra.gmra.mxu2 %v6430_v58  ;;  %v5253_v52 = vor.u32 %v5900_v42, %v5250_v43  ;;  %v4441_v0 = vor.u32 %v5699_v53, %v4440_v27  ;;  %v5090_v13 = vld [vmem:[#allocation7 + $0x6b0] sm:$0xf0]  ;;  %v4408_v18 = vld [vmem:[#allocation7 + $0x148] sm:$0xf]  ;;  %v5691_v55 = vld [vmem:[#allocation7 + $0x154] sm:$0xf0] }
 0x107   : > { %2880 = vmatpush.bf16.msra.mxu0 %v4789_v34  ;;  %2813 = vmatmul.bf16.vlgmr.msra.gmra.mxu3 %v6432_v56  ;;  %v4328_v34 = vld [vmem:[#allocation7 + $0xa8] sm:$0xf]  ;;  %v5218_v11 = vld [vmem:[#allocation7 + $0x7b0] sm:$0xf0]  ;;  %v5888_v62 = vld [vmem:[#allocation7 + $0x784] sm:$0xf]  ;;  %v4409_v24 = vor.u32 %v5691_v55, %v4408_v18 }
 0x108   : > { %2894 = vmatpush.bf16.msra.mxu1 %v4917_v25  ;;  %2851 = vmatpush.bf16.msrb.mxu2 %v4549_v61  ;;  %v4456_v25 = vld [vmem:[#allocation7 + $0x1a8] sm:$0xf]  ;;  %v4329_v46 = vor.u32 %v5671_v36, %v4328_v34  ;;  %v5234_v61 = vld [vmem:[#allocation7 + $0x7d0] sm:$0xf0]  ;;  %v5687_v30 = vld [vmem:[#allocation7 + $0x134] sm:$0xf0] }
 0x109   : > { %2865 = vmatpush.bf16.msrb.mxu3 %v4677_v8  ;;  %v4457_v47 = vor.u32 %v5703_v23, %v4456_v25  ;;  %v4296_v8 = vld [vmem:[#allocation7 + $0x68] sm:$0xf]  ;;  %v5074_v21 = vld [vmem:[#allocation7 + $0x690] sm:$0xf0]  ;;  %v5852_v32 = vld [vmem:[#allocation7 + $0x664] sm:$0xf] }
 0x10a   : > { %v4297_v12 = vor.u32 %v5663_v4, %v4296_v8  ;;  %v5202_v2 = vld [vmem:[#allocation7 + $0x790] sm:$0xf0]  ;;  %v5884_v34 = vld [vmem:[#allocation7 + $0x764] sm:$0xf]  ;;  %v4248_v23 = vld [vmem:[#allocation7 + $0x8] sm:$0xf] }
 0x10b   : > { %2881 = vmatpush.bf16.msra.mxu0 %v4773_v54  ;;  %v5864_v54 = vld [vmem:[#allocation7 + $0x6c4] sm:$0xf]  ;;  %v5205_v49 = vor.u32 %v5888_v62, %v5202_v2  ;;  %v5186_v36 = vld [vmem:[#allocation7 + $0x770] sm:$0xf0]  ;;  %v4376_v42 = vld [vmem:[#allocation7 + $0x108] sm:$0xf] }
 0x10c   : > { %2895 = vmatpush.bf16.msra.mxu1 %v4901_v60  ;;  %2852 = vmatpush.bf16.msrb.mxu2 %v4533_v15  ;;  %v5896_v60 = vld [vmem:[#allocation7 + $0x7c4] sm:$0xf]  ;;  %v5109_v1 = vor.u32 %v5864_v54, %v5106_v57  ;;  %v5093_v15 = vor.u32 %v5860_v9, %v5090_v13  ;;  %v5683_v43 = vld [vmem:[#allocation7 + $0x114] sm:$0xf0]  ;;  %v5170_v50 = vld [vmem:[#allocation7 + $0x750] sm:$0xf0] }
 0x10d   : > { %2866 = vmatpush.bf16.msrb.mxu3 %v4661_v16  ;;  %v5237_v6 = vor.u32 %v5896_v60, %v5234_v61  ;;  %v4280_v16 = vld [vmem:[#allocation7 + $0x48] sm:$0xf]  ;;  %v5807_v27 = vld [vmem:[#allocation7 + $0x4f4] sm:$0xf0]  ;;  %v4377_v57 = vor.u32 %v5683_v43, %v4376_v42  ;;  %v5876_v8 = vld [vmem:[#allocation7 + $0x724] sm:$0xf] }
 0x10e   : > { %v4872_v59 = vld [vmem:[#allocation7 + $0x4e8] sm:$0xf]  ;;  %v5839_v54 = vld [vmem:[#allocation7 + $0x5f4] sm:$0xf0] }
 0x10f   : > { %2882 = vmatpush.bf16.msra.mxu0 %v4757_v10  ;;  %v5892_v10 = vld [vmem:[#allocation7 + $0x7a4] sm:$0xf]  ;;  %v5000_v53 = vld [vmem:[#allocation7 + $0x5e8] sm:$0xf]  ;;  %v5835_v13 = vld [vmem:[#allocation7 + $0x5d4] sm:$0xf0] }
 0x110   : > { %2896 = vmatpush.bf16.msra.mxu1 %v4885_v14  ;;  %2853 = vmatpush.bf16.msrb.mxu2 %v4517_v26  ;;  %v4425_v14 = vor.u32 %v5695_v7, %v4424_v5  ;;  %v5221_v19 = vor.u32 %v5892_v10, %v5218_v11  ;;  %v5001_v4 = vor.u32 %v5839_v54, %v5000_v53  ;;  %v5154_v5 = vld [vmem:[#allocation7 + $0x730] sm:$0xf0]  ;;  %v5803_v7 = vld [vmem:[#allocation7 + $0x4d4] sm:$0xf0]  ;;  %v4984_v9 = vld [vmem:[#allocation7 + $0x5c8] sm:$0xf] }
 0x111   : > { %2867 = vmatpush.bf16.msrb.mxu3 %v4645_v3  ;;  %v5655_v3 = vld [vmem:[#allocation7 + $0x34] sm:$0xf0]  ;;  %v5840_v11 = vld [vmem:[#allocation7 + $0x604] sm:$0xf]  ;;  %v4985_v18 = vor.u32 %v5835_v13, %v4984_v9  ;;  %v4616_v62 = vld [vmem:[#allocation7 + $0x2e8] sm:$0xf] }
 0x112   : > { %2883 = vmatmul.bf16.vlgmr.msra.gmra.mxu0 %v6404_v39  ;;  %v4265_v25 = vor.u32 %v5655_v3, %v4264_v28  ;;  %v5799_v55 = vld [vmem:[#allocation7 + $0x4b4] sm:$0xf0] }
 0x113   : > { %2931 = vmatpush.bf16.msrb.mxu0 %v4361_v17  ;;  %2897 = vmatmul.bf16.vlgmr.msra.gmra.mxu1 %v6406_v44  ;;  %v5659_v17 = vld [vmem:[#allocation7 + $0x54] sm:$0xf0] }
 0x114   : > { %2945 = vmatpush.bf16.msrb.mxu1 %v4489_v20  ;;  %2854 = vmatpush.bf16.msrb.mxu2 %v4501_v41  ;;  %v5856_v20 = vld [vmem:[#allocation7 + $0x684] sm:$0xf]  ;;  %v4281_v22 = vor.u32 %v5659_v17, %v4280_v16  ;;  %v5651_v41 = vld [vmem:[#allocation7 + $0x14] sm:$0xf0]  ;;  %v5138_v17 = vld [vmem:[#allocation7 + $0x710] sm:$0xf0] }
 0x115   : > { %2868 = vmatpush.bf16.msrb.mxu3 %v4629_v37  ;;  %v5077_v26 = vor.u32 %v5856_v20, %v5074_v21  ;;  %v5189_v37 = vor.u32 %v5884_v34, %v5186_v36  ;;  %v5872_v16 = vld [vmem:[#allocation7 + $0x704] sm:$0xf]  ;;  %v4968_v20 = vld [vmem:[#allocation7 + $0x5a8] sm:$0xf]  ;;  %v5831_v21 = vld [vmem:[#allocation7 + $0x5b4] sm:$0xf0] }
 0x116   : > { %v5743_v2 = vld [vmem:[#allocation7 + $0x2f4] sm:$0xf0]  ;;  %v5141_v28 = vor.u32 %v5872_v16, %v5138_v17  ;;  %v4552_v17 = vld [vmem:[#allocation7 + $0x268] sm:$0xf] }
 0x117   : > { %2932 = vmatpush.bf16.msrb.mxu0 %v4345_v29  ;;  %2855 = vmatmul.bf16.vlgmr.msrb.gmra.mxu2 %v6418_v45  ;;  %v4392_v29 = vld [vmem:[#allocation7 + $0x128] sm:$0xf]  ;;  %v5827_v36 = vld [vmem:[#allocation7 + $0x594] sm:$0xf0] }
 0x118   : > { %2946 = vmatpush.bf16.msrb.mxu1 %v4473_v33  ;;  %2903 = vmatpush.bf16.msra.mxu2 %v5125_v48  ;;  %v5058_v33 = vld [vmem:[#allocation7 + $0x670] sm:$0xf0]  ;;  %v4393_v38 = vor.u32 %v5687_v30, %v4392_v29  ;;  %v5880_v48 = vld [vmem:[#allocation7 + $0x744] sm:$0xf]  ;;  %v4969_v29 = vor.u32 %v5831_v21, %v4968_v20  ;;  %v4824_v30 = vld [vmem:[#allocation7 + $0x488] sm:$0xf] }
 0x119   : > { %2917 = vmatpush.bf16.msra.mxu3 %v5253_v52  ;;  %v5061_v31 = vor.u32 %v5852_v32, %v5058_v33  ;;  %v4249_v52 = vor.u32 %v5651_v41, %v4248_v23  ;;  %v5173_v61 = vor.u32 %v5880_v48, %v5170_v50  ;;  %v5795_v32 = vld [vmem:[#allocation7 + $0x494] sm:$0xf0]  ;;  %v4952_v33 = vld [vmem:[#allocation7 + $0x588] sm:$0xf] }
 0x11a   : > { %2869 = vmatmul.bf16.vlgmr.msrb.gmra.mxu3 %v6420_v51  ;;  %v5739_v23 = vld [vmem:[#allocation7 + $0x2d4] sm:$0xf0]  ;;  %v4825_v41 = vor.u32 %v5795_v32, %v4824_v30  ;;  %v4953_v42 = vor.u32 %v5827_v36, %v4952_v33  ;;  %v4760_v21 = vld [vmem:[#allocation7 + $0x408] sm:$0xf]  ;;  %v5677_v32 = vld [vmem:[#allocation7 + $0xec] sm:$0xf] }
 0x11b   : > { %2933 = vmatpush.bf16.msrb.mxu0 %v4329_v46  ;;  %v5848_v46 = vld [vmem:[#allocation7 + $0x644] sm:$0xf]  ;;  %v5823_v50 = vld [vmem:[#allocation7 + $0x574] sm:$0xf0]  ;;  %v4362_v33 = vld [vmem:[#allocation7 + $0xf8] sm:$0xf0] }
 0x11c   : > { %2947 = vmatpush.bf16.msrb.mxu1 %v4457_v47  ;;  %2904 = vmatpush.bf16.msra.mxu2 %v5109_v1  ;;  %v5042_v47 = vld [vmem:[#allocation7 + $0x650] sm:$0xf0]  ;;  %v5767_v53 = vld [vmem:[#allocation7 + $0x3b4] sm:$0xf0]  ;;  %v5709_v36 = vld [vmem:[#allocation7 + $0x1ec] sm:$0xf] }
 0x11d   : > { %2918 = vmatpush.bf16.msra.mxu3 %v5237_v6  ;;  %v5045_v60 = vor.u32 %v5848_v46, %v5042_v47  ;;  %v5026_v1 = vld [vmem:[#allocation7 + $0x630] sm:$0xf0]  ;;  %v4856_v6 = vld [vmem:[#allocation7 + $0x4c8] sm:$0xf]  ;;  %v5791_v46 = vld [vmem:[#allocation7 + $0x474] sm:$0xf0] }
 0x11e   : > { %v4936_v47 = vld [vmem:[#allocation7 + $0x568] sm:$0xf]  ;;  %v5815_v16 = vld [vmem:[#allocation7 + $0x534] sm:$0xf0] }
 0x11f   : > { %2934 = vmatpush.bf16.msrb.mxu0 %v4313_v63  ;;  %v4873_v63 = vor.u32 %v5807_v27, %v4872_v59  ;;  %v4584_v59 = vld [vmem:[#allocation7 + $0x2a8] sm:$0xf]  ;;  %v5735_v27 = vld [vmem:[#allocation7 + $0x2b4] sm:$0xf0] }
 0x120   : > { %2948 = vmatpush.bf16.msrb.mxu1 %v4441_v0  ;;  %2905 = vmatpush.bf16.msra.mxu2 %v5093_v15  ;;  %v5844_v0 = vld [vmem:[#allocation7 + $0x624] sm:$0xf]  ;;  %v5010_v15 = vld [vmem:[#allocation7 + $0x610] sm:$0xf0]  ;;  %v5755_v30 = vld [vmem:[#allocation7 + $0x354] sm:$0xf0] }
 0x121   : > { %2919 = vmatpush.bf16.msra.mxu3 %v5221_v19  ;;  %v5029_v10 = vor.u32 %v5844_v0, %v5026_v1  ;;  %v4840_v19 = vld [vmem:[#allocation7 + $0x4a8] sm:$0xf] }
 0x122   : > { %v4841_v3 = vor.u32 %v5799_v55, %v4840_v19  ;;  %v4920_v0 = vld [vmem:[#allocation7 + $0x548] sm:$0xf]  ;;  %v5759_v55 = vld [vmem:[#allocation7 + $0x374] sm:$0xf0] }
 0x123   : > { %2935 = vmatpush.bf16.msrb.mxu0 %v4297_v12  ;;  %v5157_v12 = vor.u32 %v5876_v8, %v5154_v5  ;;  %v5819_v8 = vld [vmem:[#allocation7 + $0x554] sm:$0xf0]  ;;  %v4680_v19 = vld [vmem:[#allocation7 + $0x368] sm:$0xf] }
 0x124   : > { %2949 = vmatpush.bf16.msrb.mxu1 %v4425_v14  ;;  %2906 = vmatpush.bf16.msra.mxu2 %v5077_v26  ;;  %v4857_v14 = vor.u32 %v5803_v7, %v4856_v6  ;;  %v5775_v26 = vld [vmem:[#allocation7 + $0x3f4] sm:$0xf0]  ;;  %v4696_v6 = vld [vmem:[#allocation7 + $0x388] sm:$0xf]  ;;  %v4921_v13 = vor.u32 %v5819_v8, %v4920_v0  ;;  %v4330_v8 = vld [vmem:[#allocation7 + $0xb8] sm:$0xf0] }
 0x125   : > { %2920 = vmatpush.bf16.msra.mxu3 %v5205_v49  ;;  %v4617_v49 = vor.u32 %v5743_v2, %v4616_v62  ;;  %v5731_v5 = vld [vmem:[#allocation7 + $0x294] sm:$0xf0] }
 0x126   : > { %v5763_v7 = vld [vmem:[#allocation7 + $0x394] sm:$0xf0] }
 0x127   : > { %2936 = vmatpush.bf16.msrb.mxu0 %v4281_v22  ;;  %v5013_v22 = vor.u32 %v5840_v11, %v5010_v15  ;;  %v4776_v11 = vld [vmem:[#allocation7 + $0x428] sm:$0xf]  ;;  %v4697_v15 = vor.u32 %v5763_v7, %v4696_v6  ;;  %v5871_v7 = vld [vmem:[#allocation7 + $0x6f4] sm:$0xf0] }
 0x128   : > { %2950 = vmatpush.bf16.msrb.mxu1 %v4409_v24  ;;  %2907 = vmatpush.bf16.msra.mxu2 %v5061_v31  ;;  %v4744_v24 = vld [vmem:[#allocation7 + $0x3e8] sm:$0xf]  ;;  %v5771_v31 = vld [vmem:[#allocation7 + $0x3d4] sm:$0xf0] }
 0x129   : > { %2921 = vmatpush.bf16.msra.mxu3 %v5189_v37  ;;  %v4745_v34 = vor.u32 %v5775_v26, %v4744_v24  ;;  %v4808_v37 = vld [vmem:[#allocation7 + $0x468] sm:$0xf]  ;;  %v5811_v26 = vld [vmem:[#allocation7 + $0x514] sm:$0xf0] }
 0x12a   : > { %v4809_v54 = vor.u32 %v5791_v46, %v4808_v37  ;;  %v4888_v24 = vld [vmem:[#allocation7 + $0x508] sm:$0xf] }
 0x12b   : > { %2937 = vmatpush.bf16.msrb.mxu0 %v4265_v25  ;;  %v4600_v25 = vld [vmem:[#allocation7 + $0x2c8] sm:$0xf] }
 0x12c   : > { %2951 = vmatpush.bf16.msrb.mxu1 %v4393_v38  ;;  %2908 = vmatpush.bf16.msra.mxu2 %v5045_v60  ;;  %v4728_v38 = vld [vmem:[#allocation7 + $0x3c8] sm:$0xf]  ;;  %v4601_v43 = vor.u32 %v5739_v23, %v4600_v25  ;;  %v4585_v60 = vor.u32 %v5735_v27, %v4584_v59  ;;  %v4490_v25 = vld [vmem:[#allocation7 + $0x1f8] sm:$0xf0]  ;;  %v4889_v23 = vor.u32 %v5811_v26, %v4888_v24  ;;  %v5705_v59 = vld [vmem:[#allocation7 + $0x1cc] sm:$0xf] }
 0x12d   : > { %2922 = vmatpush.bf16.msra.mxu3 %v5173_v61  ;;  %v4729_v48 = vor.u32 %v5771_v31, %v4728_v38  ;;  %v4792_v61 = vld [vmem:[#allocation7 + $0x448] sm:$0xf]  ;;  %v4493_v46 = vor.u32 %v5709_v36, %v4490_v25  ;;  %v4474_v27 = vld [vmem:[#allocation7 + $0x1d8] sm:$0xf0]  ;;  %v5895_v36 = vld [vmem:[#allocation7 + $0x7b4] sm:$0xf0] }
 0x12e   : > { %v4648_v37 = vld [vmem:[#allocation7 + $0x328] sm:$0xf]  ;;  %v4477_v0 = vor.u32 %v5705_v59, %v4474_v27 }
 0x12f   : > { %2938 = vmatpush.bf16.msrb.mxu0 %v4249_v52  ;;  %v4712_v52 = vld [vmem:[#allocation7 + $0x3a8] sm:$0xf] }
 0x130   : > { %2952 = vmatpush.bf16.msrb.mxu1 %v4377_v57  ;;  %2909 = vmatpush.bf16.msra.mxu2 %v5029_v10  ;;  %v4937_v57 = vor.u32 %v5823_v50, %v4936_v47  ;;  %v4713_v1 = vor.u32 %v5767_v53, %v4712_v52  ;;  %v5751_v47 = vld [vmem:[#allocation7 + $0x334] sm:$0xf0]  ;;  %v4346_v50 = vld [vmem:[#allocation7 + $0xd8] sm:$0xf0]  ;;  %v4504_v53 = vld [vmem:[#allocation7 + $0x208] sm:$0xf] }
 0x131   : > { %2923 = vmatpush.bf16.msra.mxu3 %v5157_v12  ;;  %v5783_v12 = vld [vmem:[#allocation7 + $0x434] sm:$0xf0]  ;;  %v5128_v6 = vld [vmem:[#allocation7 + $0x6e8] sm:$0xf] }
 0x132   : > { %2939 = vmatmul.bf16.vlgmr.msrb.gmra.mxu0 %v6384_v35  ;;  %v4777_v20 = vor.u32 %v5783_v12, %v4776_v11 }
 0x133   : > { %2987 = vmatpush.bf16.msra.mxu0 %v4873_v63  ;;  %2953 = vmatmul.bf16.vlgmr.msrb.gmra.mxu1 %v6386_v40  ;;  %v5787_v63 = vld [vmem:[#allocation7 + $0x454] sm:$0xf0] }
 0x134   : > { %3001 = vmatpush.bf16.msra.mxu1 %v5001_v4  ;;  %2910 = vmatpush.bf16.msra.mxu2 %v5013_v22  ;;  %v4568_v4 = vld [vmem:[#allocation7 + $0x288] sm:$0xf]  ;;  %v4793_v9 = vor.u32 %v5787_v63, %v4792_v61  ;;  %v5779_v22 = vld [vmem:[#allocation7 + $0x414] sm:$0xf0] }
 0x135   : > { %2924 = vmatpush.bf16.msra.mxu3 %v5141_v28  ;;  %v4569_v10 = vor.u32 %v5731_v5, %v4568_v4  ;;  %v4681_v28 = vor.u32 %v5759_v55, %v4680_v19  ;;  %v4632_v61 = vld [vmem:[#allocation7 + $0x308] sm:$0xf]  ;;  %v5747_v63 = vld [vmem:[#allocation7 + $0x314] sm:$0xf0]  ;;  %v5701_v4 = vld [vmem:[#allocation7 + $0x1ac] sm:$0xf] }
 0x136   : > { %v4458_v5 = vld [vmem:[#allocation7 + $0x1b8] sm:$0xf0]  ;;  %v4633_v11 = vor.u32 %v5747_v63, %v4632_v61  ;;  %v5064_v63 = vld [vmem:[#allocation7 + $0x668] sm:$0xf] }
 0x137   : > { %2988 = vmatpush.bf16.msra.mxu0 %v4857_v14  ;;  %2911 = vmatmul.bf16.vlgmr.msra.gmra.mxu2 %v6430_v58  ;;  %v4904_v14 = vld [vmem:[#allocation7 + $0x528] sm:$0xf]  ;;  %v4442_v55 = vld [vmem:[#allocation7 + $0x198] sm:$0xf0] }
 0x138   : > { %3002 = vmatpush.bf16.msra.mxu1 %v4985_v18  ;;  %2959 = vmatpush.bf16.msrb.mxu2 %v4617_v49  ;;  %v5727_v18 = vld [vmem:[#allocation7 + $0x274] sm:$0xf0]  ;;  %v4905_v62 = vor.u32 %v5815_v16, %v4904_v14  ;;  %v4664_v49 = vld [vmem:[#allocation7 + $0x348] sm:$0xf]  ;;  %v4461_v14 = vor.u32 %v5701_v4, %v4458_v5  ;;  %v5665_v16 = vld [vmem:[#allocation7 + $0x8c] sm:$0xf] }
 0x139   : > { %2973 = vmatpush.bf16.msrb.mxu3 %v4745_v34  ;;  %v4553_v2 = vor.u32 %v5727_v18, %v4552_v17  ;;  %v4761_v34 = vor.u32 %v5779_v22, %v4760_v21  ;;  %v4665_v31 = vor.u32 %v5755_v30, %v4664_v49  ;;  %v4314_v17 = vld [vmem:[#allocation7 + $0x98] sm:$0xf0]  ;;  %v5697_v18 = vld [vmem:[#allocation7 + $0x18c] sm:$0xf]  ;;  %v5867_v21 = vld [vmem:[#allocation7 + $0x6d4] sm:$0xf0] }
 0x13a   : > { %2925 = vmatmul.bf16.vlgmr.msra.gmra.mxu3 %v6432_v56  ;;  %v4317_v22 = vor.u32 %v5665_v16, %v4314_v17  ;;  %v4445_v24 = vor.u32 %v5697_v18, %v4442_v55  ;;  %v4426_v30 = vld [vmem:[#allocation7 + $0x178] sm:$0xf0]  ;;  %v5649_v5 = vld [vmem:[#allocation7 + $0xc] sm:$0xf]  ;;  %v5883_v16 = vld [vmem:[#allocation7 + $0x754] sm:$0xf0] }
 0x13b   : > { %2989 = vmatpush.bf16.msra.mxu0 %v4841_v3  ;;  %v4536_v3 = vld [vmem:[#allocation7 + $0x248] sm:$0xf]  ;;  %v4394_v61 = vld [vmem:[#allocation7 + $0x138] sm:$0xf0]  ;;  %v5805_v17 = vld [vmem:[#allocation7 + $0x4ec] sm:$0xf] }
 0x13c   : > { %3003 = vmatpush.bf16.msra.mxu1 %v4969_v29  ;;  %2960 = vmatpush.bf16.msrb.mxu2 %v4601_v43  ;;  %v5723_v29 = vld [vmem:[#allocation7 + $0x254] sm:$0xf0]  ;;  %v4874_v18 = vld [vmem:[#allocation7 + $0x4f8] sm:$0xf0]  ;;  %v5837_v55 = vld [vmem:[#allocation7 + $0x5ec] sm:$0xf] }
 0x13d   : > { %2974 = vmatpush.bf16.msrb.mxu3 %v4729_v48  ;;  %v4537_v38 = vor.u32 %v5723_v29, %v4536_v3  ;;  %v5719_v43 = vld [vmem:[#allocation7 + $0x234] sm:$0xf0]  ;;  %v5673_v48 = vld [vmem:[#allocation7 + $0xcc] sm:$0xf]  ;;  %v4298_v3 = vld [vmem:[#allocation7 + $0x78] sm:$0xf0] }
 0x13e   : > { %v5693_v29 = vld [vmem:[#allocation7 + $0x16c] sm:$0xf] }
 0x13f   : > { %2990 = vmatpush.bf16.msra.mxu0 %v4825_v41  ;;  %v4365_v41 = vor.u32 %v5677_v32, %v4362_v33  ;;  %v5096_v32 = vld [vmem:[#allocation7 + $0x6a8] sm:$0xf]  ;;  %v5863_v33 = vld [vmem:[#allocation7 + $0x6b4] sm:$0xf0] }
 0x140   : > { %3004 = vmatpush.bf16.msra.mxu1 %v4953_v42  ;;  %2961 = vmatpush.bf16.msrb.mxu2 %v4585_v60  ;;  %v4520_v42 = vld [vmem:[#allocation7 + $0x228] sm:$0xf]  ;;  %v5715_v60 = vld [vmem:[#allocation7 + $0x214] sm:$0xf0] }
 0x141   : > { %2975 = vmatpush.bf16.msrb.mxu3 %v4713_v1  ;;  %v4521_v52 = vor.u32 %v5719_v43, %v4520_v42  ;;  %v5669_v1 = vld [vmem:[#allocation7 + $0xac] sm:$0xf] }
 0x142   : > { %v4333_v12 = vor.u32 %v5669_v1, %v4330_v8  ;;  %v5689_v42 = vld [vmem:[#allocation7 + $0x14c] sm:$0xf]  ;;  %v5192_v1 = vld [vmem:[#allocation7 + $0x768] sm:$0xf]  ;;  %v5887_v8 = vld [vmem:[#allocation7 + $0x774] sm:$0xf0] }
 0x143   : > { %2991 = vmatpush.bf16.msra.mxu0 %v4809_v54  ;;  %v4649_v54 = vor.u32 %v5751_v47, %v4648_v37  ;;  %v4410_v37 = vld [vmem:[#allocation7 + $0x158] sm:$0xf0]  ;;  %v5859_v47 = vld [vmem:[#allocation7 + $0x694] sm:$0xf0] }
 0x144   : > { %3005 = vmatpush.bf16.msra.mxu1 %v4937_v57  ;;  %2962 = vmatpush.bf16.msrb.mxu2 %v4569_v10  ;;  %v4349_v57 = vor.u32 %v5673_v48, %v4346_v50  ;;  %v5903_v10 = vld [vmem:[#allocation7 + $0x7f4] sm:$0xf0]  ;;  %v5208_v48 = vld [vmem:[#allocation7 + $0x788] sm:$0xf]  ;;  %v4413_v27 = vor.u32 %v5689_v42, %v4410_v37  ;;  %v4842_v37 = vld [vmem:[#allocation7 + $0x4b8] sm:$0xf0] }
 0x145   : > { %2976 = vmatpush.bf16.msrb.mxu3 %v4697_v15  ;;  %v5129_v15 = vor.u32 %v5871_v7, %v5128_v6  ;;  %v5891_v50 = vld [vmem:[#allocation7 + $0x794] sm:$0xf0] }
 0x147   : > { %2992 = vmatpush.bf16.msra.mxu0 %v4793_v9  ;;  %v4505_v9 = vor.u32 %v5715_v60, %v4504_v53  ;;  %v5653_v53 = vld [vmem:[#allocation7 + $0x2c] sm:$0xf]  ;;  %v5209_v60 = vor.u32 %v5891_v50, %v5208_v48  ;;  %v4618_v50 = vld [vmem:[#allocation7 + $0x2f8] sm:$0xf0] }
 0x148   : > { %3006 = vmatpush.bf16.msra.mxu1 %v4921_v13  ;;  %2963 = vmatpush.bf16.msrb.mxu2 %v4553_v2  ;;  %v5256_v13 = vld [vmem:[#allocation7 + $0x7e8] sm:$0xf]  ;;  %v5899_v2 = vld [vmem:[#allocation7 + $0x7d4] sm:$0xf0]  ;;  %v5741_v48 = vld [vmem:[#allocation7 + $0x2ec] sm:$0xf] }
 0x149   : > { %2977 = vmatpush.bf16.msrb.mxu3 %v4681_v28  ;;  %v5257_v19 = vor.u32 %v5903_v10, %v5256_v13  ;;  %v5661_v28 = vld [vmem:[#allocation7 + $0x6c] sm:$0xf]  ;;  %v4378_v10 = vld [vmem:[#allocation7 + $0x118] sm:$0xf0] }
 0x14a   : > { %v4301_v25 = vor.u32 %v5661_v28, %v4298_v3  ;;  %v5681_v13 = vld [vmem:[#allocation7 + $0x10c] sm:$0xf]  ;;  %v5160_v28 = vld [vmem:[#allocation7 + $0x728] sm:$0xf] }
 0x14b   : > { %2993 = vmatpush.bf16.msra.mxu0 %v4777_v20  ;;  %v5112_v20 = vld [vmem:[#allocation7 + $0x6c8] sm:$0xf] }
 0x14c   : > { %3007 = vmatpush.bf16.msra.mxu1 %v4905_v62  ;;  %2964 = vmatpush.bf16.msrb.mxu2 %v4537_v38  ;;  %v5240_v62 = vld [vmem:[#allocation7 + $0x7c8] sm:$0xf]  ;;  %v5113_v26 = vor.u32 %v5867_v21, %v5112_v20  ;;  %v5097_v38 = vor.u32 %v5863_v33, %v5096_v32  ;;  %v5002_v20 = vld [vmem:[#allocation7 + $0x5f8] sm:$0xf0]  ;;  %v4381_v21 = vor.u32 %v5681_v13, %v4378_v10  ;;  %v5833_v32 = vld [vmem:[#allocation7 + $0x5cc] sm:$0xf] }
 0x14d   : > { %2978 = vmatpush.bf16.msrb.mxu3 %v4665_v31  ;;  %v5241_v49 = vor.u32 %v5899_v2, %v5240_v62  ;;  %v5657_v31 = vld [vmem:[#allocation7 + $0x4c] sm:$0xf]  ;;  %v5005_v3 = vor.u32 %v5837_v55, %v5002_v20  ;;  %v4986_v33 = vld [vmem:[#allocation7 + $0x5d8] sm:$0xf0] }
 0x14e   : > { %v4989_v42 = vor.u32 %v5833_v32, %v4986_v33  ;;  %v5789_v13 = vld [vmem:[#allocation7 + $0x46c] sm:$0xf]  ;;  %v4810_v10 = vld [vmem:[#allocation7 + $0x478] sm:$0xf0] }
 0x14f   : > { %2994 = vmatpush.bf16.msra.mxu0 %v4761_v34  ;;  %v5224_v34 = vld [vmem:[#allocation7 + $0x7a8] sm:$0xf]  ;;  %v4813_v55 = vor.u32 %v5789_v13, %v4810_v10 }
 0x150   : > { %3008 = vmatpush.bf16.msra.mxu1 %v4889_v23  ;;  %2965 = vmatpush.bf16.msrb.mxu2 %v4521_v52  ;;  %v4429_v23 = vor.u32 %v5693_v29, %v4426_v30  ;;  %v5225_v43 = vor.u32 %v5895_v36, %v5224_v34  ;;  %v5879_v29 = vld [vmem:[#allocation7 + $0x734] sm:$0xf0]  ;;  %v4858_v30 = vld [vmem:[#allocation7 + $0x4d8] sm:$0xf0]  ;;  %v5016_v36 = vld [vmem:[#allocation7 + $0x608] sm:$0xf] }
 0x151   : > { %2979 = vmatpush.bf16.msrb.mxu3 %v4649_v54  ;;  %v4266_v54 = vld [vmem:[#allocation7 + $0x38] sm:$0xf0] }
 0x152   : > { %2995 = vmatmul.bf16.vlgmr.msra.gmra.mxu0 %v6404_v39  ;;  %v4269_v4 = vor.u32 %v5653_v53, %v4266_v54 }
 0x153   : > { %3043 = vmatpush.bf16.msrb.mxu0 %v4365_v41  ;;  %3009 = vmatmul.bf16.vlgmr.msra.gmra.mxu1 %v6406_v44  ;;  %v4282_v41 = vld [vmem:[#allocation7 + $0x58] sm:$0xf0] }
 0x154   : > { %3057 = vmatpush.bf16.msrb.mxu1 %v4493_v46  ;;  %2966 = vmatpush.bf16.msrb.mxu2 %v4505_v9  ;;  %v5080_v46 = vld [vmem:[#allocation7 + $0x688] sm:$0xf]  ;;  %v4285_v59 = vor.u32 %v5657_v31, %v4282_v41  ;;  %v4250_v9 = vld [vmem:[#allocation7 + $0x18] sm:$0xf0]  ;;  %v5875_v41 = vld [vmem:[#allocation7 + $0x714] sm:$0xf0] }
 0x155   : > { %2980 = vmatpush.bf16.msrb.mxu3 %v4633_v11  ;;  %v5081_v52 = vor.u32 %v5859_v47, %v5080_v46  ;;  %v5193_v11 = vor.u32 %v5887_v8, %v5192_v1  ;;  %v5144_v31 = vld [vmem:[#allocation7 + $0x708] sm:$0xf]  ;;  %v5829_v46 = vld [vmem:[#allocation7 + $0x5ac] sm:$0xf]  ;;  %v4970_v47 = vld [vmem:[#allocation7 + $0x5b8] sm:$0xf0] }
 0x156   : > { %v5145_v53 = vor.u32 %v5875_v41, %v5144_v31  ;;  %v4954_v1 = vld [vmem:[#allocation7 + $0x598] sm:$0xf0] }
 0x157   : > { %3044 = vmatpush.bf16.msrb.mxu0 %v4349_v57  ;;  %2967 = vmatmul.bf16.vlgmr.msrb.gmra.mxu2 %v6418_v45  ;;  %v5685_v57 = vld [vmem:[#allocation7 + $0x12c] sm:$0xf]  ;;  %v4602_v8 = vld [vmem:[#allocation7 + $0x2d8] sm:$0xf0] }
 0x158   : > { %3058 = vmatpush.bf16.msrb.mxu1 %v4477_v0  ;;  %3015 = vmatpush.bf16.msra.mxu2 %v5129_v15  ;;  %v5855_v0 = vld [vmem:[#allocation7 + $0x674] sm:$0xf0]  ;;  %v4397_v6 = vor.u32 %v5685_v57, %v4394_v61  ;;  %v5176_v15 = vld [vmem:[#allocation7 + $0x748] sm:$0xf]  ;;  %v4973_v57 = vor.u32 %v5829_v46, %v4970_v47  ;;  %v4826_v61 = vld [vmem:[#allocation7 + $0x498] sm:$0xf0] }
 0x159   : > { %3029 = vmatpush.bf16.msra.mxu3 %v5257_v19  ;;  %v5065_v7 = vor.u32 %v5855_v0, %v5064_v63  ;;  %v4253_v19 = vor.u32 %v5649_v5, %v4250_v9  ;;  %v5177_v2 = vor.u32 %v5883_v16, %v5176_v15  ;;  %v5825_v63 = vld [vmem:[#allocation7 + $0x58c] sm:$0xf]  ;;  %v4730_v5 = vld [vmem:[#allocation7 + $0x3d8] sm:$0xf0] }
 0x15a   : > { %2981 = vmatmul.bf16.vlgmr.msrb.gmra.mxu3 %v6420_v51  ;;  %v4938_v15 = vld [vmem:[#allocation7 + $0x578] sm:$0xf0]  ;;  %v5733_v16 = vld [vmem:[#allocation7 + $0x2ac] sm:$0xf] }
 0x15b   : > { %3045 = vmatpush.bf16.msrb.mxu0 %v4333_v12  ;;  %v5048_v12 = vld [vmem:[#allocation7 + $0x648] sm:$0xf]  ;;  %v4906_v41 = vld [vmem:[#allocation7 + $0x538] sm:$0xf0] }
 0x15c   : > { %3059 = vmatpush.bf16.msrb.mxu1 %v4461_v14  ;;  %3016 = vmatpush.bf16.msra.mxu2 %v5113_v26  ;;  %v5851_v14 = vld [vmem:[#allocation7 + $0x654] sm:$0xf0]  ;;  %v4682_v46 = vld [vmem:[#allocation7 + $0x378] sm:$0xf0] }
 0x15d   : > { %3030 = vmatpush.bf16.msra.mxu3 %v5241_v49  ;;  %v5049_v62 = vor.u32 %v5851_v14, %v5048_v12  ;;  %v5847_v26 = vld [vmem:[#allocation7 + $0x634] sm:$0xf0]  ;;  %v5801_v49 = vld [vmem:[#allocation7 + $0x4cc] sm:$0xf]  ;;  %v6450_v12 = vpop.f32.mrf.mxu0  ;;  %v6461_v47 = vld [vmem:[%s6559_s6] sm:$0xf] }
 0x15f   : > { %3046 = vmatpush.bf16.msrb.mxu0 %v4317_v22  ;;  %v4877_v22 = vor.u32 %v5805_v17, %v4874_v18  ;;  %v4586_v17 = vld [vmem:[#allocation7 + $0x2b8] sm:$0xf0]  ;;  %v5765_v18 = vld [vmem:[#allocation7 + $0x3ac] sm:$0xf] }
 0x160   : > { %3060 = vmatpush.bf16.msrb.mxu1 %v4445_v24  ;;  %3017 = vmatpush.bf16.msra.mxu2 %v5097_v38  ;;  %v5032_v24 = vld [vmem:[#allocation7 + $0x628] sm:$0xf]  ;;  %v5843_v38 = vld [vmem:[#allocation7 + $0x614] sm:$0xf0] }
 0x161   : > { %3031 = vmatpush.bf16.msra.mxu3 %v5225_v43  ;;  %v5033_v34 = vor.u32 %v5847_v26, %v5032_v24  ;;  %v5797_v43 = vld [vmem:[#allocation7 + $0x4ac] sm:$0xf]  ;;  %v6454_v24 = vpop.f32.mrf.mxu1 }
 0x162   : > { %v4845_v54 = vor.u32 %v5797_v43, %v4842_v37  ;;  %v4554_v43 = vld [vmem:[#allocation7 + $0x278] sm:$0xf0]  ;;  %v5757_v37 = vld [vmem:[#allocation7 + $0x36c] sm:$0xf] }
 0x163   : > { %3047 = vmatpush.bf16.msrb.mxu0 %v4301_v25  ;;  %v5161_v25 = vor.u32 %v5879_v29, %v5160_v28  ;;  %v4922_v28 = vld [vmem:[#allocation7 + $0x558] sm:$0xf0] }
 0x164   : > { %3061 = vmatpush.bf16.msrb.mxu1 %v4429_v23  ;;  %3018 = vmatpush.bf16.msra.mxu2 %v5081_v52  ;;  %v4861_v23 = vor.u32 %v5801_v49, %v4858_v30  ;;  %v4746_v52 = vld [vmem:[#allocation7 + $0x3f8] sm:$0xf0]  ;;  %v5761_v49 = vld [vmem:[#allocation7 + $0x38c] sm:$0xf] }
 0x165   : > { %3032 = vmatpush.bf16.msra.mxu3 %v5209_v60  ;;  %v5793_v60 = vld [vmem:[#allocation7 + $0x48c] sm:$0xf]  ;;  %v4570_v29 = vld [vmem:[#allocation7 + $0x298] sm:$0xf0] }
 0x166   : > { %v4698_v30 = vld [vmem:[#allocation7 + $0x398] sm:$0xf0] }
 0x167   : > { %3048 = vmatpush.bf16.msrb.mxu0 %v4285_v59  ;;  %v5017_v59 = vor.u32 %v5843_v38, %v5016_v36  ;;  %v5781_v36 = vld [vmem:[#allocation7 + $0x42c] sm:$0xf]  ;;  %v4701_v38 = vor.u32 %v5761_v49, %v4698_v30 }
 0x168   : > { %3062 = vmatpush.bf16.msrb.mxu1 %v4413_v27  ;;  %3019 = vmatpush.bf16.msra.mxu2 %v5065_v7  ;;  %v5773_v27 = vld [vmem:[#allocation7 + $0x3ec] sm:$0xf]  ;;  %v4957_v7 = vor.u32 %v5825_v63, %v4954_v1  ;;  %v4538_v63 = vld [vmem:[#allocation7 + $0x258] sm:$0xf0] }
 0x169   : > { %3033 = vmatpush.bf16.msra.mxu3 %v5193_v11  ;;  %v4749_v0 = vor.u32 %v5773_v27, %v4746_v52  ;;  %v5821_v11 = vld [vmem:[#allocation7 + $0x56c] sm:$0xf]  ;;  %v4666_v1 = vld [vmem:[#allocation7 + $0x358] sm:$0xf0] }
 0x16a   : > { %v4941_v20 = vor.u32 %v5821_v11, %v4938_v15  ;;  %v5777_v27 = vld [vmem:[#allocation7 + $0x40c] sm:$0xf] }
 0x16b   : > { %3049 = vmatpush.bf16.msrb.mxu0 %v4269_v4  ;;  %v5769_v4 = vld [vmem:[#allocation7 + $0x3cc] sm:$0xf] }
 0x16c   : > { %3063 = vmatpush.bf16.msrb.mxu1 %v4397_v6  ;;  %3020 = vmatpush.bf16.msra.mxu2 %v5049_v62  ;;  %v4829_v6 = vor.u32 %v5793_v60, %v4826_v61  ;;  %v4733_v14 = vor.u32 %v5769_v4, %v4730_v5  ;;  %v5785_v62 = vld [vmem:[#allocation7 + $0x44c] sm:$0xf]  ;;  %v4685_v60 = vor.u32 %v5757_v37, %v4682_v46  ;;  %v2732_v4 = vpop.f32.mrf.mxu1  ;;  %v5258_v37 = vld [vmem:[#allocation7 + $0x7f8] sm:$0xf0] }
 0x16d   : > { %3034 = vmatpush.bf16.msra.mxu3 %v5177_v2  ;;  %v4794_v2 = vld [vmem:[#allocation7 + $0x458] sm:$0xf0]  ;;  %v5721_v61 = vld [vmem:[#allocation7 + $0x24c] sm:$0xf] }
 0x16e   : > { %v4797_v32 = vor.u32 %v5785_v62, %v4794_v2  ;;  %v4541_v10 = vor.u32 %v5721_v61, %v4538_v63  ;;  %v5376_v2 = vld [vmem:[#allocation8 + $0xe0] sm:$0xf]  ;;  %v5913_v63 = vld [vmem:[#allocation8 + $0x44] sm:$0xf0] }
 0x16f   : > { %3050 = vmatpush.bf16.msrb.mxu0 %v4253_v19  ;;  %v4714_v19 = vld [vmem:[#allocation7 + $0x3b8] sm:$0xf0]  ;;  %v5296_v61 = vld [vmem:[#allocation8 + $0x40] sm:$0xf] }
 0x170   : > { %3064 = vmatpush.bf16.msrb.mxu1 %v4381_v21  ;;  %3021 = vmatpush.bf16.msra.mxu2 %v5033_v34  ;;  %v4589_v21 = vor.u32 %v5733_v16, %v4586_v17  ;;  %v4717_v26 = vor.u32 %v5765_v18, %v4714_v19  ;;  %v5717_v16 = vld [vmem:[#allocation7 + $0x22c] sm:$0xf]  ;;  %v4522_v17 = vld [vmem:[#allocation7 + $0x238] sm:$0xf0] }
 0x171   : > { %3035 = vmatpush.bf16.msra.mxu3 %v5161_v25  ;;  %v4778_v25 = vld [vmem:[#allocation7 + $0x438] sm:$0xf0]  ;;  %v5749_v18 = vld [vmem:[#allocation7 + $0x32c] sm:$0xf] }
 0x172   : > { %3051 = vmatmul.bf16.vlgmr.msrb.gmra.mxu0 %v6384_v35  ;;  %v4621_v35 = vor.u32 %v5741_v48, %v4618_v50  ;;  %v2718_v48 = vpop.f32.mrf.mxu0 }
 0x173   : > { %3099 = vmatpush.bf16.msra.mxu0 %v4877_v22  ;;  %3065 = vmatmul.bf16.vlgmr.msrb.gmra.mxu1 %v6386_v40  ;;  %v5737_v40 = vld [vmem:[#allocation7 + $0x2cc] sm:$0xf] }
 0x174   : > { %3113 = vmatpush.bf16.msra.mxu1 %v5005_v3  ;;  %3022 = vmatpush.bf16.msra.mxu2 %v5017_v59  ;;  %v4605_v9 = vor.u32 %v5737_v40, %v4602_v8  ;;  %v5817_v22 = vld [vmem:[#allocation7 + $0x54c] sm:$0xf]  ;;  %v4781_v59 = vor.u32 %v5781_v36, %v4778_v25  ;;  %v5320_v40 = vld [vmem:[#allocation8 + $0x70] sm:$0xf]  ;;  %v5919_v8 = vld [vmem:[#allocation8 + $0x74] sm:$0xf0] }
 0x175   : > { %3036 = vmatpush.bf16.msra.mxu3 %v5145_v53  ;;  %v5729_v3 = vld [vmem:[#allocation7 + $0x28c] sm:$0xf]  ;;  %v4925_v33 = vor.u32 %v5817_v22, %v4922_v28  ;;  %v5933_v22 = vld [vmem:[#allocation8 + $0xe4] sm:$0xf0]  ;;  %v4525_v28 = vor.u32 %v5717_v16, %v4522_v17  ;;  %v4634_v36 = vld [vmem:[#allocation7 + $0x318] sm:$0xf0] }
 0x176   : > { %v4573_v34 = vor.u32 %v5729_v3, %v4570_v29  ;;  %v5713_v3 = vld [vmem:[#allocation7 + $0x20c] sm:$0xf]  ;;  %v5098_v17 = vld [vmem:[#allocation7 + $0x6b8] sm:$0xf0] }
 0x177   : > { %3100 = vmatpush.bf16.msra.mxu0 %v4861_v23  ;;  %3023 = vmatmul.bf16.vlgmr.msra.gmra.mxu2 %v6430_v58  ;;  %v5813_v23 = vld [vmem:[#allocation7 + $0x52c] sm:$0xf] }
 0x178   : > { %3114 = vmatpush.bf16.msra.mxu1 %v4989_v42  ;;  %3071 = vmatpush.bf16.msrb.mxu2 %v4621_v35  ;;  %v5725_v42 = vld [vmem:[#allocation7 + $0x26c] sm:$0xf]  ;;  %v4909_v52 = vor.u32 %v5813_v23, %v4906_v41  ;;  %v4890_v35 = vld [vmem:[#allocation7 + $0x518] sm:$0xf0]  ;;  %v5304_v23 = vld [vmem:[#allocation8 + $0x50] sm:$0xf]  ;;  %v5377_v41 = vor.u32 %v5933_v22, %v5376_v2 }
 0x179   : > { %3085 = vmatpush.bf16.msrb.mxu3 %v4749_v0  ;;  %v6456_v31 = vpop.f32.mrf.mxu2  ;;  %v4557_v53 = vor.u32 %v5725_v42, %v4554_v43  ;;  %v5753_v0 = vld [vmem:[#allocation7 + $0x34c] sm:$0xf]  ;;  %v5130_v42 = vld [vmem:[#allocation7 + $0x6f8] sm:$0xf0]  ;;  %v5280_v2 = vld [vmem:[#allocation8 + $0x20] sm:$0xf] }
 0x17a   : > { %3037 = vmatmul.bf16.vlgmr.msra.gmra.mxu3 %v6432_v56  ;;  %v6463_v50 = vpop.f32.mrf.mxu3  ;;  %v4669_v11 = vor.u32 %v5753_v0, %v4666_v1  ;;  %v6467_v29 = vpop.f32.mrf.mxu0  ;;  %v5901_v43 = vld [vmem:[#allocation7 + $0x7ec] sm:$0xf]  ;;  %v5114_v0 = vld [vmem:[#allocation7 + $0x6d8] sm:$0xf0] }
 0x17b   : > { %3101 = vmatpush.bf16.msra.mxu0 %v4845_v54  ;;  %v4762_v54 = vld [vmem:[#allocation7 + $0x418] sm:$0xf0]  ;;  %v5897_v1 = vld [vmem:[#allocation7 + $0x7cc] sm:$0xf] }
 0x17c   : > { %3115 = vmatpush.bf16.msra.mxu1 %v4973_v57  ;;  %3072 = vmatpush.bf16.msrb.mxu2 %v4605_v9  ;;  %v5809_v57 = vld [vmem:[#allocation7 + $0x50c] sm:$0xf]  ;;  %v4765_v5 = vor.u32 %v5777_v27, %v4762_v54  ;;  %v1419_v9 = vperm.slane %v6461_v47, 0  ;;  %v5368_v27 = vld [vmem:[#allocation8 + $0xd0] sm:$0xf] }
 0x17d   : > { %3086 = vmatpush.bf16.msrb.mxu3 %v4733_v14  ;;  %v4893_v13 = vor.u32 %v5809_v57, %v4890_v35  ;;  %v5321_v14 = vor.u32 %v5919_v8, %v5320_v40  ;;  %v5242_v40 = vld [vmem:[#allocation7 + $0x7d8] sm:$0xf0] }
 0x17e   : > { %v2719_v19 = vadd.f32 %v2718_v48, %v1419_v9 }
 0x17f   : > { %3102 = vmatpush.bf16.msra.mxu0 %v4829_v6  ;;  %v5384_v6 = vld [vmem:[#allocation8 + $0xf0] sm:$0xf] }
 0x180   : > { %3116 = vmatpush.bf16.msra.mxu1 %v4957_v7  ;;  %3073 = vmatpush.bf16.msrb.mxu2 %v4589_v21  ;;  %v5935_v7 = vld [vmem:[#allocation8 + $0xf4] sm:$0xf0]  ;;  %v5917_v21 = vld [vmem:[#allocation8 + $0x64] sm:$0xf0]  ;;  %v2733_v25 = vadd.f32 %v2732_v4, %v2719_v19  ;;  %v5226_v19 = vld [vmem:[#allocation7 + $0x7b8] sm:$0xf0] }
 0x181   : > { %3087 = vmatpush.bf16.msrb.mxu3 %v4717_v26  ;;  %v2746_v15 = vpop.f32.mrf.mxu2  ;;  %v5385_v62 = vor.u32 %v5935_v7, %v5384_v6  ;;  %v2717_v26 = vadd.f32 %v6450_v12, %v1419_v9  ;;  %v5869_v12 = vld [vmem:[#allocation7 + $0x6ec] sm:$0xf]  ;;  %v5929_v6 = vld [vmem:[#allocation8 + $0xc4] sm:$0xf0]  ;;  %v5297_v7 = vor.u32 %v5913_v63, %v5296_v61 }
 0x182   : > { %v2760_v49 = vpop.f32.mrf.mxu3  ;;  %v2747_v48 = vadd.f32 %v2746_v15, %v2733_v25  ;;  %v5133_v35 = vor.u32 %v5869_v12, %v5130_v42  ;;  %v2774_v15 = vpop.f32.mrf.mxu0  ;;  %v5344_v25 = vld [vmem:[#allocation8 + $0xa0] sm:$0xf] }
 0x183   : > { %3103 = vmatpush.bf16.msra.mxu0 %v4813_v55  ;;  %v4650_v55 = vld [vmem:[#allocation7 + $0x338] sm:$0xf0]  ;;  %v2731_v46 = vadd.f32 %v6454_v24, %v2717_v26  ;;  %v5865_v24 = vld [vmem:[#allocation7 + $0x6cc] sm:$0xf] }
 0x184   : > { %3117 = vmatpush.bf16.msra.mxu1 %v4941_v20  ;;  %3074 = vmatpush.bf16.msrb.mxu2 %v4573_v34  ;;  %v5312_v20 = vld [vmem:[#allocation8 + $0x60] sm:$0xf]  ;;  %v4653_v30 = vor.u32 %v5749_v18, %v4650_v55  ;;  %v5745_v34 = vld [vmem:[#allocation7 + $0x30c] sm:$0xf]  ;;  %v2761_v4 = vadd.f32 %v2760_v49, %v2747_v48  ;;  %v5082_v49 = vld [vmem:[#allocation7 + $0x698] sm:$0xf0] }
 0x185   : > { %3088 = vmatpush.bf16.msrb.mxu3 %v4701_v38  ;;  %v5915_v38 = vld [vmem:[#allocation8 + $0x54] sm:$0xf0]  ;;  %v5893_v18 = vld [vmem:[#allocation7 + $0x7ac] sm:$0xf]  ;;  %v5066_v48 = vld [vmem:[#allocation7 + $0x678] sm:$0xf0] }
 0x186   : > { %v5305_v54 = vor.u32 %v5915_v38, %v5304_v23  ;;  %v5925_v23 = vld [vmem:[#allocation8 + $0xa4] sm:$0xf0] }
 0x187   : > { %3104 = vmatpush.bf16.msra.mxu0 %v4797_v32  ;;  %v5313_v32 = vor.u32 %v5917_v21, %v5312_v20  ;;  %v2775_v20 = vadd.f32 %v2774_v15, %v2761_v4  ;;  %v5927_v21 = vld [vmem:[#allocation8 + $0xb4] sm:$0xf0]  ;;  %v5178_v4 = vld [vmem:[#allocation7 + $0x758] sm:$0xf0] }
 0x188   : > { %3118 = vmatpush.bf16.msra.mxu1 %v4925_v33  ;;  %3075 = vmatpush.bf16.msrb.mxu2 %v4557_v53  ;;  %v4506_v33 = vld [vmem:[#allocation7 + $0x218] sm:$0xf0]  ;;  %v6472_v53 = vpop.f32.mrf.mxu1 }
 0x189   : > { %3089 = vmatpush.bf16.msrb.mxu3 %v4685_v60  ;;  %v6474_v57 = vpop.f32.mrf.mxu2  ;;  %v5261_v60 = vor.u32 %v5901_v43, %v5258_v37  ;;  %v5272_v43 = vld [vmem:[#allocation8 + $0x10] sm:$0xf]  ;;  %v5907_v37 = vld [vmem:[#allocation8 + $0x14] sm:$0xf0] }
 0x18a   : > { %v6478_v16 = vpop.f32.mrf.mxu3 }
 0x18b   : > { %3105 = vmatpush.bf16.msra.mxu0 %v4781_v59  ;;  %v4509_v59 = vor.u32 %v5713_v3, %v4506_v33  ;;  %v5857_v3 = vld [vmem:[#allocation7 + $0x68c] sm:$0xf] }
 0x18c   : > { %3119 = vmatpush.bf16.msra.mxu1 %v4909_v52  ;;  %3076 = vmatpush.bf16.msrb.mxu2 %v4541_v10  ;;  %v5931_v52 = vld [vmem:[#allocation8 + $0xd4] sm:$0xf0]  ;;  %v5288_v10 = vld [vmem:[#allocation8 + $0x30] sm:$0xf]  ;;  %v5889_v33 = vld [vmem:[#allocation7 + $0x78c] sm:$0xf]  ;;  %v5085_v12 = vor.u32 %v5857_v3, %v5082_v49 }
 0x18d   : > { %3090 = vmatpush.bf16.msrb.mxu3 %v4669_v11  ;;  %v5369_v8 = vor.u32 %v5931_v52, %v5368_v27  ;;  %v5911_v11 = vld [vmem:[#allocation8 + $0x34] sm:$0xf0]  ;;  %v5194_v27 = vld [vmem:[#allocation7 + $0x778] sm:$0xf0]  ;;  %v5345_v52 = vor.u32 %v5925_v23, %v5344_v25  ;;  %v5914_v23 = vld [vmem:[#allocation8 + $0x54] sm:$0xf] }
 0x18e   : > { %v5146_v25 = vld [vmem:[#allocation7 + $0x718] sm:$0xf0] }
 0x18f   : > { %3106 = vmatpush.bf16.msra.mxu0 %v4765_v5  ;;  %v5360_v5 = vld [vmem:[#allocation8 + $0xc0] sm:$0xf] }
 0x190   : > { %3120 = vmatpush.bf16.msra.mxu1 %v4893_v13  ;;  %3077 = vmatpush.bf16.msrb.mxu2 %v4525_v28  ;;  %v5245_v13 = vor.u32 %v5897_v1, %v5242_v40  ;;  %v5361_v55 = vor.u32 %v5929_v6, %v5360_v5  ;;  %v5229_v28 = vor.u32 %v5893_v18, %v5226_v19  ;;  %v5849_v1 = vld [vmem:[#allocation7 + $0x64c] sm:$0xf]  ;;  %v5050_v40 = vld [vmem:[#allocation7 + $0x658] sm:$0xf0]  ;;  %v5918_v5 = vld [vmem:[#allocation8 + $0x74] sm:$0xf] }
 0x191   : > { %3091 = vmatpush.bf16.msrb.mxu3 %v4653_v30  ;;  %v2788_v30 = vpop.f32.mrf.mxu1  ;;  %v5845_v19 = vld [vmem:[#allocation7 + $0x62c] sm:$0xf] }
 0x192   : > { %3107 = vmatmul.bf16.vlgmr.msra.gmra.mxu0 %v6404_v39  ;;  %v4637_v39 = vor.u32 %v5745_v34, %v4634_v36  ;;  %v5210_v34 = vld [vmem:[#allocation7 + $0x798] sm:$0xf0]  ;;  %v2789_v36 = vadd.f32 %v2788_v30, %v2775_v20 }
 0x193   : > { %3557 = vmatpush.bf16.msrb.mxu0 %v5321_v14  ;;  %3121 = vmatmul.bf16.vlgmr.msra.gmra.mxu1 %v6406_v44  ;;  %v2745_v44 = vadd.f32 %v6456_v31, %v2731_v46  ;;  %v5117_v31 = vor.u32 %v5865_v24, %v5114_v0  ;;  %v5861_v14 = vld [vmem:[#allocation7 + $0x6ac] sm:$0xf]  ;;  %v5213_v42 = vor.u32 %v5889_v33, %v5210_v34  ;;  %v5905_v0 = vld [vmem:[#allocation8 + $0x4] sm:$0xf0]  ;;  %v5034_v20 = vld [vmem:[#allocation7 + $0x638] sm:$0xf0] }
 0x194   : > { %3571 = vmatpush.bf16.msrb.mxu1 %v5385_v62  ;;  %3078 = vmatpush.bf16.msrb.mxu2 %v4509_v59  ;;  %v5289_v62 = vor.u32 %v5911_v11, %v5288_v10  ;;  %v5101_v26 = vor.u32 %v5861_v14, %v5098_v17  ;;  %v5853_v46 = vld [vmem:[#allocation7 + $0x66c] sm:$0xf]  ;;  %v5934_v10 = vld [vmem:[#allocation8 + $0xf4] sm:$0xf]  ;;  %v5386_v11 = vld [vmem:[#allocation8 + $0xf8] sm:$0xf0]  ;;  %v2828_v14 = vpop.f32.mrf.mxu0  ;;  %v5053_v17 = vor.u32 %v5849_v1, %v5050_v40 }
 0x195   : > { %3092 = vmatpush.bf16.msrb.mxu3 %v4637_v39  ;;  %v2759_v9 = vadd.f32 %v6463_v50, %v2745_v44  ;;  %v5352_v50 = vld [vmem:[#allocation8 + $0xb0] sm:$0xf]  ;;  %v5885_v59 = vld [vmem:[#allocation7 + $0x76c] sm:$0xf]  ;;  %v5923_v44 = vld [vmem:[#allocation8 + $0x94] sm:$0xf0]  ;;  %v5069_v63 = vor.u32 %v5853_v46, %v5066_v48  ;;  %v5037_v30 = vor.u32 %v5845_v19, %v5034_v20 }
 0x196   : > { %v5197_v24 = vor.u32 %v5885_v59, %v5194_v27  ;;  %v5841_v33 = vld [vmem:[#allocation7 + $0x60c] sm:$0xf]  ;;  %v5906_v19 = vld [vmem:[#allocation8 + $0x14] sm:$0xf] }
 0x197   : > { %3558 = vmatpush.bf16.msrb.mxu0 %v5313_v32  ;;  %3079 = vmatmul.bf16.vlgmr.msrb.gmra.mxu2 %v6418_v45  ;;  %v2773_v22 = vadd.f32 %v6467_v29, %v2759_v9  ;;  %v5909_v45 = vld [vmem:[#allocation8 + $0x24] sm:$0xf0]  ;;  %v2802_v32 = vpop.f32.mrf.mxu2  ;;  %v5328_v9 = vld [vmem:[#allocation8 + $0x80] sm:$0xf] }
 0x198   : > { %3572 = vmatpush.bf16.msrb.mxu1 %v5377_v41  ;;  %3127 = vmatpush.bf16.msra.mxu2 %v5133_v35  ;;  %v5281_v38 = vor.u32 %v5909_v45, %v5280_v2  ;;  %v2803_v41 = vadd.f32 %v2802_v32, %v2789_v36  ;;  %v2816_v35 = vpop.f32.mrf.mxu3  ;;  %v5916_v2 = vld [vmem:[#allocation8 + $0x64] sm:$0xf]  ;;  %v5378_v45 = vld [vmem:[#allocation8 + $0xe8] sm:$0xf0] }
 0x199   : > { %3141 = vmatpush.bf16.msra.mxu3 %v5261_v60  ;;  %v2787_v29 = vadd.f32 %v6472_v53, %v2773_v22  ;;  %v5273_v60 = vor.u32 %v5907_v37, %v5272_v43  ;;  %v5264_v53 = vld [vmem:[#allocation8] sm:$0xf]  ;;  %v5314_v22 = vld [vmem:[#allocation8 + $0x68] sm:$0xf0]  ;;  %v2842_v3 = vpop.f32.mrf.mxu1 }
 0x19a   : > { %3093 = vmatmul.bf16.vlgmr.msrb.gmra.mxu3 %v6420_v51  ;;  %v5353_v51 = vor.u32 %v5927_v21, %v5352_v50  ;;  %v2817_v61 = vadd.f32 %v2816_v35, %v2803_v41  ;;  %v5877_v50 = vld [vmem:[#allocation7 + $0x72c] sm:$0xf]  ;;  %v5162_v21 = vld [vmem:[#allocation7 + $0x738] sm:$0xf0]  ;;  %v5317_v34 = vor.u32 %v5916_v2, %v5314_v22  ;;  %v5930_v41 = vld [vmem:[#allocation8 + $0xd4] sm:$0xf] }
 0x19b   : > { %3559 = vmatpush.bf16.msrb.mxu0 %v5305_v54  ;;  %v2801_v39 = vadd.f32 %v6474_v57, %v2787_v29  ;;  %v5336_v54 = vld [vmem:[#allocation8 + $0x90] sm:$0xf]  ;;  %v5165_v32 = vor.u32 %v5877_v50, %v5162_v21  ;;  %v5873_v36 = vld [vmem:[#allocation7 + $0x70c] sm:$0xf]  ;;  %v1420_v29 = vperm.slane %v6461_v47, 1 }
 0x19c   : > { %3573 = vmatpush.bf16.msrb.mxu1 %v5369_v8  ;;  %3128 = vmatpush.bf16.msra.mxu2 %v5117_v31  ;;  %v5881_v8 = vld [vmem:[#allocation7 + $0x74c] sm:$0xf]  ;;  %v5337_v6 = vor.u32 %v5923_v44, %v5336_v54  ;;  %v5921_v31 = vld [vmem:[#allocation8 + $0x84] sm:$0xf0]  ;;  %v3159_v15 = vmax.f32 %v2817_v61, 0.0  ;;  %v5149_v46 = vor.u32 %v5873_v36, %v5146_v25  ;;  %v2830_v27 = vpop.f32.mrf.mxu0 }
 0x19d   : > { %3142 = vmatpush.bf16.msra.mxu3 %v5245_v13  ;;  %v2815_v57 = vadd.f32 %v6478_v16, %v2801_v39  ;;  %v5265_v13 = vor.u32 %v5905_v0, %v5264_v53  ;;  %v5181_v18 = vor.u32 %v5881_v8, %v5178_v4  ;;  %v5329_v16 = vor.u32 %v5921_v31, %v5328_v9  ;;  %v5298_v39 = vld [vmem:[#allocation8 + $0x48] sm:$0xf0]  ;;  %v5928_v35 = vld [vmem:[#allocation8 + $0xc4] sm:$0xf]  ;;  %v5926_v8 = vld [vmem:[#allocation8 + $0xb4] sm:$0xf] }
 0x19e   : > { %v2829_v44 = vadd.f32 %v2828_v14, %v1420_v29  ;;  %v2831_v40 = vadd.f32 %v2830_v27, %v1420_v29  ;;  %v5354_v4 = vld [vmem:[#allocation8 + $0xb8] sm:$0xf0]  ;;  %v5908_v9 = vld [vmem:[#allocation8 + $0x24] sm:$0xf]  ;;  %v5282_v31 = vld [vmem:[#allocation8 + $0x28] sm:$0xf0] }
 0x19f   : > { %3560 = vmatpush.bf16.msrb.mxu0 %v5297_v7  ;;  %v5322_v7 = vld [vmem:[#allocation8 + $0x78] sm:$0xf0]  ;;  %v2856_v43 = vpop.f32.mrf.mxu2  ;;  %v5924_v14 = vld [vmem:[#allocation8 + $0xa4] sm:$0xf]  ;;  %v5922_v50 = vld [vmem:[#allocation8 + $0x94] sm:$0xf] }
 0x1a0   : > { %3574 = vmatpush.bf16.msrb.mxu1 %v5361_v55  ;;  %3129 = vmatpush.bf16.msra.mxu2 %v5101_v26  ;;  %v5325_v55 = vor.u32 %v5918_v5, %v5322_v7  ;;  %v5389_v26 = vor.u32 %v5934_v10, %v5386_v11  ;;  %v2870_v48 = vpop.f32.mrf.mxu3  ;;  %v2843_v1 = vadd.f32 %v2842_v3, %v2829_v44  ;;  %v5338_v21 = vld [vmem:[#allocation8 + $0x98] sm:$0xf0]  ;;  %v5920_v3 = vld [vmem:[#allocation8 + $0x84] sm:$0xf]  ;;  %v5949_v29 = vld [vmem:[#allocation8 + $0x164] sm:$0xf0] }
 0x1a1   : > { %3143 = vmatpush.bf16.msra.mxu3 %v5229_v28  ;;  %v5932_v28 = vld [vmem:[#allocation8 + $0xe4] sm:$0xf]  ;;  %v2844_v61 = vpop.f32.mrf.mxu1 }
 0x1a2   : > { %v2857_v5 = vadd.f32 %v2856_v43, %v2843_v1  ;;  %v2845_v10 = vadd.f32 %v2844_v61, %v2831_v40  ;;  %v5424_v61 = vld [vmem:[#allocation8 + $0x140] sm:$0xf]  ;;  %v5416_v1 = vld [vmem:[#allocation8 + $0x130] sm:$0xf]  ;;  %v5943_v40 = vld [vmem:[#allocation8 + $0x134] sm:$0xf0] }
 0x1a3   : > { %3561 = vmatpush.bf16.msrb.mxu0 %v5289_v62  ;;  %v3155_v62 = vmax.f32 %v2815_v57, 0.0 }
 0x1a4   : > { %3575 = vmatpush.bf16.msrb.mxu1 %v5353_v51  ;;  %3130 = vmatpush.bf16.msra.mxu2 %v5085_v12  ;;  %v5018_v51 = vld [vmem:[#allocation7 + $0x618] sm:$0xf0]  ;;  %v5381_v12 = vor.u32 %v5932_v28, %v5378_v45  ;;  %v2884_v57 = vpop.f32.mrf.mxu0  ;;  %v5266_v28 = vld [vmem:[#allocation8 + $0x8] sm:$0xf0]  ;;  %v5341_v45 = vor.u32 %v5922_v50, %v5338_v21  ;;  %v1421_v50 = vperm.slane %v6461_v47, 2 }
 0x1a5   : > { %3144 = vmatpush.bf16.msra.mxu3 %v5213_v42  ;;  %v6486_v49 = vpack.c.bf16 %v3159_v15, %v3155_v62  ;;  %v5370_v42 = vld [vmem:[#allocation8 + $0xd8] sm:$0xf0]  ;;  %v5021_v37 = vor.u32 %v5841_v33, %v5018_v51  ;;  %v5346_v15 = vld [vmem:[#allocation8 + $0xa8] sm:$0xf0]  ;;  %v5448_v33 = vld [vmem:[#allocation8 + $0x170] sm:$0xf] }
 0x1a6   : > { %v5373_v54 = vor.u32 %v5930_v41, %v5370_v42  ;;  %v5349_v20 = vor.u32 %v5924_v14, %v5346_v15  ;;  %v5948_v15 = vld [vmem:[#allocation8 + $0x164] sm:$0xf] }
 0x1a7   : > { %3562 = vmatpush.bf16.msrb.mxu0 %v5281_v38  ;;  %v5306_v38 = vld [vmem:[#allocation8 + $0x58] sm:$0xf0]  ;;  %v2858_v7 = vpop.f32.mrf.mxu2 }
 0x1a8   : > { %3576 = vmatpush.bf16.msrb.mxu1 %v5345_v52  ;;  %3131 = vmatpush.bf16.msra.mxu2 %v5069_v63  ;;  %v5309_v59 = vor.u32 %v5914_v23, %v5306_v38  ;;  %v5912_v52 = vld [vmem:[#allocation8 + $0x44] sm:$0xf]  ;;  %v5910_v63 = vld [vmem:[#allocation8 + $0x34] sm:$0xf]  ;;  %v2872_v11 = vpop.f32.mrf.mxu3 }
 0x1a9   : > { %3145 = vmatpush.bf16.msra.mxu3 %v5197_v24  ;;  %v5301_v53 = vor.u32 %v5912_v52, %v5298_v39  ;;  %v5290_v24 = vld [vmem:[#allocation8 + $0x38] sm:$0xf0]  ;;  %v5432_v52 = vld [vmem:[#allocation8 + $0x150] sm:$0xf]  ;;  %v5947_v39 = vld [vmem:[#allocation8 + $0x154] sm:$0xf0] }
 0x1aa   : > { %v5433_v44 = vor.u32 %v5947_v39, %v5432_v52  ;;  %v5394_v52 = vld [vmem:[#allocation8 + $0x108] sm:$0xf0] }
 0x1ab   : > { %3563 = vmatpush.bf16.msrb.mxu0 %v5273_v60  ;;  %v5362_v60 = vld [vmem:[#allocation8 + $0xc8] sm:$0xf0] }
 0x1ac   : > { %3577 = vmatpush.bf16.msrb.mxu1 %v5337_v6  ;;  %3132 = vmatpush.bf16.msra.mxu2 %v5053_v17  ;;  %v5365_v0 = vor.u32 %v5928_v35, %v5362_v60  ;;  %v5293_v6 = vor.u32 %v5910_v63, %v5290_v24  ;;  %v2871_v17 = vadd.f32 %v2870_v48, %v2857_v5  ;;  %v2886_v51 = vpop.f32.mrf.mxu0  ;;  %v5945_v63 = vld [vmem:[#allocation8 + $0x144] sm:$0xf0] }
 0x1ad   : > { %3146 = vmatpush.bf16.msra.mxu3 %v5181_v18  ;;  %v2859_v18 = vadd.f32 %v2858_v7, %v2845_v10  ;;  %v5425_v24 = vor.u32 %v5945_v63, %v5424_v61  ;;  %v5941_v5 = vld [vmem:[#allocation8 + $0x124] sm:$0xf0]  ;;  %v5950_v10 = vld [vmem:[#allocation8 + $0x174] sm:$0xf] }
 0x1af   : > { %3564 = vmatpush.bf16.msrb.mxu0 %v5265_v13  ;;  %v5357_v13 = vor.u32 %v5926_v8, %v5354_v4  ;;  %v2873_v62 = vadd.f32 %v2872_v11, %v2859_v18  ;;  %v5417_v8 = vor.u32 %v5943_v40, %v5416_v1  ;;  %v5408_v4 = vld [vmem:[#allocation8 + $0x120] sm:$0xf]  ;;  %v5450_v11 = vld [vmem:[#allocation8 + $0x178] sm:$0xf0] }
 0x1b0   : > { %3578 = vmatpush.bf16.msrb.mxu1 %v5329_v16  ;;  %3133 = vmatpush.bf16.msra.mxu2 %v5037_v30  ;;  %v2885_v16 = vadd.f32 %v2884_v57, %v2871_v17  ;;  %v5939_v57 = vld [vmem:[#allocation8 + $0x114] sm:$0xf0]  ;;  %v5453_v14 = vor.u32 %v5950_v10, %v5450_v11  ;;  %v5442_v17 = vld [vmem:[#allocation8 + $0x168] sm:$0xf0]  ;;  %v5504_v40 = vld [vmem:[#allocation8 + $0x1e0] sm:$0xf] }
 0x1b1   : > { %3147 = vmatpush.bf16.msra.mxu3 %v5165_v32  ;;  %v5330_v32 = vld [vmem:[#allocation8 + $0x88] sm:$0xf0]  ;;  %v2887_v25 = vadd.f32 %v2886_v51, %v2873_v62  ;;  %v5940_v51 = vld [vmem:[#allocation8 + $0x124] sm:$0xf] }
 0x1b2   : > { %3565 = vmatmul.bf16.vlgmr.msrb.gmra.mxu0 %v6486_v49  ;;  %v5333_v41 = vor.u32 %v5920_v3, %v5330_v32  ;;  %v5426_v62 = vld [vmem:[#allocation8 + $0x148] sm:$0xf0]  ;;  %v5418_v3 = vld [vmem:[#allocation8 + $0x138] sm:$0xf0] }
 0x1b3   : > { %3613 = vmatpush.bf16.msra.mxu0 %v5325_v55  ;;  %v5274_v55 = vld [vmem:[#allocation8 + $0x18] sm:$0xf0] }
 0x1b4   : > { %3627 = vmatpush.bf16.msra.mxu1 %v5389_v26  ;;  %3134 = vmatpush.bf16.msra.mxu2 %v5021_v37  ;;  %v5277_v2 = vor.u32 %v5906_v19, %v5274_v55  ;;  %v5904_v26 = vld [vmem:[#allocation8 + $0x4] sm:$0xf]  ;;  %v2940_v18 = vpop.f32.mrf.mxu0  ;;  %v5946_v19 = vld [vmem:[#allocation8 + $0x154] sm:$0xf]  ;;  %v5434_v55 = vld [vmem:[#allocation8 + $0x158] sm:$0xf0] }
 0x1b5   : > { %3148 = vmatpush.bf16.msra.mxu3 %v5149_v46  ;;  %v5269_v38 = vor.u32 %v5904_v26, %v5266_v28  ;;  %v2941_v28 = vadd.f32 %v2940_v18, %v1421_v50 }
 0x1b7   : > { %3614 = vmatpush.bf16.msra.mxu0 %v5317_v34  ;;  %3135 = vmatmul.bf16.vlgmr.msra.gmra.mxu2 %v6430_v58  ;;  %v5285_v58 = vor.u32 %v5908_v9, %v5282_v31  ;;  %v5951_v34 = vld [vmem:[#allocation8 + $0x174] sm:$0xf0]  ;;  %v5392_v9 = vld [vmem:[#allocation8 + $0x100] sm:$0xf]  ;;  %v5937_v31 = vld [vmem:[#allocation8 + $0x104] sm:$0xf0] }
 0x1b8   : > { %3628 = vmatpush.bf16.msra.mxu1 %v5381_v12  ;;  %3149 = vmatmul.bf16.vlgmr.msra.gmra.mxu3 %v6432_v56  ;;  %v2898_v56 = vpop.f32.mrf.mxu1  ;;  %v5449_v36 = vor.u32 %v5951_v34, %v5448_v33  ;;  %v5440_v12 = vld [vmem:[#allocation8 + $0x160] sm:$0xf] }
 0x1b9   : > { %v2899_v23 = vadd.f32 %v2898_v56, %v2885_v16  ;;  %v5441_v42 = vor.u32 %v5949_v29, %v5440_v12  ;;  %v5944_v16 = vld [vmem:[#allocation8 + $0x144] sm:$0xf]  ;;  %v5938_v29 = vld [vmem:[#allocation8 + $0x114] sm:$0xf] }
 0x1ba   : > { %v2912_v22 = vpop.f32.mrf.mxu2  ;;  %3585 = vmatpush.bf16.msrb.mxu2 %v5449_v36  ;;  %v5410_v36 = vld [vmem:[#allocation8 + $0x128] sm:$0xf0] }
 0x1bb   : > { %3615 = vmatpush.bf16.msra.mxu0 %v5309_v59  ;;  %v2913_v43 = vadd.f32 %v2912_v22, %v2899_v23  ;;  %v5429_v22 = vor.u32 %v5944_v16, %v5426_v62  ;;  %v5413_v23 = vor.u32 %v5940_v51, %v5410_v36  ;;  %v5957_v16 = vld [vmem:[#allocation8 + $0x1a4] sm:$0xf0]  ;;  %v5506_v51 = vld [vmem:[#allocation8 + $0x1e8] sm:$0xf0] }
 0x1bc   : > { %3629 = vmatpush.bf16.msra.mxu1 %v5373_v54  ;;  %v2942_v26 = vpop.f32.mrf.mxu0 }
 0x1bd   : > { %v2926_v30 = vpop.f32.mrf.mxu3  ;;  %v2943_v34 = vadd.f32 %v2942_v26, %v1421_v50 }
 0x1be   : > { %3586 = vmatpush.bf16.msrb.mxu2 %v5441_v42  ;;  %v2927_v59 = vadd.f32 %v2926_v30, %v2913_v43 }
 0x1bf   : > { %3616 = vmatpush.bf16.msra.mxu0 %v5301_v53 }
 0x1c0   : > { %3630 = vmatpush.bf16.msra.mxu1 %v5365_v0  ;;  %v2900_v37 = vpop.f32.mrf.mxu1  ;;  %v3156_v60 = vmax.f32 %v2927_v59, 0.0 }
 0x1c1   : > { %v2901_v46 = vadd.f32 %v2900_v37, %v2887_v25 }
 0x1c2   : > { %v2914_v48 = vpop.f32.mrf.mxu2  ;;  %3587 = vmatpush.bf16.msrb.mxu2 %v5433_v44 }
 0x1c3   : > { %3617 = vmatpush.bf16.msra.mxu0 %v5293_v6  ;;  %v2915_v27 = vadd.f32 %v2914_v48, %v2901_v46  ;;  %v5409_v6 = vor.u32 %v5941_v5, %v5408_v4 }
 0x1c4   : > { %3631 = vmatpush.bf16.msra.mxu1 %v5357_v13  ;;  %v5393_v13 = vor.u32 %v5937_v31, %v5392_v9 }
 0x1c5   : > { %v2928_v54 = vpop.f32.mrf.mxu3 }
 0x1c6   : > { %v2929_v35 = vadd.f32 %v2928_v54, %v2915_v27  ;;  %3588 = vmatpush.bf16.msrb.mxu2 %v5425_v24  ;;  %v5936_v27 = vld [vmem:[#allocation8 + $0x104] sm:$0xf] }
 0x1c7   : > { %3618 = vmatpush.bf16.msra.mxu0 %v5285_v58  ;;  %v5445_v58 = vor.u32 %v5948_v15, %v5442_v17  ;;  %v5397_v44 = vor.u32 %v5936_v27, %v5394_v52  ;;  %v5488_v15 = vld [vmem:[#allocation8 + $0x1c0] sm:$0xf]  ;;  %v5961_v17 = vld [vmem:[#allocation8 + $0x1c4] sm:$0xf0]  ;;  %v5958_v27 = vld [vmem:[#allocation8 + $0x1b4] sm:$0xf] }
 0x1c8   : > { %3632 = vmatpush.bf16.msra.mxu1 %v5349_v20  ;;  %v3160_v53 = vmax.f32 %v2929_v35, 0.0  ;;  %v2954_v56 = vpop.f32.mrf.mxu1  ;;  %v5437_v20 = vor.u32 %v5946_v19, %v5434_v55  ;;  %v5512_v35 = vld [vmem:[#allocation8 + $0x1f0] sm:$0xf]  ;;  %v5489_v18 = vor.u32 %v5961_v17, %v5488_v15  ;;  %v5959_v55 = vld [vmem:[#allocation8 + $0x1b4] sm:$0xf0] }
 0x1c9   : > { %v2955_v33 = vadd.f32 %v2954_v56, %v2941_v28  ;;  %v5480_v19 = vld [vmem:[#allocation8 + $0x1b0] sm:$0xf]  ;;  %v5456_v28 = vld [vmem:[#allocation8 + $0x180] sm:$0xf]  ;;  %v5482_v52 = vld [vmem:[#allocation8 + $0x1b8] sm:$0xf0] }
 0x1ca   : > { %v3164_v0 = vpack.c.bf16 %v3160_v53, %v3156_v60  ;;  %3589 = vmatpush.bf16.msrb.mxu2 %v5417_v8  ;;  %v5967_v60 = vld [vmem:[#allocation8 + $0x1f4] sm:$0xf0]  ;;  %v5965_v8 = vld [vmem:[#allocation8 + $0x1e4] sm:$0xf0]  ;;  %v5481_v50 = vor.u32 %v5959_v55, %v5480_v19 }
 0x1cb   : > { %3619 = vmatpush.bf16.msra.mxu0 %v5277_v2  ;;  %v5513_v61 = vor.u32 %v5967_v60, %v5512_v35  ;;  %v5505_v4 = vor.u32 %v5965_v8, %v5504_v40  ;;  %v5956_v35 = vld [vmem:[#allocation8 + $0x1a4] sm:$0xf]  ;;  %v5474_v60 = vld [vmem:[#allocation8 + $0x1a8] sm:$0xf0]  ;;  %v5954_v40 = vld [vmem:[#allocation8 + $0x194] sm:$0xf] }
 0x1cc   : > { %3633 = vmatpush.bf16.msra.mxu1 %v5341_v45  ;;  %v5942_v45 = vld [vmem:[#allocation8 + $0x134] sm:$0xf]  ;;  %v5466_v8 = vld [vmem:[#allocation8 + $0x198] sm:$0xf0] }
 0x1cd   : > { %3579 = vmatmul.bf16.vlgmr.msrb.gmra.mxu1 %v3164_v0  ;;  %v5421_v30 = vor.u32 %v5942_v45, %v5418_v3  ;;  %3599 = vmatpush.bf16.msrb.mxu3 %v5513_v61  ;;  %v5953_v45 = vld [vmem:[#allocation8 + $0x184] sm:$0xf0] }
 0x1ce   : > { %3590 = vmatpush.bf16.msrb.mxu2 %v5409_v6  ;;  %v5457_v3 = vor.u32 %v5953_v45, %v5456_v28  ;;  %v5974_v28 = vld [vmem:[%s6562_s9 + $0x30] sm:$0xff]  ;;  %v5973_v45 = vld [vmem:[%s6562_s9 + $0x28] sm:$0xff] }
 0x1cf   : > { %3620 = vmatpush.bf16.msra.mxu0 %v5269_v38  ;;  %v2996_v38 = vpop.f32.mrf.mxu0 }
 0x1d0   : > { %3634 = vmatpush.bf16.msra.mxu1 %v5333_v41  ;;  %v2956_v32 = vpop.f32.mrf.mxu1  ;;  %v5402_v41 = vld [vmem:[#allocation8 + $0x118] sm:$0xf0] }
 0x1d1   : > { %v2957_v42 = vadd.f32 %v2956_v32, %v2943_v34  ;;  %v5405_v37 = vor.u32 %v5938_v29, %v5402_v41  ;;  %3600 = vmatpush.bf16.msrb.mxu3 %v5505_v4  ;;  %v5514_v32 = vld [vmem:[#allocation8 + $0x1f8] sm:$0xf0]  ;;  %v5964_v34 = vld [vmem:[#allocation8 + $0x1e4] sm:$0xf] }
 0x1d2   : > { %3621 = vmatmul.bf16.vlgmr.msra.gmra.mxu0 %v6486_v49  ;;  %v5400_v49 = vld [vmem:[#allocation8 + $0x110] sm:$0xf]  ;;  %v5960_v41 = vld [vmem:[#allocation8 + $0x1c4] sm:$0xf] }
 0x1d3   : > { %v5401_v7 = vor.u32 %v5939_v57, %v5400_v49  ;;  %v5496_v57 = vld [vmem:[#allocation8 + $0x1d0] sm:$0xf]  ;;  %v5952_v4 = vld [vmem:[#allocation8 + $0x184] sm:$0xf] }
 0x1d5   : > { %3591 = vmatpush.bf16.msrb.mxu2 %v5401_v7  ;;  %v5963_v7 = vld [vmem:[#allocation8 + $0x1d4] sm:$0xf0] }
 0x1d6   : > { %v5497_v31 = vor.u32 %v5963_v7, %v5496_v57 }
 0x1d7   : > { %v2998_v24 = vpop.f32.mrf.mxu0 }
 0x1d8   : > { %v3010_v59 = vpop.f32.mrf.mxu1  ;;  %3601 = vmatpush.bf16.msrb.mxu3 %v5497_v31 }
 0x1d9   : > { %3592 = vmatpush.bf16.msrb.mxu2 %v5393_v13 }
 0x1da   : > { %v2968_v21 = vpop.f32.mrf.mxu2 }
 0x1db   : > { %v2969_v25 = vadd.f32 %v2968_v21, %v2955_v33  ;;  %v5472_v21 = vld [vmem:[#allocation8 + $0x1a0] sm:$0xf] }
 0x1dc   : > { %3602 = vmatpush.bf16.msrb.mxu3 %v5489_v18  ;;  %v5473_v62 = vor.u32 %v5957_v16, %v5472_v21 }
 0x1dd   : > { %3635 = vmatmul.bf16.vlgmr.msra.gmra.mxu1 %v3164_v0  ;;  %3641 = vmatpush.bf16.msra.mxu2 %v5453_v14  ;;  %v2982_v2 = vpop.f32.mrf.mxu3 }
 0x1de   : > { %v2983_v46 = vadd.f32 %v2982_v2, %v2969_v25  ;;  %v5464_v2 = vld [vmem:[#allocation8 + $0x190] sm:$0xf]  ;;  %v5509_v25 = vor.u32 %v5964_v34, %v5506_v51  ;;  %v5969_v51 = vld [vmem:[%s6562_s9 + $0x8] sm:$0xff] }
 0x1df   : > { %v5982_v34 = vld [vmem:[%s6562_s9 + $0x70] sm:$0xff] }
 0x1e0   : > { %v2997_v39 = vadd.f32 %v2996_v38, %v2983_v46  ;;  %v3012_v6 = vpop.f32.mrf.mxu1  ;;  %3603 = vmatpush.bf16.msrb.mxu3 %v5481_v50  ;;  %v5498_v38 = vld [vmem:[#allocation8 + $0x1d8] sm:$0xf0] }
 0x1e1   : > { %3642 = vmatpush.bf16.msra.mxu2 %v5445_v58 }
 0x1e2   : > { %v2970_v12 = vpop.f32.mrf.mxu2  ;;  %v3011_v1 = vadd.f32 %v3010_v59, %v2997_v39 }
 0x1e3   : > { %v2971_v48 = vadd.f32 %v2970_v12, %v2957_v42  ;;  %v5490_v42 = vld [vmem:[#allocation8 + $0x1c8] sm:$0xf0] }
 0x1e4   : > { %3604 = vmatpush.bf16.msrb.mxu3 %v5473_v62 }
 0x1e5   : > { %3643 = vmatpush.bf16.msra.mxu2 %v5437_v20  ;;  %v2984_v43 = vpop.f32.mrf.mxu3 }
 0x1e6   : > { %v2985_v54 = vadd.f32 %v2984_v43, %v2971_v48  ;;  %v1422_v43 = vperm.slane %v6461_v47, 3 }
 0x1e8   : > { %v2999_v0 = vadd.f32 %v2998_v24, %v2985_v54  ;;  %v5485_v54 = vor.u32 %v5958_v27, %v5482_v52 }
 0x1e9   : > { %3644 = vmatpush.bf16.msra.mxu2 %v5429_v22  ;;  %v5955_v22 = vld [vmem:[#allocation8 + $0x194] sm:$0xf0] }
 0x1ea   : > { %v3013_v49 = vadd.f32 %v3012_v6, %v2999_v0  ;;  %v5465_v26 = vor.u32 %v5955_v22, %v5464_v2  ;;  %v5469_v6 = vor.u32 %v5954_v40, %v5466_v8 }
 0x1ec   : > { %3605 = vmatpush.bf16.msrb.mxu3 %v5465_v26  ;;  %v5975_v26 = vld [vmem:[%s6562_s9 + $0x38] sm:$0xff] }
 0x1ed   : > { %3645 = vmatpush.bf16.msra.mxu2 %v5421_v30  ;;  %v5966_v30 = vld [vmem:[#allocation8 + $0x1f4] sm:$0xf]  ;;  %3807 = vmatpush.bf16.msrb.mxu0 %v5975_v26 }
 0x1ee   : > { %v5517_v33 = vor.u32 %v5966_v30, %v5514_v32  ;;  %v5971_v30 = vld [vmem:[%s6562_s9 + $0x18] sm:$0xff] }
 0x1ef   : > { %v3052_v36 = vpop.f32.mrf.mxu0  ;;  %v5983_v32 = vld [vmem:[%s6562_s9 + $0x78] sm:$0xff] }
 0x1f0   : > { %3606 = vmatpush.bf16.msrb.mxu3 %v5457_v3  ;;  %v3066_v29 = vpop.f32.mrf.mxu1  ;;  %v3053_v39 = vadd.f32 %v3052_v36, %v1422_v43  ;;  %v5972_v3 = vld [vmem:[%s6562_s9 + $0x20] sm:$0xff]  ;;  %3821 = vmatpush.bf16.msrb.mxu1 %v5983_v32  ;;  %v5981_v36 = vld [vmem:[%s6562_s9 + $0x68] sm:$0xff] }
 0x1f1   : > { %3646 = vmatpush.bf16.msra.mxu2 %v5413_v23  ;;  %v5962_v23 = vld [vmem:[#allocation8 + $0x1d4] sm:$0xf]  ;;  %3808 = vmatpush.bf16.msrb.mxu0 %v5974_v28 }
 0x1f2   : > { %v5501_v12 = vor.u32 %v5962_v23, %v5498_v38  ;;  %v5980_v23 = vld [vmem:[%s6562_s9 + $0x60] sm:$0xff]  ;;  %v5979_v38 = vld [vmem:[%s6562_s9 + $0x58] sm:$0xff] }
 0x1f4   : > { %3655 = vmatpush.bf16.msra.mxu3 %v5517_v33  ;;  %v5970_v33 = vld [vmem:[%s6562_s9 + $0x10] sm:$0xff]  ;;  %3822 = vmatpush.bf16.msrb.mxu1 %v5982_v34 }
 0x1f5   : > { %3647 = vmatpush.bf16.msra.mxu2 %v5405_v37  ;;  %v5493_v37 = vor.u32 %v5960_v41, %v5490_v42  ;;  %3809 = vmatpush.bf16.msrb.mxu0 %v5973_v45 }
 0x1f7   : > { %v3054_v59 = vpop.f32.mrf.mxu0 }
 0x1f8   : > { %3656 = vmatpush.bf16.msra.mxu3 %v5509_v25  ;;  %v3055_v61 = vadd.f32 %v3054_v59, %v1422_v43  ;;  %3823 = vmatpush.bf16.msrb.mxu1 %v5981_v36  ;;  %v5968_v25 = vld [vmem:[%s6562_s9] sm:$0xff]  ;;  %v5977_v43 = vld [vmem:[%s6562_s9 + $0x48] sm:$0xff] }
 0x1f9   : > { %3648 = vmatpush.bf16.msra.mxu2 %v5397_v44  ;;  %v3068_v44 = vpop.f32.mrf.mxu1  ;;  %3810 = vmatpush.bf16.msrb.mxu0 %v5972_v3 }
 0x1fa   : > { %v3024_v53 = vpop.f32.mrf.mxu2 }
 0x1fb   : > { %v3025_v5 = vadd.f32 %v3024_v53, %v3011_v1  ;;  %v3067_v53 = vadd.f32 %v3066_v29, %v3053_v39 }
 0x1fc   : > { %3657 = vmatpush.bf16.msra.mxu3 %v5501_v12  ;;  %3824 = vmatpush.bf16.msrb.mxu1 %v5980_v23  ;;  %v5978_v12 = vld [vmem:[%s6562_s9 + $0x50] sm:$0xff] }
 0x1fd   : > { %v3038_v63 = vpop.f32.mrf.mxu3  ;;  %3811 = vmatpush.bf16.msrb.mxu0 %v5971_v30 }
 0x1fe   : > { %v3039_v13 = vadd.f32 %v3038_v63, %v3025_v5  ;;  %v5477_v63 = vor.u32 %v5956_v35, %v5474_v60  ;;  %v3069_v5 = vadd.f32 %v3068_v44, %v3055_v61 }
 0x200   : > { %v3157_v58 = vmax.f32 %v3039_v13, 0.0  ;;  %3658 = vmatpush.bf16.msra.mxu3 %v5493_v37  ;;  %3825 = vmatpush.bf16.msrb.mxu1 %v5979_v38  ;;  %v3231_v37 = vld [vmem:[%s6561_s8] sm:$0x3] }
 0x201   : > { %3812 = vmatpush.bf16.msrb.mxu0 %v5970_v33 }
 0x202   : > { %v3026_v9 = vpop.f32.mrf.mxu2 }
 0x203   : > { %v3027_v10 = vadd.f32 %v3026_v9, %v3013_v49  ;;  %v5458_v49 = vld [vmem:[#allocation8 + $0x188] sm:$0xf0] }
 0x204   : > { %3659 = vmatpush.bf16.msra.mxu3 %v5485_v54  ;;  %v5461_v9 = vor.u32 %v5952_v4, %v5458_v49  ;;  %3826 = vmatpush.bf16.msrb.mxu1 %v5978_v12 }
 0x205   : > { %v3040_v11 = vpop.f32.mrf.mxu3  ;;  %3813 = vmatpush.bf16.msrb.mxu0 %v5969_v51 }
 0x206   : > { %v3041_v14 = vadd.f32 %v3040_v11, %v3027_v10 }
 0x208   : > { %v3161_v56 = vmax.f32 %v3041_v14, 0.0  ;;  %3660 = vmatpush.bf16.msra.mxu3 %v5477_v63  ;;  %3827 = vmatpush.bf16.msrb.mxu1 %v5977_v43 }
 0x209   : > { %3814 = vmatpush.bf16.msrb.mxu0 %v5968_v25 }
 0x20a   : > { %v3165_v20 = vpack.c.bf16 %v3161_v56, %v3157_v58 }
 0x20c   : > { %3593 = vmatmul.bf16.vlgmr.msrb.gmra.mxu2 %v3165_v20  ;;  %3661 = vmatpush.bf16.msra.mxu3 %v5469_v6 }
 0x20f   : > { %v3108_v24 = vpop.f32.mrf.mxu0 }
 0x210   : > { %v3122_v31 = vpop.f32.mrf.mxu1  ;;  %3662 = vmatpush.bf16.msra.mxu3 %v5461_v9 }
 0x217   : > { %v3110_v15 = vpop.f32.mrf.mxu0 }
 0x218   : > { %v3124_v56 = vpop.f32.mrf.mxu1 }
 0x21a   : > { %v3080_v46 = vpop.f32.mrf.mxu2 }
 0x21b   : > { %v3081_v0 = vadd.f32 %v3080_v46, %v3067_v53  ;;  %v5976_v46 = vld [vmem:[%s6562_s9 + $0x40] sm:$0xff] }
 0x21c   : > { %3649 = vmatmul.bf16.vlgmr.msra.gmra.mxu2 %v3165_v20  ;;  %3828 = vmatpush.bf16.msrb.mxu1 %v5976_v46 }
 0x21d   : > { %v3094_v48 = vpop.f32.mrf.mxu3 }
 0x21e   : > { %v3095_v57 = vadd.f32 %v3094_v48, %v3081_v0  ;;  %v3233_v48 = vperm.slane %v3231_v37, 0 }
 0x220   : > { %v3109_v13 = vadd.f32 %v3108_v24, %v3095_v57 }
 0x222   : > { %v3082_v47 = vpop.f32.mrf.mxu2  ;;  %v3123_v18 = vadd.f32 %v3122_v31, %v3109_v13 }
 0x223   : > { %v3083_v7 = vadd.f32 %v3082_v47, %v3069_v5  ;;  %v3234_v5 = vperm.slane %v3231_v37, 1 }
 0x225   : > { %v3096_v1 = vpop.f32.mrf.mxu3 }
 0x226   : > { %v3097_v10 = vadd.f32 %v3096_v1, %v3083_v7 }
 0x228   : > { %v3111_v17 = vadd.f32 %v3110_v15, %v3097_v10 }
 0x22a   : > { %v3125_v19 = vadd.f32 %v3124_v56, %v3111_v17 }
 0x22f   : > { %v3566_v29 = vpop.f32.mrf.mxu0 }
 0x230   : > { %v3567_v54 = vadd.f32 %v3566_v29, %v3233_v48 }
 0x237   : > { %v3568_v59 = vpop.f32.mrf.mxu0 }
 0x238   : > { %v3569_v44 = vadd.f32 %v3568_v59, %v3233_v48 }
 0x23a   : > { %v3136_v11 = vpop.f32.mrf.mxu2 }
 0x23b   : > { %v3150_v14 = vpop.f32.mrf.mxu3  ;;  %v3137_v58 = vadd.f32 %v3136_v11, %v3123_v18 }
 0x23d   : > { %v3151_v20 = vadd.f32 %v3150_v14, %v3137_v58 }
 0x23f   : > { %v3158_v62 = vmax.f32 %v3151_v20, 0.0 }
 0x242   : > { %v3138_v55 = vpop.f32.mrf.mxu2 }
 0x243   : > { %v3139_v50 = vadd.f32 %v3138_v55, %v3125_v19  ;;  %v3152_v21 = vpop.f32.mrf.mxu3 }
 0x245   : > { %v3153_v16 = vadd.f32 %v3152_v21, %v3139_v50  ;;  %v6039_v50 = vld [vmem:[#allocation2] ss:$0 sm:$0xff] }
 0x247   : > { %v3162_v2 = vmax.f32 %v3153_v16, 0.0 }
 0x249   : > { %v3166_v22 = vpack.c.bf16 %v3162_v2, %v3158_v62 }
 0x24a   : > { %v3580_v41 = vpop.f32.mrf.mxu1 }
 0x24b   : > { %3607 = vmatmul.bf16.vlgmr.msrb.gmra.mxu3 %v3166_v22  ;;  %v3581_v35 = vadd.f32 %v3580_v41, %v3567_v54 }
 0x24f   : > { %v3622_v61 = vpop.f32.mrf.mxu0 }
 0x250   : > { %v3623_v7 = vadd.f32 %v3622_v61, %v3234_v5 }
 0x252   : > { %v3582_v27 = vpop.f32.mrf.mxu1 }
 0x253   : > { %v3583_v60 = vadd.f32 %v3582_v27, %v3569_v44 }
 0x257   : > { %v3624_v49 = vpop.f32.mrf.mxu0 }
 0x258   : > { %v3625_v31 = vadd.f32 %v3624_v49, %v3234_v5 }
 0x25a   : > { %v3636_v0 = vpop.f32.mrf.mxu1 }
 0x25b   : > { %3663 = vmatmul.bf16.vlgmr.msra.gmra.mxu3 %v3166_v22  ;;  %v3637_v13 = vadd.f32 %v3636_v0, %v3623_v7 }
 0x262   : > { %v3638_v9 = vpop.f32.mrf.mxu1 }
 0x263   : > { %v3639_v11 = vadd.f32 %v3638_v9, %v3625_v31 }
 0x28f   : > { %v3594_v42 = vpop.f32.mrf.mxu2 }
 0x290   : > { %v3595_v53 = vadd.f32 %v3594_v42, %v3581_v35 }
 0x297   : > { %v3596_v52 = vpop.f32.mrf.mxu2 }
 0x298   : > { %v3597_v63 = vadd.f32 %v3596_v52, %v3583_v60 }
 0x29f   : > { %v3650_v40 = vpop.f32.mrf.mxu2 }
 0x2a0   : > { %v3651_v14 = vadd.f32 %v3650_v40, %v3637_v13 }
 0x2a7   : > { %v3652_v10 = vpop.f32.mrf.mxu2 }
 0x2a8   : > { %v3653_v15 = vadd.f32 %v3652_v10, %v3639_v11 }
 0x2ce   : > { %v3608_v39 = vpop.f32.mrf.mxu3 }
 0x2cf   : > { %v3609_v24 = vadd.f32 %v3608_v39, %v3595_v53 }
 0x2d1   : > { %v3669_v8 = vmax.f32 %v3609_v24, 0.0 }
 0x2d6   : > { %v3610_v47 = vpop.f32.mrf.mxu3 }
 0x2d7   : > { %v3611_v1 = vadd.f32 %v3610_v47, %v3597_v63 }
 0x2d9   : > { %v3671_v4 = vmax.f32 %v3611_v1, 0.0 }
 0x2db   : > { %v3673_v6 = vpack.c.bf16 %v3671_v4, %v3669_v8 }
 0x2dd   : > { %3815 = vmatmul.bf16.vlgmr.msrb.gmra.mxu0 %v3673_v6 }
 0x2de   : > { %v3664_v57 = vpop.f32.mrf.mxu3 }
 0x2df   : > { %v3665_v17 = vadd.f32 %v3664_v57, %v3651_v14 }
 0x2e1   : > { %v3670_v56 = vmax.f32 %v3665_v17, 0.0 }
 0x2e6   : > { %v3666_v18 = vpop.f32.mrf.mxu3 }
 0x2e7   : > { %v3667_v58 = vadd.f32 %v3666_v18, %v3653_v15 }
 0x2e9   : > { %v3672_v19 = vmax.f32 %v3667_v58, 0.0 }
 0x2eb   : > { %v3674_v55 = vpack.c.bf16 %v3672_v19, %v3670_v56 }
 0x2ed   : > { %3829 = vmatmul.bf16.vlgmr.msrb.gmra.mxu1 %v3674_v55 }
 0x35a   : > { %v3816_v20 = vpop.f32.mrf.mxu0 }
 0x35b   : > { %v3817_v21 = vadd.f32 %v6039_v50, %v3816_v20 }
 0x362   : > { %v3818_v2 = vpop.f32.mrf.mxu0 }
 0x363   : > { %v3819_v22 = vadd.f32 %v6039_v50, %v3818_v2 }
 0x36a   : > { %v3830_v16 = vpop.f32.mrf.mxu1 }
 0x36b   : > { %v3831_v62 = vadd.f32 %v3830_v16, %v3817_v21 }
 0x36d   : > { %3836 = vst.msk [vmem:[%s479_s28] sm:$0xff] %vm3835_vm1, %v3831_v62 }
 0x372   : > { %v3832_v26 = vpop.f32.mrf.mxu1 }
 0x373   : > { %v3833_v28 = vadd.f32 %v3832_v26, %v3819_v22 }
 0x375   : > { %3837 = vst.msk [vmem:[%s479_s28 + $0x8] sm:$0xff] %vm3835_vm1, %v3833_v28 }
 0x376 PF: > { %s26_s19 = sadd.s32 1, %s6178_s19  }
 0x377   : > { %p23_p7 = scmp.ge.s32.totalorder %s26_s19, 4  }
 0x379   :  { %25 = sbr.rel (!%p23_p7) target bundleno = 6 (0x6), region = 114 }
 0x37e   :  { %3860 = vsyncpa [#allocation4], 1 }
 0x37f   :  { %3862 = vsyncpa [#allocation4 + $0x1], 1 }
 0x380   :  { %3863 = vsyncpa [#allocation6], 1 }
 0x381   :  { %3864 = vsyncpa [#allocation9], 1 }

</bundles_post_ra>
